<compile_context>
chip_gen: v7x
topology: tpu7x:2x2x1
jax: 0.10.0
libtpu: 0.0.40
codegen_flags: <defaults>
</compile_context>

<pallas_src>
import functools

import jax
import jax.numpy as jnp
from jax import lax
from jax.experimental import pallas as pl
from jax.experimental.pallas import tpu as pltpu

LN_EPS = 1e-5                 # nn.LayerNorm default
_SQRT_HALF = 0.7071067811865476


def _layernorm(x, gamma, beta):
    # One-pass form: var = E[x^2] - mu^2 (biased, like torch.nn.LayerNorm).
    mu = jnp.mean(x, axis=-1, keepdims=True)
    var = jnp.maximum(jnp.mean(x * x, axis=-1, keepdims=True) - mu * mu, 0.0)
    return (x - mu) * lax.rsqrt(var + LN_EPS) * gamma + beta


def encoder_kernel(x_ref, pos_ref,
                   g1_ref, b1_ref, wqkv_ref, wproj_ref, bproj_ref,
                   g2_ref, b2_ref, w1_ref, bb1_ref, w2_ref, bb2_ref,
                   o_ref, *, num_heads, bblk, seq):
    layer = pl.program_id(1)

    # Seed the VMEM-resident state with the kernel input at the first layer.
    @pl.when(layer == 0)
    def _seed():
        o_ref[...] = x_ref[...].astype(o_ref.dtype)

    C = o_ref.shape[-1]
    hd = C // num_heads
    M = bblk * seq

    # x_l + pos, flattened so every dense matmul sees M = bblk*N rows.
    inp = (o_ref[...] + pos_ref[...].astype(o_ref.dtype)).reshape(M, C)  # f32

    # ---------------- attention branch ----------------
    ln1 = _layernorm(inp, g1_ref[0], b1_ref[0])
    # wqkv has the attention scale pre-folded into its Q columns (host-side).
    qkv = jnp.dot(ln1.astype(jnp.bfloat16), wqkv_ref[0],
                  preferred_element_type=jnp.float32)          # (M, 3C) f32
    # Free leading-dim split to (bblk, seq, 3C); one wholesale cast to bf16.
    qkv = qkv.reshape(bblk, seq, 3 * C).astype(jnp.bfloat16)

    # Per-head attention, batched over the whole batch block (no per-(b,h)
    # slicing / stacking; the only remaining loop is over num_heads).
    ctx_heads = []
    for h in range(num_heads):
        c0 = h * hd
        qh = qkv[:, :, c0:c0 + hd]                             # (bblk, seq, hd)
        kh = qkv[:, :, C + c0:C + c0 + hd]
        vh = qkv[:, :, 2 * C + c0:2 * C + c0 + hd]
        s = jnp.einsum('bnd,bmd->bnm', qh, kh,
                       preferred_element_type=jnp.float32)     # (bblk, seq, seq)
        s = s - jnp.max(s, axis=-1, keepdims=True)
        p = jnp.exp(s)
        p = p * pl.reciprocal(jnp.sum(p, axis=-1, keepdims=True), approx=True)
        ctx_heads.append(
            jnp.einsum('bnm,bmd->bnd', p.astype(jnp.bfloat16), vh,
                       preferred_element_type=jnp.float32).astype(jnp.bfloat16))

    # Single lane-dense merge of heads -> (M, C) feeding the proj matmul.
    ctx = jnp.concatenate(ctx_heads, axis=-1).reshape(M, C)     # bf16 (M, C)
    attn_out = jnp.dot(ctx, wproj_ref[0],
                       preferred_element_type=jnp.float32) + bproj_ref[0]

    x1 = inp + attn_out                                         # residual 1

    # ---------------- MLP branch ----------------
    # TODO(synk): for production shapes on v7x (64 MiB VMEM), tile the MLP (and
    # attention over KV) in row chunks of M so the (M, H) intermediate fits.
    ln2 = _layernorm(x1, g2_ref[0], b2_ref[0])
    h1 = jnp.dot(ln2.astype(jnp.bfloat16), w1_ref[0],
                 preferred_element_type=jnp.float32) + bb1_ref[0]
    # Exact GELU (PyTorch nn.GELU default): 0.5*x*(1+erf(x/sqrt(2))).  Kept in
    # f32 for parity with the reference (tanh/bf16 variant would be faster on
    # v6e/v7x but diverges slightly).
    h1 = 0.5 * h1 * (1.0 + lax.erf(h1 * jnp.float32(_SQRT_HALF)))
    mlp_out = jnp.dot(h1.astype(jnp.bfloat16), w2_ref[0],
                      preferred_element_type=jnp.float32) + bb2_ref[0]

    o_ref[...] = (x1 + mlp_out).reshape(bblk, seq, C).astype(o_ref.dtype)


def _tpu_target_info():
    """(num_tensorcores, vmem_limit_bytes) for the local TPU generation."""
    kind = ""
    try:
        kind = jax.devices()[0].device_kind.lower()
    except Exception:
        pass
    is_v7 = ("v7" in kind) or ("tpu7" in kind)
    # v7x: 2 TensorCores / chip, 64 MiB VMEM per core -> stay under it.
    # v5e / v6e: 1 TensorCore, 128 MiB VMEM (default scoped limit 16/32 MiB).
    num_tc = 2 if is_v7 else 1
    vmem_limit = (48 if is_v7 else 64) * 1024 * 1024
    return num_tc, vmem_limit


def transformer_encoder(x, pos, params, num_heads):
    """Mirrors TransformerEncoder.forward: for block in blocks: x = block(x + pos)."""
    B, N, C = x.shape
    depth = params["wqkv"].shape[0]
    H = params["w1"].shape[-1]
    assert C % num_heads == 0
    # Lane-dense matmul outputs (avoid masked partial stores / relayouts).
    assert C % 128 == 0, "embed_dim must be a multiple of 128 (pad host-side)"
    assert H % 128 == 0, "mlp hidden dim must be a multiple of 128 (pad host-side)"

    num_tc, vmem_limit = _tpu_target_info()
    # Split the batch across TensorCores only when there is more than one TC
    # AND each core still gets >= 256 matmul rows (v6e/v7x MXU is 256 wide).
    splits = 1
    if num_tc > 1 and B % num_tc == 0 and (B // num_tc) * N >= 256:
        splits = num_tc
    bblk = B // splits
    assert (bblk * N) % 8 == 0, "rows per batch block must be a multiple of 8"

    kernel = functools.partial(encoder_kernel, num_heads=num_heads,
                               bblk=bblk, seq=N)

    batch_map = lambda s, l: (s, 0, 0)   # varies with split, resident over layers
    layer_map = lambda s, l: (l, 0, 0)   # per-layer weights, pipelined over depth

    out = pl.pallas_call(
        kernel,
        # Carried layer-to-layer state is kept in f32 regardless of input dtype.
        out_shape=jax.ShapeDtypeStruct((B, N, C), jnp.float32),
        grid=(splits, depth),
        in_specs=[
            pl.BlockSpec((bblk, N, C), batch_map),    # x
            pl.BlockSpec((bblk, N, C), batch_map),    # pos
            pl.BlockSpec((1, 1, C), layer_map),       # norm1 gamma (f32)
            pl.BlockSpec((1, 1, C), layer_map),       # norm1 beta  (f32)
            pl.BlockSpec((1, C, 3 * C), layer_map),   # qkv weight  (bf16, q pre-scaled)
            pl.BlockSpec((1, C, C), layer_map),       # proj weight (bf16)
            pl.BlockSpec((1, 1, C), layer_map),       # proj bias   (f32)
            pl.BlockSpec((1, 1, C), layer_map),       # norm2 gamma (f32)
            pl.BlockSpec((1, 1, C), layer_map),       # norm2 beta  (f32)
            pl.BlockSpec((1, C, H), layer_map),       # fc1 weight  (bf16)
            pl.BlockSpec((1, 1, H), layer_map),       # fc1 bias    (f32)
            pl.BlockSpec((1, H, C), layer_map),       # fc2 weight  (bf16)
            pl.BlockSpec((1, 1, C), layer_map),       # fc2 bias    (f32)
        ],
        out_specs=pl.BlockSpec((bblk, N, C), batch_map),
        compiler_params=pltpu.CompilerParams(
            dimension_semantics=("parallel", "arbitrary"),
            vmem_limit_bytes=vmem_limit),
    )(x, pos, params["g1"], params["b1"], params["wqkv"], params["wproj"],
      params["bproj"], params["g2"], params["b2"], params["w1"],
      params["bb1"], params["w2"], params["bb2"])
    return out.astype(x.dtype)


def init_block_params(key, C, H):
    ks = jax.random.split(key, 6)
    std = 0.02
    return {
        "g1": jnp.ones((1, C), jnp.float32),
        "b1": jnp.zeros((1, C), jnp.float32),
        "wqkv": std * jax.random.normal(ks[0], (C, 3 * C), jnp.float32),
        "wproj": std * jax.random.normal(ks[1], (C, C), jnp.float32),
        "bproj": std * jax.random.normal(ks[2], (1, C), jnp.float32),
        "g2": jnp.ones((1, C), jnp.float32),
        "b2": jnp.zeros((1, C), jnp.float32),
        "w1": std * jax.random.normal(ks[3], (C, H), jnp.float32),
        "bb1": std * jax.random.normal(ks[4], (1, H), jnp.float32),
        "w2": std * jax.random.normal(ks[5], (H, C), jnp.float32),
        "bb2": jnp.zeros((1, C), jnp.float32),
    }


_MATMUL_WEIGHTS = ("wqkv", "wproj", "w1", "w2")


def stack_params(layer_params, num_heads):
    """Stack per-layer params over depth, fold the attention scale into the Q
    columns of wqkv (one-time, host-side), and cast matmul weights to bf16."""
    stacked = {k: jnp.stack([p[k] for p in layer_params], axis=0)
               for k in layer_params[0]}
    C = stacked["wqkv"].shape[1]
    scale = float((C // num_heads) ** -0.5)        # qk_scale=None default
    stacked["wqkv"] = stacked["wqkv"].at[:, :, :C].multiply(scale)
    for k in _MATMUL_WEIGHTS:
        stacked[k] = stacked[k].astype(jnp.bfloat16)
    return stacked


if __name__ == "__main__":
    # Small shapes consistent with the module's forward (embed_dim=C, depth=4).
    B, N, C = 4, 32, 128
    depth, num_heads, mlp_ratio = 4, 4, 4.0
    H = int(C * mlp_ratio)

    key = jax.random.PRNGKey(0)
    kx, kpos, kparams = jax.random.split(key, 3)
    x = jax.random.normal(kx, (B, N, C), jnp.float32)
    pos = jax.random.normal(kpos, (B, N, C), jnp.float32)

    params = stack_params([init_block_params(k, C, H)
                           for k in jax.random.split(kparams, depth)],
                          num_heads)

    # TODO(synk): dropout / DropPath are identity at rate 0.0 (eval), so omitted.
    out = transformer_encoder(x, pos, params, num_heads)
    jax.block_until_ready(out)
    assert out.shape == (B, N, C)
    print("KERNEL_OK")
</pallas_src>

<mosaic_0001>
module attributes {stable_mosaic.version = 11 : i64} {
  func.func @encoder_kernel(%arg0: i32, %arg1: i32, %arg2: memref<4x32x128xf32, #tpu.memory_space<vmem>>, %arg3: memref<4x32x128xf32, #tpu.memory_space<vmem>>, %arg4: memref<1x1x128xf32, #tpu.memory_space<vmem>>, %arg5: memref<1x1x128xf32, #tpu.memory_space<vmem>>, %arg6: memref<1x128x384xbf16, #tpu.memory_space<vmem>>, %arg7: memref<1x128x128xbf16, #tpu.memory_space<vmem>>, %arg8: memref<1x1x128xf32, #tpu.memory_space<vmem>>, %arg9: memref<1x1x128xf32, #tpu.memory_space<vmem>>, %arg10: memref<1x1x128xf32, #tpu.memory_space<vmem>>, %arg11: memref<1x128x512xbf16, #tpu.memory_space<vmem>>, %arg12: memref<1x1x512xf32, #tpu.memory_space<vmem>>, %arg13: memref<1x512x128xbf16, #tpu.memory_space<vmem>>, %arg14: memref<1x1x128xf32, #tpu.memory_space<vmem>>, %arg15: memref<4x32x128xf32, #tpu.memory_space<vmem>>) attributes {dimension_semantics = [#tpu.dimension_semantics<parallel>, #tpu.dimension_semantics<arbitrary>], iteration_bounds = array<i64: 1, 4>, scalar_prefetch = 0 : i64, scratch_operands = 0 : i64, tpu.core_type = #tpu.core_type<tc>, window_params = [{transform_indices = @transform_0, window_bounds = array<i64: 4, 32, 128>}, {transform_indices = @transform_1, window_bounds = array<i64: 4, 32, 128>}, {transform_indices = @transform_2, window_bounds = array<i64: 1, 1, 128>}, {transform_indices = @transform_3, window_bounds = array<i64: 1, 1, 128>}, {transform_indices = @transform_4, window_bounds = array<i64: 1, 128, 384>}, {transform_indices = @transform_5, window_bounds = array<i64: 1, 128, 128>}, {transform_indices = @transform_6, window_bounds = array<i64: 1, 1, 128>}, {transform_indices = @transform_7, window_bounds = array<i64: 1, 1, 128>}, {transform_indices = @transform_8, window_bounds = array<i64: 1, 1, 128>}, {transform_indices = @transform_9, window_bounds = array<i64: 1, 128, 512>}, {transform_indices = @transform_10, window_bounds = array<i64: 1, 1, 512>}, {transform_indices = @transform_11, window_bounds = array<i64: 1, 512, 128>}, {transform_indices = @transform_12, window_bounds = array<i64: 1, 1, 128>}, {transform_indices = @transform_13, window_bounds = array<i64: 4, 32, 128>}]} {
    %c0_i32 = arith.constant 0 : i32
    %0 = arith.cmpi eq, %arg1, %c0_i32 : i32
    %1 = arith.extui %0 : i1 to i32
    %c0_i32_0 = arith.constant 0 : i32
    %2 = arith.cmpi ne, %1, %c0_i32_0 : i32
    scf.if %2 {
      %c0_76 = arith.constant 0 : index
      %c0_77 = arith.constant 0 : index
      %c0_78 = arith.constant 0 : index
      %174 = vector.load %arg2[%c0_76, %c0_77, %c0_78] : memref<4x32x128xf32, #tpu.memory_space<vmem>>, vector<4x32x128xf32>
      %c0_79 = arith.constant 0 : index
      %c0_80 = arith.constant 0 : index
      %c0_81 = arith.constant 0 : index
      %175 = vector.load %arg15[%c0_79, %c0_80, %c0_81] : memref<4x32x128xf32, #tpu.memory_space<vmem>>, vector<4x32x128xf32>
      tpu.vector_store %arg15[%c0_79, %c0_80, %c0_81], %174 {strides = array<i32>} : memref<4x32x128xf32, #tpu.memory_space<vmem>>, vector<4x32x128xf32>,
    } else {
    }
    %c0 = arith.constant 0 : index
    %c0_1 = arith.constant 0 : index
    %c0_2 = arith.constant 0 : index
    %3 = vector.load %arg15[%c0, %c0_1, %c0_2] : memref<4x32x128xf32, #tpu.memory_space<vmem>>, vector<4x32x128xf32>
    %c0_3 = arith.constant 0 : index
    %c0_4 = arith.constant 0 : index
    %c0_5 = arith.constant 0 : index
    %4 = vector.load %arg3[%c0_3, %c0_4, %c0_5] : memref<4x32x128xf32, #tpu.memory_space<vmem>>, vector<4x32x128xf32>
    %5 = arith.addf %3, %4 : vector<4x32x128xf32>
    %6 = vector.shape_cast %5 : vector<4x32x128xf32> to vector<128x128xf32>
    %c0_6 = arith.constant 0 : index
    %c0_7 = arith.constant 0 : index
    %c0_8 = arith.constant 0 : index
    %7 = vector.load %arg4[%c0_6, %c0_7, %c0_8] : memref<1x1x128xf32, #tpu.memory_space<vmem>>, vector<1x1x128xf32>
    %8 = vector.shape_cast %7 : vector<1x1x128xf32> to vector<1x128xf32>
    %c0_9 = arith.constant 0 : index
    %c0_10 = arith.constant 0 : index
    %c0_11 = arith.constant 0 : index
    %9 = vector.load %arg5[%c0_9, %c0_10, %c0_11] : memref<1x1x128xf32, #tpu.memory_space<vmem>>, vector<1x1x128xf32>
    %10 = vector.shape_cast %9 : vector<1x1x128xf32> to vector<1x128xf32>
    %cst = arith.constant dense<0.000000e+00> : vector<128xf32>
    %11 = vector.multi_reduction <add>, %6, %cst [1] : vector<128x128xf32> to vector<128xf32>
    %12 = vector.shape_cast %11 : vector<128xf32> to vector<128x1xf32>
    %cst_12 = arith.constant 1.280000e+02 : f32
    %13 = vector.broadcast %cst_12 : f32 to vector<128x1xf32>
    %14 = arith.divf %12, %13 : vector<128x1xf32>
    %15 = arith.mulf %6, %6 : vector<128x128xf32>
    %cst_13 = arith.constant dense<0.000000e+00> : vector<128xf32>
    %16 = vector.multi_reduction <add>, %15, %cst_13 [1] : vector<128x128xf32> to vector<128xf32>
    %17 = vector.shape_cast %16 : vector<128xf32> to vector<128x1xf32>
    %cst_14 = arith.constant 1.280000e+02 : f32
    %18 = vector.broadcast %cst_14 : f32 to vector<128x1xf32>
    %19 = arith.divf %17, %18 : vector<128x1xf32>
    %20 = arith.mulf %14, %14 : vector<128x1xf32>
    %21 = arith.subf %19, %20 : vector<128x1xf32>
    %cst_15 = arith.constant 0.000000e+00 : f32
    %22 = vector.broadcast %cst_15 : f32 to vector<128x1xf32>
    %23 = arith.maximumf %21, %22 : vector<128x1xf32>
    %24 = vector.broadcast %14 : vector<128x1xf32> to vector<128x128xf32>
    %25 = arith.subf %6, %24 : vector<128x128xf32>
    %cst_16 = arith.constant 9.99999974E-6 : f32
    %26 = vector.broadcast %cst_16 : f32 to vector<128x1xf32>
    %27 = arith.addf %23, %26 : vector<128x1xf32>
    %28 = math.rsqrt %27 : vector<128x1xf32>
    %29 = vector.broadcast %28 : vector<128x1xf32> to vector<128x128xf32>
    %30 = arith.mulf %25, %29 : vector<128x128xf32>
    %31 = vector.broadcast %8 : vector<1x128xf32> to vector<128x128xf32>
    %32 = arith.mulf %30, %31 : vector<128x128xf32>
    %33 = vector.broadcast %10 : vector<1x128xf32> to vector<128x128xf32>
    %34 = arith.addf %32, %33 : vector<128x128xf32>
    %35 = arith.truncf %34 : vector<128x128xf32> to vector<128x128xbf16>
    %c0_17 = arith.constant 0 : index
    %c0_18 = arith.constant 0 : index
    %c0_19 = arith.constant 0 : index
    %36 = vector.load %arg6[%c0_17, %c0_18, %c0_19] : memref<1x128x384xbf16, #tpu.memory_space<vmem>>, vector<1x128x384xbf16>
    %37 = vector.shape_cast %36 : vector<1x128x384xbf16> to vector<128x384xbf16>
    %cst_20 = arith.constant dense<0.000000e+00> : vector<128x384xf32>
    %38 = tpu.matmul %35, %37, %cst_20 {dimension_numbers = #tpu.dot_dimension_numbers<[1], [0], [0], [1], [0, 0, 1, 1], [], []>} : vector<128x128xbf16>, vector<128x384xbf16>, vector<128x384xf32> -> vector<128x384xf32>
    %39 = vector.shape_cast %38 : vector<128x384xf32> to vector<4x32x384xf32>
    %40 = arith.truncf %39 : vector<4x32x384xf32> to vector<4x32x384xbf16>
    %41 = vector.extract_strided_slice %40 {offsets = [0, 0, 0], sizes = [4, 32, 32], strides = [1, 1, 1]} : vector<4x32x384xbf16> to vector<4x32x32xbf16>
    %42 = vector.extract_strided_slice %40 {offsets = [0, 0, 128], sizes = [4, 32, 32], strides = [1, 1, 1]} : vector<4x32x384xbf16> to vector<4x32x32xbf16>
    %43 = vector.extract_strided_slice %40 {offsets = [0, 0, 256], sizes = [4, 32, 32], strides = [1, 1, 1]} : vector<4x32x384xbf16> to vector<4x32x32xbf16>
    "tpu.trace_start"() <{level = 10 : i32, message = "bnd,bmd->bnm"}> : () -> ()
    %cst_21 = arith.constant dense<0.000000e+00> : vector<4x32x32xf32>
    %44 = tpu.matmul %41, %42, %cst_21 {dimension_numbers = #tpu.dot_dimension_numbers<[2], [2], [1], [1], [0, 0, 0, 1, 1, 1], [0], [0]>} : vector<4x32x32xbf16>, vector<4x32x32xbf16>, vector<4x32x32xf32> -> vector<4x32x32xf32>
    "tpu.trace_stop"() : () -> ()
    %cst_22 = arith.constant dense<0xFF800000> : vector<4x32xf32>
    %45 = vector.multi_reduction <maximumf>, %44, %cst_22 [2] : vector<4x32x32xf32> to vector<4x32xf32>
    %46 = vector.shape_cast %45 : vector<4x32xf32> to vector<4x32x1xf32>
    %47 = vector.broadcast %46 : vector<4x32x1xf32> to vector<4x32x32xf32>
    %48 = arith.subf %44, %47 : vector<4x32x32xf32>
    %49 = math.exp %48 : vector<4x32x32xf32>
    %cst_23 = arith.constant dense<0.000000e+00> : vector<4x32xf32>
    %50 = vector.multi_reduction <add>, %49, %cst_23 [2] : vector<4x32x32xf32> to vector<4x32xf32>
    %51 = vector.shape_cast %50 : vector<4x32xf32> to vector<4x32x1xf32>
    %52 = tpu.reciprocal %51 {approx = true} : vector<4x32x1xf32> -> vector<4x32x1xf32>
    %53 = vector.broadcast %52 : vector<4x32x1xf32> to vector<4x32x32xf32>
    %54 = arith.mulf %49, %53 : vector<4x32x32xf32>
    %55 = arith.truncf %54 : vector<4x32x32xf32> to vector<4x32x32xbf16>
    "tpu.trace_start"() <{level = 10 : i32, message = "bnm,bmd->bnd"}> : () -> ()
    %cst_24 = arith.constant dense<0.000000e+00> : vector<4x32x32xf32>
    %56 = tpu.matmul %55, %43, %cst_24 {dimension_numbers = #tpu.dot_dimension_numbers<[2], [1], [1], [2], [0, 0, 0, 1, 1, 2], [0], [0]>} : vector<4x32x32xbf16>, vector<4x32x32xbf16>, vector<4x32x32xf32> -> vector<4x32x32xf32>
    "tpu.trace_stop"() : () -> ()
    %57 = arith.truncf %56 : vector<4x32x32xf32> to vector<4x32x32xbf16>
    %58 = vector.extract_strided_slice %40 {offsets = [0, 0, 32], sizes = [4, 32, 32], strides = [1, 1, 1]} : vector<4x32x384xbf16> to vector<4x32x32xbf16>
    %59 = vector.extract_strided_slice %40 {offsets = [0, 0, 160], sizes = [4, 32, 32], strides = [1, 1, 1]} : vector<4x32x384xbf16> to vector<4x32x32xbf16>
    %60 = vector.extract_strided_slice %40 {offsets = [0, 0, 288], sizes = [4, 32, 32], strides = [1, 1, 1]} : vector<4x32x384xbf16> to vector<4x32x32xbf16>
    "tpu.trace_start"() <{level = 10 : i32, message = "bnd,bmd->bnm"}> : () -> ()
    %cst_25 = arith.constant dense<0.000000e+00> : vector<4x32x32xf32>
    %61 = tpu.matmul %58, %59, %cst_25 {dimension_numbers = #tpu.dot_dimension_numbers<[2], [2], [1], [1], [0, 0, 0, 1, 1, 1], [0], [0]>} : vector<4x32x32xbf16>, vector<4x32x32xbf16>, vector<4x32x32xf32> -> vector<4x32x32xf32>
    "tpu.trace_stop"() : () -> ()
    %cst_26 = arith.constant dense<0xFF800000> : vector<4x32xf32>
    %62 = vector.multi_reduction <maximumf>, %61, %cst_26 [2] : vector<4x32x32xf32> to vector<4x32xf32>
    %63 = vector.shape_cast %62 : vector<4x32xf32> to vector<4x32x1xf32>
    %64 = vector.broadcast %63 : vector<4x32x1xf32> to vector<4x32x32xf32>
    %65 = arith.subf %61, %64 : vector<4x32x32xf32>
    %66 = math.exp %65 : vector<4x32x32xf32>
    %cst_27 = arith.constant dense<0.000000e+00> : vector<4x32xf32>
    %67 = vector.multi_reduction <add>, %66, %cst_27 [2] : vector<4x32x32xf32> to vector<4x32xf32>
    %68 = vector.shape_cast %67 : vector<4x32xf32> to vector<4x32x1xf32>
    %69 = tpu.reciprocal %68 {approx = true} : vector<4x32x1xf32> -> vector<4x32x1xf32>
    %70 = vector.broadcast %69 : vector<4x32x1xf32> to vector<4x32x32xf32>
    %71 = arith.mulf %66, %70 : vector<4x32x32xf32>
    %72 = arith.truncf %71 : vector<4x32x32xf32> to vector<4x32x32xbf16>
    "tpu.trace_start"() <{level = 10 : i32, message = "bnm,bmd->bnd"}> : () -> ()
    %cst_28 = arith.constant dense<0.000000e+00> : vector<4x32x32xf32>
    %73 = tpu.matmul %72, %60, %cst_28 {dimension_numbers = #tpu.dot_dimension_numbers<[2], [1], [1], [2], [0, 0, 0, 1, 1, 2], [0], [0]>} : vector<4x32x32xbf16>, vector<4x32x32xbf16>, vector<4x32x32xf32> -> vector<4x32x32xf32>
    "tpu.trace_stop"() : () -> ()
    %74 = arith.truncf %73 : vector<4x32x32xf32> to vector<4x32x32xbf16>
    %75 = vector.extract_strided_slice %40 {offsets = [0, 0, 64], sizes = [4, 32, 32], strides = [1, 1, 1]} : vector<4x32x384xbf16> to vector<4x32x32xbf16>
    %76 = vector.extract_strided_slice %40 {offsets = [0, 0, 192], sizes = [4, 32, 32], strides = [1, 1, 1]} : vector<4x32x384xbf16> to vector<4x32x32xbf16>
    %77 = vector.extract_strided_slice %40 {offsets = [0, 0, 320], sizes = [4, 32, 32], strides = [1, 1, 1]} : vector<4x32x384xbf16> to vector<4x32x32xbf16>
    "tpu.trace_start"() <{level = 10 : i32, message = "bnd,bmd->bnm"}> : () -> ()
    %cst_29 = arith.constant dense<0.000000e+00> : vector<4x32x32xf32>
    %78 = tpu.matmul %75, %76, %cst_29 {dimension_numbers = #tpu.dot_dimension_numbers<[2], [2], [1], [1], [0, 0, 0, 1, 1, 1], [0], [0]>} : vector<4x32x32xbf16>, vector<4x32x32xbf16>, vector<4x32x32xf32> -> vector<4x32x32xf32>
    "tpu.trace_stop"() : () -> ()
    %cst_30 = arith.constant dense<0xFF800000> : vector<4x32xf32>
    %79 = vector.multi_reduction <maximumf>, %78, %cst_30 [2] : vector<4x32x32xf32> to vector<4x32xf32>
    %80 = vector.shape_cast %79 : vector<4x32xf32> to vector<4x32x1xf32>
    %81 = vector.broadcast %80 : vector<4x32x1xf32> to vector<4x32x32xf32>
    %82 = arith.subf %78, %81 : vector<4x32x32xf32>
    %83 = math.exp %82 : vector<4x32x32xf32>
    %cst_31 = arith.constant dense<0.000000e+00> : vector<4x32xf32>
    %84 = vector.multi_reduction <add>, %83, %cst_31 [2] : vector<4x32x32xf32> to vector<4x32xf32>
    %85 = vector.shape_cast %84 : vector<4x32xf32> to vector<4x32x1xf32>
    %86 = tpu.reciprocal %85 {approx = true} : vector<4x32x1xf32> -> vector<4x32x1xf32>
    %87 = vector.broadcast %86 : vector<4x32x1xf32> to vector<4x32x32xf32>
    %88 = arith.mulf %83, %87 : vector<4x32x32xf32>
    %89 = arith.truncf %88 : vector<4x32x32xf32> to vector<4x32x32xbf16>
    "tpu.trace_start"() <{level = 10 : i32, message = "bnm,bmd->bnd"}> : () -> ()
    %cst_32 = arith.constant dense<0.000000e+00> : vector<4x32x32xf32>
    %90 = tpu.matmul %89, %77, %cst_32 {dimension_numbers = #tpu.dot_dimension_numbers<[2], [1], [1], [2], [0, 0, 0, 1, 1, 2], [0], [0]>} : vector<4x32x32xbf16>, vector<4x32x32xbf16>, vector<4x32x32xf32> -> vector<4x32x32xf32>
    "tpu.trace_stop"() : () -> ()
    %91 = arith.truncf %90 : vector<4x32x32xf32> to vector<4x32x32xbf16>
    %92 = vector.extract_strided_slice %40 {offsets = [0, 0, 96], sizes = [4, 32, 32], strides = [1, 1, 1]} : vector<4x32x384xbf16> to vector<4x32x32xbf16>
    %93 = vector.extract_strided_slice %40 {offsets = [0, 0, 224], sizes = [4, 32, 32], strides = [1, 1, 1]} : vector<4x32x384xbf16> to vector<4x32x32xbf16>
    %94 = vector.extract_strided_slice %40 {offsets = [0, 0, 352], sizes = [4, 32, 32], strides = [1, 1, 1]} : vector<4x32x384xbf16> to vector<4x32x32xbf16>
    "tpu.trace_start"() <{level = 10 : i32, message = "bnd,bmd->bnm"}> : () -> ()
    %cst_33 = arith.constant dense<0.000000e+00> : vector<4x32x32xf32>
    %95 = tpu.matmul %92, %93, %cst_33 {dimension_numbers = #tpu.dot_dimension_numbers<[2], [2], [1], [1], [0, 0, 0, 1, 1, 1], [0], [0]>} : vector<4x32x32xbf16>, vector<4x32x32xbf16>, vector<4x32x32xf32> -> vector<4x32x32xf32>
    "tpu.trace_stop"() : () -> ()
    %cst_34 = arith.constant dense<0xFF800000> : vector<4x32xf32>
    %96 = vector.multi_reduction <maximumf>, %95, %cst_34 [2] : vector<4x32x32xf32> to vector<4x32xf32>
    %97 = vector.shape_cast %96 : vector<4x32xf32> to vector<4x32x1xf32>
    %98 = vector.broadcast %97 : vector<4x32x1xf32> to vector<4x32x32xf32>
    %99 = arith.subf %95, %98 : vector<4x32x32xf32>
    %100 = math.exp %99 : vector<4x32x32xf32>
    %cst_35 = arith.constant dense<0.000000e+00> : vector<4x32xf32>
    %101 = vector.multi_reduction <add>, %100, %cst_35 [2] : vector<4x32x32xf32> to vector<4x32xf32>
    %102 = vector.shape_cast %101 : vector<4x32xf32> to vector<4x32x1xf32>
    %103 = tpu.reciprocal %102 {approx = true} : vector<4x32x1xf32> -> vector<4x32x1xf32>
    %104 = vector.broadcast %103 : vector<4x32x1xf32> to vector<4x32x32xf32>
    %105 = arith.mulf %100, %104 : vector<4x32x32xf32>
    %106 = arith.truncf %105 : vector<4x32x32xf32> to vector<4x32x32xbf16>
    "tpu.trace_start"() <{level = 10 : i32, message = "bnm,bmd->bnd"}> : () -> ()
    %cst_36 = arith.constant dense<0.000000e+00> : vector<4x32x32xf32>
    %107 = tpu.matmul %106, %94, %cst_36 {dimension_numbers = #tpu.dot_dimension_numbers<[2], [1], [1], [2], [0, 0, 0, 1, 1, 2], [0], [0]>} : vector<4x32x32xbf16>, vector<4x32x32xbf16>, vector<4x32x32xf32> -> vector<4x32x32xf32>
    "tpu.trace_stop"() : () -> ()
    %108 = arith.truncf %107 : vector<4x32x32xf32> to vector<4x32x32xbf16>
    %109 = tpu.concatenate %57, %74, %91, %108 in 2 : vector<4x32x32xbf16>, vector<4x32x32xbf16>, vector<4x32x32xbf16>, vector<4x32x32xbf16> -> vector<4x32x128xbf16>
    %110 = vector.shape_cast %109 : vector<4x32x128xbf16> to vector<128x128xbf16>
    %c0_37 = arith.constant 0 : index
    %c0_38 = arith.constant 0 : index
    %c0_39 = arith.constant 0 : index
    %111 = vector.load %arg7[%c0_37, %c0_38, %c0_39] : memref<1x128x128xbf16, #tpu.memory_space<vmem>>, vector<1x128x128xbf16>
    %112 = vector.shape_cast %111 : vector<1x128x128xbf16> to vector<128x128xbf16>
    %cst_40 = arith.constant dense<0.000000e+00> : vector<128x128xf32>
    %113 = tpu.matmul %110, %112, %cst_40 {dimension_numbers = #tpu.dot_dimension_numbers<[1], [0], [0], [1], [0, 0, 1, 1], [], []>} : vector<128x128xbf16>, vector<128x128xbf16>, vector<128x128xf32> -> vector<128x128xf32>
    %c0_41 = arith.constant 0 : index
    %c0_42 = arith.constant 0 : index
    %c0_43 = arith.constant 0 : index
    %114 = vector.load %arg8[%c0_41, %c0_42, %c0_43] : memref<1x1x128xf32, #tpu.memory_space<vmem>>, vector<1x1x128xf32>
    %115 = vector.shape_cast %114 : vector<1x1x128xf32> to vector<1x128xf32>
    %116 = vector.broadcast %115 : vector<1x128xf32> to vector<128x128xf32>
    %117 = arith.addf %113, %116 : vector<128x128xf32>
    %118 = arith.addf %6, %117 : vector<128x128xf32>
    %c0_44 = arith.constant 0 : index
    %c0_45 = arith.constant 0 : index
    %c0_46 = arith.constant 0 : index
    %119 = vector.load %arg9[%c0_44, %c0_45, %c0_46] : memref<1x1x128xf32, #tpu.memory_space<vmem>>, vector<1x1x128xf32>
    %120 = vector.shape_cast %119 : vector<1x1x128xf32> to vector<1x128xf32>
    %c0_47 = arith.constant 0 : index
    %c0_48 = arith.constant 0 : index
    %c0_49 = arith.constant 0 : index
    %121 = vector.load %arg10[%c0_47, %c0_48, %c0_49] : memref<1x1x128xf32, #tpu.memory_space<vmem>>, vector<1x1x128xf32>
    %122 = vector.shape_cast %121 : vector<1x1x128xf32> to vector<1x128xf32>
    %cst_50 = arith.constant dense<0.000000e+00> : vector<128xf32>
    %123 = vector.multi_reduction <add>, %118, %cst_50 [1] : vector<128x128xf32> to vector<128xf32>
    %124 = vector.shape_cast %123 : vector<128xf32> to vector<128x1xf32>
    %cst_51 = arith.constant 1.280000e+02 : f32
    %125 = vector.broadcast %cst_51 : f32 to vector<128x1xf32>
    %126 = arith.divf %124, %125 : vector<128x1xf32>
    %127 = arith.mulf %118, %118 : vector<128x128xf32>
    %cst_52 = arith.constant dense<0.000000e+00> : vector<128xf32>
    %128 = vector.multi_reduction <add>, %127, %cst_52 [1] : vector<128x128xf32> to vector<128xf32>
    %129 = vector.shape_cast %128 : vector<128xf32> to vector<128x1xf32>
    %cst_53 = arith.constant 1.280000e+02 : f32
    %130 = vector.broadcast %cst_53 : f32 to vector<128x1xf32>
    %131 = arith.divf %129, %130 : vector<128x1xf32>
    %132 = arith.mulf %126, %126 : vector<128x1xf32>
    %133 = arith.subf %131, %132 : vector<128x1xf32>
    %cst_54 = arith.constant 0.000000e+00 : f32
    %134 = vector.broadcast %cst_54 : f32 to vector<128x1xf32>
    %135 = arith.maximumf %133, %134 : vector<128x1xf32>
    %136 = vector.broadcast %126 : vector<128x1xf32> to vector<128x128xf32>
    %137 = arith.subf %118, %136 : vector<128x128xf32>
    %cst_55 = arith.constant 9.99999974E-6 : f32
    %138 = vector.broadcast %cst_55 : f32 to vector<128x1xf32>
    %139 = arith.addf %135, %138 : vector<128x1xf32>
    %140 = math.rsqrt %139 : vector<128x1xf32>
    %141 = vector.broadcast %140 : vector<128x1xf32> to vector<128x128xf32>
    %142 = arith.mulf %137, %141 : vector<128x128xf32>
    %143 = vector.broadcast %120 : vector<1x128xf32> to vector<128x128xf32>
    %144 = arith.mulf %142, %143 : vector<128x128xf32>
    %145 = vector.broadcast %122 : vector<1x128xf32> to vector<128x128xf32>
    %146 = arith.addf %144, %145 : vector<128x128xf32>
    %147 = arith.truncf %146 : vector<128x128xf32> to vector<128x128xbf16>
    %c0_56 = arith.constant 0 : index
    %c0_57 = arith.constant 0 : index
    %c0_58 = arith.constant 0 : index
    %148 = vector.load %arg11[%c0_56, %c0_57, %c0_58] : memref<1x128x512xbf16, #tpu.memory_space<vmem>>, vector<1x128x512xbf16>
    %149 = vector.shape_cast %148 : vector<1x128x512xbf16> to vector<128x512xbf16>
    %cst_59 = arith.constant dense<0.000000e+00> : vector<128x512xf32>
    %150 = tpu.matmul %147, %149, %cst_59 {dimension_numbers = #tpu.dot_dimension_numbers<[1], [0], [0], [1], [0, 0, 1, 1], [], []>} : vector<128x128xbf16>, vector<128x512xbf16>, vector<128x512xf32> -> vector<128x512xf32>
    %c0_60 = arith.constant 0 : index
    %c0_61 = arith.constant 0 : index
    %c0_62 = arith.constant 0 : index
    %151 = vector.load %arg12[%c0_60, %c0_61, %c0_62] : memref<1x1x512xf32, #tpu.memory_space<vmem>>, vector<1x1x512xf32>
    %152 = vector.shape_cast %151 : vector<1x1x512xf32> to vector<1x512xf32>
    %153 = vector.broadcast %152 : vector<1x512xf32> to vector<128x512xf32>
    %154 = arith.addf %150, %153 : vector<128x512xf32>
    %cst_63 = arith.constant 5.000000e-01 : f32
    %155 = vector.broadcast %cst_63 : f32 to vector<128x512xf32>
    %156 = arith.mulf %155, %154 : vector<128x512xf32>
    %cst_64 = arith.constant 0.707106769 : f32
    %157 = vector.broadcast %cst_64 : f32 to vector<128x512xf32>
    %158 = arith.mulf %154, %157 : vector<128x512xf32>
    %159 = math.erf %158 : vector<128x512xf32>
    %cst_65 = arith.constant 1.000000e+00 : f32
    %160 = vector.broadcast %cst_65 : f32 to vector<128x512xf32>
    %161 = arith.addf %160, %159 : vector<128x512xf32>
    %162 = arith.mulf %156, %161 : vector<128x512xf32>
    %163 = arith.truncf %162 : vector<128x512xf32> to vector<128x512xbf16>
    %c0_66 = arith.constant 0 : index
    %c0_67 = arith.constant 0 : index
    %c0_68 = arith.constant 0 : index
    %164 = vector.load %arg13[%c0_66, %c0_67, %c0_68] : memref<1x512x128xbf16, #tpu.memory_space<vmem>>, vector<1x512x128xbf16>
    %165 = vector.shape_cast %164 : vector<1x512x128xbf16> to vector<512x128xbf16>
    %cst_69 = arith.constant dense<0.000000e+00> : vector<128x128xf32>
    %166 = tpu.matmul %163, %165, %cst_69 {dimension_numbers = #tpu.dot_dimension_numbers<[1], [0], [0], [1], [0, 0, 1, 1], [], []>} : vector<128x512xbf16>, vector<512x128xbf16>, vector<128x128xf32> -> vector<128x128xf32>
    %c0_70 = arith.constant 0 : index
    %c0_71 = arith.constant 0 : index
    %c0_72 = arith.constant 0 : index
    %167 = vector.load %arg14[%c0_70, %c0_71, %c0_72] : memref<1x1x128xf32, #tpu.memory_space<vmem>>, vector<1x1x128xf32>
    %168 = vector.shape_cast %167 : vector<1x1x128xf32> to vector<1x128xf32>
    %169 = vector.broadcast %168 : vector<1x128xf32> to vector<128x128xf32>
    %170 = arith.addf %166, %169 : vector<128x128xf32>
    %171 = arith.addf %118, %170 : vector<128x128xf32>
    %172 = vector.shape_cast %171 : vector<128x128xf32> to vector<4x32x128xf32>
    %c0_73 = arith.constant 0 : index
    %c0_74 = arith.constant 0 : index
    %c0_75 = arith.constant 0 : index
    %173 = vector.load %arg15[%c0_73, %c0_74, %c0_75] : memref<4x32x128xf32, #tpu.memory_space<vmem>>, vector<4x32x128xf32>
    tpu.vector_store %arg15[%c0_73, %c0_74, %c0_75], %172 {strides = array<i32>} : memref<4x32x128xf32, #tpu.memory_space<vmem>>, vector<4x32x128xf32>,
    return
  }
  func.func @transform_0(%arg0: i32, %arg1: i32) -> (i32, i32, i32) {
    %c0_i32 = arith.constant 0 : i32
    %c0_i32_0 = arith.constant 0 : i32
    %c0_i32_1 = arith.constant 0 : i32
    return %arg0, %c0_i32, %c0_i32_0 : i32, i32, i32
  }
  func.func @transform_1(%arg0: i32, %arg1: i32) -> (i32, i32, i32) {
    %c0_i32 = arith.constant 0 : i32
    %c0_i32_0 = arith.constant 0 : i32
    %c0_i32_1 = arith.constant 0 : i32
    return %arg0, %c0_i32, %c0_i32_0 : i32, i32, i32
  }
  func.func @transform_2(%arg0: i32, %arg1: i32) -> (i32, i32, i32) {
    %c0_i32 = arith.constant 0 : i32
    %c0_i32_0 = arith.constant 0 : i32
    %c0_i32_1 = arith.constant 0 : i32
    return %arg1, %c0_i32, %c0_i32_0 : i32, i32, i32
  }
  func.func @transform_3(%arg0: i32, %arg1: i32) -> (i32, i32, i32) {
    %c0_i32 = arith.constant 0 : i32
    %c0_i32_0 = arith.constant 0 : i32
    %c0_i32_1 = arith.constant 0 : i32
    return %arg1, %c0_i32, %c0_i32_0 : i32, i32, i32
  }
  func.func @transform_4(%arg0: i32, %arg1: i32) -> (i32, i32, i32) {
    %c0_i32 = arith.constant 0 : i32
    %c0_i32_0 = arith.constant 0 : i32
    %c0_i32_1 = arith.constant 0 : i32
    return %arg1, %c0_i32, %c0_i32_0 : i32, i32, i32
  }
  func.func @transform_5(%arg0: i32, %arg1: i32) -> (i32, i32, i32) {
    %c0_i32 = arith.constant 0 : i32
    %c0_i32_0 = arith.constant 0 : i32
    %c0_i32_1 = arith.constant 0 : i32
    return %arg1, %c0_i32, %c0_i32_0 : i32, i32, i32
  }
  func.func @transform_6(%arg0: i32, %arg1: i32) -> (i32, i32, i32) {
    %c0_i32 = arith.constant 0 : i32
    %c0_i32_0 = arith.constant 0 : i32
    %c0_i32_1 = arith.constant 0 : i32
    return %arg1, %c0_i32, %c0_i32_0 : i32, i32, i32
  }
  func.func @transform_7(%arg0: i32, %arg1: i32) -> (i32, i32, i32) {
    %c0_i32 = arith.constant 0 : i32
    %c0_i32_0 = arith.constant 0 : i32
    %c0_i32_1 = arith.constant 0 : i32
    return %arg1, %c0_i32, %c0_i32_0 : i32, i32, i32
  }
  func.func @transform_8(%arg0: i32, %arg1: i32) -> (i32, i32, i32) {
    %c0_i32 = arith.constant 0 : i32
    %c0_i32_0 = arith.constant 0 : i32
    %c0_i32_1 = arith.constant 0 : i32
    return %arg1, %c0_i32, %c0_i32_0 : i32, i32, i32
  }
  func.func @transform_9(%arg0: i32, %arg1: i32) -> (i32, i32, i32) {
    %c0_i32 = arith.constant 0 : i32
    %c0_i32_0 = arith.constant 0 : i32
    %c0_i32_1 = arith.constant 0 : i32
    return %arg1, %c0_i32, %c0_i32_0 : i32, i32, i32
  }
  func.func @transform_10(%arg0: i32, %arg1: i32) -> (i32, i32, i32) {
    %c0_i32 = arith.constant 0 : i32
    %c0_i32_0 = arith.constant 0 : i32
    %c0_i32_1 = arith.constant 0 : i32
    return %arg1, %c0_i32, %c0_i32_0 : i32, i32, i32
  }
  func.func @transform_11(%arg0: i32, %arg1: i32) -> (i32, i32, i32) {
    %c0_i32 = arith.constant 0 : i32
    %c0_i32_0 = arith.constant 0 : i32
    %c0_i32_1 = arith.constant 0 : i32
    return %arg1, %c0_i32, %c0_i32_0 : i32, i32, i32
  }
  func.func @transform_12(%arg0: i32, %arg1: i32) -> (i32, i32, i32) {
    %c0_i32 = arith.constant 0 : i32
    %c0_i32_0 = arith.constant 0 : i32
    %c0_i32_1 = arith.constant 0 : i32
    return %arg1, %c0_i32, %c0_i32_0 : i32, i32, i32
  }
  func.func @transform_13(%arg0: i32, %arg1: i32) -> (i32, i32, i32) {
    %c0_i32 = arith.constant 0 : i32
    %c0_i32_0 = arith.constant 0 : i32
    %c0_i32_1 = arith.constant 0 : i32
    return %arg0, %c0_i32, %c0_i32_0 : i32, i32, i32
  }
}

</mosaic_0001>

<bundles_post_ra>
// kernel: tpu_custom_call.1
= control target key start
LH: loop header
LB: loop body
LE: loop exit
PB: predicated region body
PF: predicated region fallthrough
CT: control target
= control target key end

     0   :  { %s11372_s0 = inlined_call_operand.hbm [shape: f32[4,32,128], index: 0, kind: input, shape index: {}]   ;;  %s11373_s1 = inlined_call_operand.hbm [shape: f32[4,32,128], index: 1, kind: input, shape index: {}]   ;;  %s11374_s2 = inlined_call_operand.hbm [shape: f32[4,1,128], index: 2, kind: input, shape index: {}]   ;;  %s11375_s3 = inlined_call_operand.hbm [shape: f32[4,1,128], index: 3, kind: input, shape index: {}]   ;;  %s11376_s4 = inlined_call_operand.hbm [shape: bf16[4,128,384], index: 4, kind: input, shape index: {}]   ;;  %s11377_s5 = inlined_call_operand.hbm [shape: bf16[4,128,128], index: 5, kind: input, shape index: {}]   ;;  %s11378_s6 = inlined_call_operand.hbm [shape: f32[4,1,128], index: 6, kind: input, shape index: {}]   ;;  %s11379_s7 = inlined_call_operand.hbm [shape: f32[4,1,128], index: 7, kind: input, shape index: {}]   ;;  %s11380_s8 = inlined_call_operand.hbm [shape: f32[4,1,128], index: 8, kind: input, shape index: {}]   ;;  %s11381_s9 = inlined_call_operand.hbm [shape: bf16[4,128,512], index: 9, kind: input, shape index: {}]   ;;  %s11382_s10 = inlined_call_operand.hbm [shape: f32[4,1,512], index: 10, kind: input, shape index: {}]   ;;  %s11383_s11 = inlined_call_operand.hbm [shape: bf16[4,512,128], index: 11, kind: input, shape index: {}]   ;;  %s11384_s12 = inlined_call_operand.hbm [shape: f32[4,1,128], index: 12, kind: input, shape index: {}]   ;;  %s11385_s13 = inlined_call_operand.hbm [shape: f32[4,32,128], index: 13, kind: output, shape index: {}]  }
   0x1   :  { %11464 = sst [smem:[#allocation71_spill]] %s11372_s0 }
   0x2   :  { %11465 = sst [smem:[#allocation72_spill]] %s11374_s2 }
   0x3   :  { %11466 = sst [smem:[#allocation73_spill]] %s11375_s3 }
   0x4   :  { %11467 = sst [smem:[#allocation74_spill]] %s11376_s4 }
   0x5   :  { %11468 = sst [smem:[#allocation75_spill]] %s11385_s13 }
   0x6   :  { %18 = vsyncpa [#allocation3], 0 }
   0x7   :  { %19 = vsyncpa [#allocation6], 0 }
   0x8   :  { %20 = vsyncpa [#allocation4], 0  ;;  %s8717_s25 = smov 0   ;;  %s8719_s26 = smov 0  }
   0x9   :  { %s8721_s27 = smov 0   ;;  %s8723_s28 = smov 0  }
   0xa   :  { %s8725_s29 = smov 0   ;;  %s8727_s30 = smov 0  }
   0xb LB: > { %11469 = sst [smem:[#allocation23_spill]] %s8601_s26  ;;  %s8746_s14 = sadd.s32 4294967295, %s8617_s30   ;;  %s8617_s30 = sphi %s8727_s30, %s26_s30   ;;  %s8613_s29 = sphi %s8725_s29, %s11638_s29   ;;  %s8609_s28 = sphi %s8723_s28, %s11637_s28   ;;  %s8605_s27 = sphi %s8721_s27, %s11635_s27   ;;  %s8601_s26 = sphi %s8719_s26, %s11634_s26   ;;  %s8597_s25 = sphi %s8717_s25, %s11633_s25  }
   0xc   : > { %11470 = sst [smem:[#allocation24_spill]] %s8605_s27  ;;  %s35_s15 = sadd.s32 1, %s8613_s29 }
   0xd   : > { %11471 = sst [smem:[#allocation25_spill]] %s8609_s28  ;;  %p36_p0 = scmp.ge.s32.totalorder %s35_s15, 4 }
   0xe   : > { %11472 = sst [smem:[#allocation26_spill]] %s8617_s30  ;;  %s97_s16 = sadd.s32 1, %s8605_s27 }
   0xf   : > { %11473 = sst [smem:[#allocation27_spill]] %s8746_s14  ;;  %p104_p1 = scmp.ne.s32.totalorder %s8605_s27, %s8601_s26 }
  0x10   : > { %p105_p2 = scmp.eq.s32.totalorder %s8617_s30, 0  ;;  %s11640_s15 = smov (%p36_p0, %s35_s15), 0 }
  0x11   : > { %11474 = sst [smem:[#allocation28_spill]] %s11640_s15  ;;  %p110_p4 = scmp.ne.s32.totalorder %s8601_s26, %s8597_s25 }
  0x12   : > { %p8755_p3 = por %p105_p2, %p104_p1  ;;  %s94_s18 = ssub.s32 %s8613_s29, %s11640_s15 }
  0x13   : > { %p11391_p5 = scmp.eq.s32.totalorder %s8746_s14, 0  ;;  %p95_p6 = scmp.eq.s32.totalorder %s94_s18, 0 }
  0x14   : > { %s11475_s17 = scalar_select %p8755_p3, 1, 0 }
  0x15   : > { %p6580_p7 = scmp.ge.s32.totalorder %s8617_s30, 1  ;;  %p8766_p8 = por %p11391_p5, %p110_p4 }
  0x16   : > { %p407_p9 = scmp.lt.s32.totalorder %s8617_s30, 5  ;;  %s8619_s22 = smov [#allocation2]  }
  0x17   : > { %s11476_s19 = scalar_select %p8766_p8, 1, 0 }
  0x18   : > { %s8772_s20 = scalar_select %p95_p6, %s8605_s27, %s97_s16  }
  0x19   : > { %11477 = sst [smem:[#allocation29_spill]] %s11476_s19  ;;  %p8774_p10 = pnand %p6580_p7, %p407_p9 }
  0x1a   : > { %11478 = sst [smem:[#allocation30_spill]] %s8772_s20  ;;  %s423_s23 = sshll.u32 %s8619_s22, 4  ;;  %s424_s23 = int_to_ptr.vmem [resolvable:$true] %s423_s23 }
  0x1b   : > { %s11479_s21 = scalar_select %p8774_p10, 1, 0 }
  0x1c   : > { %p7462_p11 = pneg %p8774_p10  ;;  %s8788_s25 = sand.u32 1, %s8605_s27  }
  0x1d   : > { %11480 = sst [smem:[#allocation31_spill]] %s11479_s21  ;;  %s454_s16 = sand.u32 1, %s8617_s30  }
  0x1e   : > { %p8782_p12 = pnand %p7462_p11, %p11391_p5  ;;  %s11482_s0 = sld [smem:[#allocation71_spill]] }
  0x20   : > { %s11481_s24 = scalar_select %p8782_p12, 1, 0 }
  0x21   : > { %p11398_p1 = pneg %p8782_p12 }
  0x24   : > { %s8143_s20 = scalar_lea.hbm %s11482_s0, 2048 }
  0x25   : > { %p8144_p0 = scmp.ne.s32.totalorder %s11482_s0, %s8143_s20  ;;  %p8150_p6 = scmp.lt.u32.totalorder %s8143_s20, %s11482_s0 }
  0x27   : > { %p8146_p2 = pnand %p11398_p1, %p8144_p0 }
  0x29   : > { %p8147_p4 = pneg %p8146_p2 }
  0x2b   : > { %p8152_p7 = pnand %p8150_p6, %p8147_p4 }
  0x2d   : > { %8155 = shalt.err (!%p8152_p7)
}
  0x2e   : > { %s8156_s27 = scalar_lea.vmem %s424_s23, 2048  ;;  %p8164_p13 = scmp.lt.s32.totalorder %s424_s23, %s424_s23 }
  0x2f   : > { %p8157_p9 = scmp.ne.s32.totalorder %s424_s23, %s8156_s27  ;;  %p8165_p8 = scmp.lt.s32.totalorder %s8156_s27, %s8156_s27 }
  0x31   : > { %p8159_p11 = pnand %p8157_p9, %p11398_p1  ;;  %p8166_p10 = por %p8165_p8, %p8164_p13 }
  0x33   : > { %p8160_p5 = pneg %p8159_p11 }
  0x35   : > { %p8167_p3 = pnand %p8166_p10, %p8160_p5 }
  0x37   : > { %8170 = shalt.err (!%p8167_p3)
}
  0x38   : > { %s11395_s13 = smov 128   ;;  %s11396_s28 = smov 8  }
  0x39   : > { %7465 = dma.hbm_to_vmem [thread:$0]  (!%p8782_p12), %s11482_s0, 2048, %s424_s23, [#allocation3], %s11395_s13, %s11395_s13, %s11396_s28  }
  0x3a   : > { %p11483_p0 = scmp.ne.s32.totalorder %s11475_s17, 0  ;;  %p11484_p2 = scmp.lt.s32.totalorder %s8617_s30, 4 }
  0x3b   : > { %s8825_s20 = sshll.u32 %s8613_s29, 4  ;;  %s11486_s2 = sld [smem:[#allocation72_spill]] }
  0x3c   : > { %p8820_p8 = pnand %p11484_p2, %p11483_p0  ;;  %s457_s17 = scalar_lea.vmem [#allocation7], %s8788_s25 }
  0x3d   : > { %s464_s23 = sshll.u32 %s457_s17, 4  ;;  %s11487_s3 = sld [smem:[#allocation73_spill]]  ;;  %s8834_s23 = int_to_ptr.vmem [resolvable:$true] %s464_s23 }
  0x3e   : > { %s11485_s27 = scalar_select %p8820_p8, 1, 0 }
  0x3f   : > { %s8842_s28 = scalar_lea.sflag [#allocation3], %s454_s16  ;;  %p8848_p5 = pneg %p8820_p8 }
  0x41   : > { %s8831_s26 = scalar_lea.hbm %s11486_s2, %s8825_s20  ;;  %s8176_s30 = scalar_lea.hbm %s11486_s2, 64 }
  0x42   : > { %s8171_s0 = scalar_lea.hbm %s8831_s26, 16  ;;  %p8177_p4 = scmp.lt.u32.totalorder %s8831_s26, %s11486_s2 }
  0x43   : > { %s8840_s13 = scalar_lea.hbm %s11487_s3, %s8825_s20  ;;  %p8172_p3 = scmp.ne.s32.totalorder %s8831_s26, %s8171_s0 }
  0x44   : > { %s11488_s18 = scalar_select %p8848_p5, 1, 0 }
  0x45   : > { %p8174_p10 = pnand %p8848_p5, %p8172_p3  ;;  %p8178_p6 = scmp.lt.u32.totalorder %s8176_s30, %s8171_s0 }
  0x46   : > { %p8180_p9 = scmp.lt.u32.totalorder %s8171_s0, %s8831_s26 }
  0x47   : > { %p8175_p13 = pneg %p8174_p10  ;;  %p8179_p7 = por %p8178_p6, %p8177_p4 }
  0x49   : > { %p8181_p11 = por %p8180_p9, %p8179_p7 }
  0x4b   : > { %p8182_p0 = pnand %p8181_p11, %p8175_p13 }
  0x4d   : > { %8185 = shalt.err (!%p8182_p0)
}
  0x4e   : > { %s8186_s16 = scalar_lea.vmem %s8834_s23, 16  ;;  %s8622_s22 = smov [#allocation7]  }
  0x4f   : > { %p8187_p2 = scmp.ne.s32.totalorder %s8834_s23, %s8186_s16  ;;  %s8191_s17 = sshll.u32 %s8622_s22, 4  ;;  %s8192_s17 = int_to_ptr.vmem [resolvable:$false] %s8191_s17 }
  0x50   : > { %s8193_s15 = scalar_lea.vmem %s8192_s17, 32  ;;  %p8194_p1 = scmp.lt.s32.totalorder %s8834_s23, %s8192_s17 }
  0x51   : > { %p8189_p3 = pnand %p8187_p2, %p8848_p5  ;;  %p8195_p12 = scmp.lt.s32.totalorder %s8193_s15, %s8186_s16 }
  0x53   : > { %p8190_p10 = pneg %p8189_p3  ;;  %p8196_p4 = por %p8195_p12, %p8194_p1 }
  0x55   : > { %p8197_p6 = pnand %p8196_p4, %p8190_p10 }
  0x57   : > { %8200 = shalt.err (!%p8197_p6)
}
  0x58   : > { %7472 = dma.hbm_to_vmem [thread:$0]  (!%p8820_p8), %s8831_s26, 16, %s8834_s23, %s8842_s28  }
  0x59   : > { %s474_s0 = scalar_lea.vmem [#allocation8], %s8788_s25  ;;  %s7425_s19 = smul.u32 192, %s8788_s25 }
  0x5a   : > { %s481_s30 = sshll.u32 %s474_s0, 4  ;;  %s7426_s16 = smul.u32 3072, %s8613_s29  ;;  %s482_s30 = int_to_ptr.vmem [resolvable:$true] %s481_s30 }
  0x5b   : > { %s8201_s22 = scalar_lea.hbm %s8840_s13, 16  ;;  %s8206_s2 = scalar_lea.hbm %s11487_s3, 64 }
  0x5c   : > { %p8202_p12 = scmp.ne.s32.totalorder %s8840_s13, %s8201_s22  ;;  %p8207_p7 = scmp.lt.u32.totalorder %s8840_s13, %s11487_s3 }
  0x5d   : > { %p8208_p9 = scmp.lt.u32.totalorder %s8206_s2, %s8201_s22  ;;  %p8210_p0 = scmp.lt.u32.totalorder %s8201_s22, %s8840_s13 }
  0x5e   : > { %p8204_p1 = pnand %p8202_p12, %p8848_p5 }
  0x5f   : > { %p8209_p11 = por %p8208_p9, %p8207_p7 }
  0x60   : > { %p8205_p13 = pneg %p8204_p1 }
  0x61   : > { %p8211_p2 = por %p8210_p0, %p8209_p11 }
  0x63   : > { %p8212_p3 = pnand %p8211_p2, %p8205_p13 }
  0x65   : > { %8215 = shalt.err (!%p8212_p3)
}
  0x66   : > { %s8216_s26 = scalar_lea.vmem %s482_s30, 16  ;;  %s8623_s23 = smov [#allocation8]  }
  0x67   : > { %p8217_p10 = scmp.ne.s32.totalorder %s482_s30, %s8216_s26  ;;  %s8221_s0 = sshll.u32 %s8623_s23, 4  ;;  %s8222_s0 = int_to_ptr.vmem [resolvable:$false] %s8221_s0 }
  0x68   : > { %s8223_s17 = scalar_lea.vmem %s8222_s0, 32  ;;  %p8224_p12 = scmp.lt.s32.totalorder %s482_s30, %s8222_s0 }
  0x69   : > { %p8219_p4 = pnand %p8217_p10, %p8848_p5  ;;  %p8225_p1 = scmp.lt.s32.totalorder %s8223_s17, %s8216_s26 }
  0x6b   : > { %p8220_p6 = pneg %p8219_p4  ;;  %p8226_p8 = por %p8225_p1, %p8224_p12 }
  0x6d   : > { %p8227_p7 = pnand %p8226_p8, %p8220_p6 }
  0x6f   : > { %8230 = shalt.err (!%p8227_p7)
}
  0x70   : > { %p11489_p9 = scmp.ne.s32.totalorder %s11485_s27, 0  ;;  %s11490_s4 = sld [smem:[#allocation74_spill]] }
  0x71   : > { %s492_s22 = scalar_lea.vmem [#allocation9], %s7425_s19 }
  0x72   : > { %7475 = dma.hbm_to_vmem [thread:$0]  (!%p11489_p9), %s8840_s13, 16, %s482_s30, %s8842_s28  }
  0x73   : > { %s499_s15 = sshll.u32 %s492_s22, 4  ;;  %s8900_s15 = int_to_ptr.vmem [resolvable:$true] %s499_s15 }
  0x76   : > { %s8896_s21 = scalar_lea.hbm %s11490_s4, %s7426_s16  ;;  %s8236_s23 = scalar_lea.hbm %s11490_s4, 12288 }
  0x77   : > { %s8231_s26 = scalar_lea.hbm %s8896_s21, 3072  ;;  %p8237_p0 = scmp.lt.u32.totalorder %s8896_s21, %s11490_s4 }
  0x78   : > { %p8232_p8 = scmp.ne.s32.totalorder %s8896_s21, %s8231_s26  ;;  %p8238_p2 = scmp.lt.u32.totalorder %s8236_s23, %s8231_s26 }
  0x79   : > { %p8240_p10 = scmp.lt.u32.totalorder %s8231_s26, %s8896_s21 }
  0x7a   : > { %p8234_p13 = pnand %p8232_p8, %p8848_p5  ;;  %p8239_p3 = por %p8238_p2, %p8237_p0 }
  0x7c   : > { %p8235_p11 = pneg %p8234_p13  ;;  %p8241_p4 = por %p8240_p10, %p8239_p3 }
  0x7e   : > { %p8242_p6 = pnand %p8241_p4, %p8235_p11 }
  0x80   : > { %8245 = shalt.err (!%p8242_p6)
}
  0x81   : > { %s8246_s19 = scalar_lea.vmem %s8900_s15, 3072  ;;  %s8624_s17 = smov [#allocation9]  }
  0x82   : > { %p8247_p12 = scmp.ne.s32.totalorder %s8900_s15, %s8246_s19  ;;  %s8251_s2 = sshll.u32 %s8624_s17, 4  ;;  %s8252_s2 = int_to_ptr.vmem [resolvable:$false] %s8251_s2 }
  0x83   : > { %s8253_s14 = scalar_lea.vmem %s8252_s2, 6144  ;;  %p8254_p8 = scmp.lt.s32.totalorder %s8900_s15, %s8252_s2 }
  0x84   : > { %p8249_p1 = pnand %p8247_p12, %p8848_p5  ;;  %p8255_p13 = scmp.lt.s32.totalorder %s8253_s14, %s8246_s19 }
  0x86   : > { %p8250_p7 = pneg %p8249_p1  ;;  %p8256_p0 = por %p8255_p13, %p8254_p8 }
  0x88   : > { %p8257_p2 = pnand %p8256_p0, %p8250_p7 }
  0x8a   : > { %8260 = shalt.err (!%p8257_p2)
}
  0x8b   : > { %s8625_s22 = smov 192   ;;  %s8626_s26 = smov 12  }
  0x8c   : > { %7478 = dma.hbm_to_vmem [thread:$0]  (!%p11489_p9), %s8896_s21, 3072, %s8900_s15, %s8842_s28, %s8625_s22, %s8625_s22, %s8626_s26  }
  0x8d   : > { %s6587_s13 = sshll.u32 %s8788_s25, 6  ;;  %s6781_s30 = sshll.u32 %s8613_s29, 10 }
  0x8e   : > { %s8929_s0 = scalar_lea.hbm %s11377_s5, %s6781_s30  ;;  %s513_s19 = scalar_lea.vmem [#allocation10], %s6587_s13 }
  0x8f   : > { %s520_s17 = sshll.u32 %s513_s19, 4  ;;  %s8261_s2 = scalar_lea.hbm %s8929_s0, 1024  ;;  %s8931_s17 = int_to_ptr.vmem [resolvable:$true] %s520_s17 }
  0x90   : > { %p8262_p11 = scmp.ne.s32.totalorder %s8929_s0, %s8261_s2  ;;  %s8266_s14 = scalar_lea.hbm %s11377_s5, 4096 }
  0x91   : > { %p8267_p4 = scmp.lt.u32.totalorder %s8929_s0, %s11377_s5  ;;  %p8268_p6 = scmp.lt.u32.totalorder %s8266_s14, %s8261_s2 }
  0x92   : > { %p8264_p3 = pnand %p8262_p11, %p8848_p5  ;;  %p8270_p1 = scmp.lt.u32.totalorder %s8261_s2, %s8929_s0 }
  0x93   : > { %p8269_p12 = por %p8268_p6, %p8267_p4 }
  0x94   : > { %p8265_p10 = pneg %p8264_p3 }
  0x95   : > { %p8271_p7 = por %p8270_p1, %p8269_p12 }
  0x97   : > { %p8272_p8 = pnand %p8271_p7, %p8265_p10 }
  0x99   : > { %8275 = shalt.err (!%p8272_p8)
}
  0x9a   : > { %s8276_s13 = scalar_lea.vmem %s8931_s17, 1024  ;;  %s8627_s30 = smov [#allocation10]  }
  0x9b   : > { %p8277_p13 = scmp.ne.s32.totalorder %s8931_s17, %s8276_s13  ;;  %s8281_s23 = sshll.u32 %s8627_s30, 4  ;;  %s8282_s23 = int_to_ptr.vmem [resolvable:$false] %s8281_s23 }
  0x9c   : > { %s8283_s16 = scalar_lea.vmem %s8282_s23, 2048  ;;  %p8284_p11 = scmp.lt.s32.totalorder %s8931_s17, %s8282_s23 }
  0x9d   : > { %p8279_p0 = pnand %p8277_p13, %p8848_p5  ;;  %p8285_p3 = scmp.lt.s32.totalorder %s8283_s16, %s8276_s13 }
  0x9f   : > { %p8280_p2 = pneg %p8279_p0  ;;  %p8286_p4 = por %p8285_p3, %p8284_p11 }
  0xa1   : > { %p8287_p6 = pnand %p8286_p4, %p8280_p2 }
  0xa3   : > { %8290 = shalt.err (!%p8287_p6)
}
  0xa4   : > { %s11407_s19 = smov 64   ;;  %s11409_s2 = smov 4  }
  0xa5   : > { %7481 = dma.hbm_to_vmem [thread:$0]  (!%p11489_p9), %s8929_s0, 1024, %s8931_s17, %s8842_s28, %s11407_s19, %s11407_s19, %s11409_s2  }
  0xa6   : > { %s8962_s14 = scalar_lea.hbm %s11378_s6, %s8825_s20  ;;  %s533_s22 = scalar_lea.vmem [#allocation11], %s8788_s25 }
  0xa7   : > { %s540_s26 = sshll.u32 %s533_s22, 4  ;;  %s8969_s23 = scalar_lea.hbm %s11379_s7, %s8825_s20  ;;  %s541_s26 = int_to_ptr.vmem [resolvable:$true] %s540_s26 }
  0xa8   : > { %s8291_s16 = scalar_lea.hbm %s8962_s14, 16  ;;  %s8296_s21 = scalar_lea.hbm %s11378_s6, 64 }
  0xa9   : > { %p8292_p10 = scmp.ne.s32.totalorder %s8962_s14, %s8291_s16  ;;  %p8297_p7 = scmp.lt.u32.totalorder %s8962_s14, %s11378_s6 }
  0xaa   : > { %p8298_p8 = scmp.lt.u32.totalorder %s8296_s21, %s8291_s16  ;;  %p8300_p0 = scmp.lt.u32.totalorder %s8291_s16, %s8962_s14 }
  0xab   : > { %p8294_p12 = pnand %p8292_p10, %p8848_p5 }
  0xac   : > { %p8299_p13 = por %p8298_p8, %p8297_p7 }
  0xad   : > { %p8295_p1 = pneg %p8294_p12 }
  0xae   : > { %p8301_p2 = por %p8300_p0, %p8299_p13 }
  0xb0   : > { %p8302_p11 = pnand %p8301_p2, %p8295_p1 }
  0xb2   : > { %8305 = shalt.err (!%p8302_p11)
}
  0xb3   : > { %s8306_s22 = scalar_lea.vmem %s541_s26, 16  ;;  %s8630_s13 = smov [#allocation11]  }
  0xb4   : > { %p8307_p3 = scmp.ne.s32.totalorder %s541_s26, %s8306_s22  ;;  %s8311_s30 = sshll.u32 %s8630_s13, 4  ;;  %s8312_s30 = int_to_ptr.vmem [resolvable:$false] %s8311_s30 }
  0xb5   : > { %s8313_s0 = scalar_lea.vmem %s8312_s30, 32  ;;  %p8314_p10 = scmp.lt.s32.totalorder %s541_s26, %s8312_s30 }
  0xb6   : > { %p8309_p4 = pnand %p8307_p3, %p8848_p5  ;;  %p8315_p12 = scmp.lt.s32.totalorder %s8313_s0, %s8306_s22 }
  0xb8   : > { %p8310_p6 = pneg %p8309_p4  ;;  %p8316_p9 = por %p8315_p12, %p8314_p10 }
  0xba   : > { %p8317_p7 = pnand %p8316_p9, %p8310_p6 }
  0xbc   : > { %8320 = shalt.err (!%p8317_p7)
}
  0xbd   : > { %p11491_p8 = scmp.ne.s32.totalorder %s11485_s27, 0  ;;  %s550_s19 = scalar_lea.vmem [#allocation12], %s8788_s25 }
  0xbe   : > { %s557_s16 = sshll.u32 %s550_s19, 4  ;;  %s8994_s15 = scalar_lea.hbm %s11380_s8, %s8825_s20  ;;  %s558_s16 = int_to_ptr.vmem [resolvable:$true] %s557_s16 }
  0xbf   : > { %7484 = dma.hbm_to_vmem [thread:$0]  (!%p11491_p8), %s8962_s14, 16, %s541_s26, %s8842_s28  }
  0xc0   : > { %s8321_s22 = scalar_lea.hbm %s8969_s23, 16  ;;  %s8326_s0 = scalar_lea.hbm %s11379_s7, 64 }
  0xc1   : > { %p8322_p9 = scmp.ne.s32.totalorder %s8969_s23, %s8321_s22  ;;  %p8327_p0 = scmp.lt.u32.totalorder %s8969_s23, %s11379_s7 }
  0xc2   : > { %p8328_p2 = scmp.lt.u32.totalorder %s8326_s0, %s8321_s22  ;;  %p8330_p3 = scmp.lt.u32.totalorder %s8321_s22, %s8969_s23 }
  0xc3   : > { %p8324_p1 = pnand %p8322_p9, %p8848_p5 }
  0xc4   : > { %p8329_p11 = por %p8328_p2, %p8327_p0 }
  0xc5   : > { %p8325_p13 = pneg %p8324_p1 }
  0xc6   : > { %p8331_p4 = por %p8330_p3, %p8329_p11 }
  0xc8   : > { %p8332_p6 = pnand %p8331_p4, %p8325_p13 }
  0xca   : > { %8335 = shalt.err (!%p8332_p6)
}
  0xcb   : > { %s8336_s14 = scalar_lea.vmem %s558_s16, 16  ;;  %s8631_s26 = smov [#allocation12]  }
  0xcc   : > { %p8337_p10 = scmp.ne.s32.totalorder %s558_s16, %s8336_s14  ;;  %s8341_s19 = sshll.u32 %s8631_s26, 4  ;;  %s8342_s19 = int_to_ptr.vmem [resolvable:$false] %s8341_s19 }
  0xcd   : > { %s8343_s17 = scalar_lea.vmem %s8342_s19, 32  ;;  %p8344_p9 = scmp.lt.s32.totalorder %s558_s16, %s8342_s19 }
  0xce   : > { %p8339_p12 = pnand %p8337_p10, %p8848_p5  ;;  %p8345_p1 = scmp.lt.s32.totalorder %s8343_s17, %s8336_s14 }
  0xd0   : > { %p8340_p7 = pneg %p8339_p12  ;;  %p8346_p8 = por %p8345_p1, %p8344_p9 }
  0xd2   : > { %p8347_p0 = pnand %p8346_p8, %p8340_p7 }
  0xd4   : > { %8350 = shalt.err (!%p8347_p0)
}
  0xd5   : > { %p11492_p2 = scmp.ne.s32.totalorder %s11485_s27, 0  ;;  %s567_s3 = scalar_lea.vmem [#allocation13], %s8788_s25 }
  0xd6   : > { %s574_s2 = sshll.u32 %s567_s3, 4  ;;  %s11410_s21 = sshll.u32 %s8788_s25, 8  ;;  %s575_s2 = int_to_ptr.vmem [resolvable:$true] %s574_s2 }
  0xd7   : > { %7487 = dma.hbm_to_vmem [thread:$0]  (!%p11492_p2), %s8969_s23, 16, %s558_s16, %s8842_s28  }
  0xd8   : > { %s8351_s22 = scalar_lea.hbm %s8994_s15, 16  ;;  %s8356_s0 = scalar_lea.hbm %s11380_s8, 64 }
  0xd9   : > { %p8352_p13 = scmp.ne.s32.totalorder %s8994_s15, %s8351_s22  ;;  %p8357_p3 = scmp.lt.u32.totalorder %s8994_s15, %s11380_s8 }
  0xda   : > { %p8358_p4 = scmp.lt.u32.totalorder %s8356_s0, %s8351_s22  ;;  %p8360_p10 = scmp.lt.u32.totalorder %s8351_s22, %s8994_s15 }
  0xdb   : > { %p8354_p8 = pnand %p8352_p13, %p8848_p5 }
  0xdc   : > { %p8359_p6 = por %p8358_p4, %p8357_p3 }
  0xdd   : > { %p8355_p11 = pneg %p8354_p8 }
  0xde   : > { %p8361_p12 = por %p8360_p10, %p8359_p6 }
  0xe0   : > { %p8362_p7 = pnand %p8361_p12, %p8355_p11 }
  0xe2   : > { %8365 = shalt.err (!%p8362_p7)
}
  0xe3   : > { %s8366_s23 = scalar_lea.vmem %s575_s2, 16  ;;  %s8632_s16 = smov [#allocation13]  }
  0xe4   : > { %p8367_p9 = scmp.ne.s32.totalorder %s575_s2, %s8366_s23  ;;  %s8371_s19 = sshll.u32 %s8632_s16, 4  ;;  %s8372_s19 = int_to_ptr.vmem [resolvable:$false] %s8371_s19 }
  0xe5   : > { %s8373_s17 = scalar_lea.vmem %s8372_s19, 32  ;;  %p8374_p13 = scmp.lt.s32.totalorder %s575_s2, %s8372_s19 }
  0xe6   : > { %p8369_p1 = pnand %p8367_p9, %p8848_p5  ;;  %p8375_p8 = scmp.lt.s32.totalorder %s8373_s17, %s8366_s23 }
  0xe8   : > { %p8370_p0 = pneg %p8369_p1  ;;  %p8376_p2 = por %p8375_p8, %p8374_p13 }
  0xea   : > { %p8377_p3 = pnand %p8376_p2, %p8370_p0 }
  0xec   : > { %8380 = shalt.err (!%p8377_p3)
}
  0xed   : > { %p11493_p4 = scmp.ne.s32.totalorder %s11485_s27, 0  ;;  %s6782_s3 = sshll.u32 %s8613_s29, 12 }
  0xee   : > { %s585_s22 = scalar_lea.vmem [#allocation14], %s11410_s21  ;;  %s9042_s14 = scalar_lea.hbm %s11381_s9, %s6782_s3 }
  0xef   : > { %7490 = dma.hbm_to_vmem [thread:$0]  (!%p11493_p4), %s8994_s15, 16, %s575_s2, %s8842_s28  }
  0xf0   : > { %s592_s13 = sshll.u32 %s585_s22, 4  ;;  %s8381_s26 = scalar_lea.hbm %s9042_s14, 4096  ;;  %s9044_s13 = int_to_ptr.vmem [resolvable:$true] %s592_s13 }
  0xf1   : > { %p8382_p2 = scmp.ne.s32.totalorder %s9042_s14, %s8381_s26  ;;  %s8386_s23 = scalar_lea.hbm %s11381_s9, 16384 }
  0xf2   : > { %p8387_p10 = scmp.lt.u32.totalorder %s9042_s14, %s11381_s9  ;;  %p8388_p12 = scmp.lt.u32.totalorder %s8386_s23, %s8381_s26 }
  0xf3   : > { %p8384_p11 = pnand %p8382_p2, %p8848_p5  ;;  %p8390_p9 = scmp.lt.u32.totalorder %s8381_s26, %s9042_s14 }
  0xf4   : > { %p8389_p7 = por %p8388_p12, %p8387_p10 }
  0xf5   : > { %p8385_p6 = pneg %p8384_p11 }
  0xf6   : > { %p8391_p1 = por %p8390_p9, %p8389_p7 }
  0xf8   : > { %p8392_p0 = pnand %p8391_p1, %p8385_p6 }
  0xfa   : > { %8395 = shalt.err (!%p8392_p0)
}
  0xfb   : > { %s8396_s17 = scalar_lea.vmem %s9044_s13, 4096  ;;  %s8633_s22 = smov [#allocation14]  }
  0xfc   : > { %p8397_p13 = scmp.ne.s32.totalorder %s9044_s13, %s8396_s17  ;;  %s8401_s30 = sshll.u32 %s8633_s22, 4  ;;  %s8402_s30 = int_to_ptr.vmem [resolvable:$false] %s8401_s30 }
  0xfd   : > { %s8403_s0 = scalar_lea.vmem %s8402_s30, 8192  ;;  %p8404_p2 = scmp.lt.s32.totalorder %s9044_s13, %s8402_s30 }
  0xfe   : > { %p8399_p8 = pnand %p8397_p13, %p8848_p5  ;;  %p8405_p11 = scmp.lt.s32.totalorder %s8403_s0, %s8396_s17 }
 0x100   : > { %p8400_p3 = pneg %p8399_p8  ;;  %p8406_p10 = por %p8405_p11, %p8404_p2 }
 0x102   : > { %p8407_p12 = pnand %p8406_p10, %p8400_p3 }
 0x104   : > { %8410 = shalt.err (!%p8407_p12)
}
 0x105   : > { %s8634_s26 = smov 256   ;;  %s8635_s15 = smov 16  }
 0x106   : > { %7493 = dma.hbm_to_vmem [thread:$0]  (!%p11493_p4), %s9042_s14, 4096, %s9044_s13, %s8842_s28, %s8634_s26, %s8634_s26, %s8635_s15  }
 0x107   : > { %s6596_s2 = sshll.u32 %s8788_s25, 2  ;;  %s6783_s23 = sshll.u32 %s8613_s29, 6 }
 0x108   : > { %s9073_s17 = scalar_lea.hbm %s11382_s10, %s6783_s23  ;;  %s606_s22 = scalar_lea.vmem [#allocation15], %s6596_s2 }
 0x109   : > { %s614_s30 = sshll.u32 %s606_s22, 4  ;;  %s9080_s4 = scalar_lea.hbm %s11383_s11, %s6782_s3  ;;  %s615_s30 = int_to_ptr.vmem [resolvable:$true] %s614_s30 }
 0x10a   : > { %s8411_s13 = scalar_lea.hbm %s9073_s17, 64  ;;  %s8416_s15 = scalar_lea.hbm %s11382_s10, 256 }
 0x10b   : > { %p8412_p6 = scmp.ne.s32.totalorder %s9073_s17, %s8411_s13  ;;  %p8417_p1 = scmp.lt.u32.totalorder %s9073_s17, %s11382_s10 }
 0x10c   : > { %p8418_p0 = scmp.lt.u32.totalorder %s8416_s15, %s8411_s13  ;;  %p8420_p8 = scmp.lt.u32.totalorder %s8411_s13, %s9073_s17 }
 0x10d   : > { %p8414_p7 = pnand %p8412_p6, %p8848_p5 }
 0x10e   : > { %p8419_p13 = por %p8418_p0, %p8417_p1 }
 0x10f   : > { %p8415_p9 = pneg %p8414_p7 }
 0x110   : > { %p8421_p3 = por %p8420_p8, %p8419_p13 }
 0x112   : > { %p8422_p2 = pnand %p8421_p3, %p8415_p9 }
 0x114   : > { %8425 = shalt.err (!%p8422_p2)
}
 0x115   : > { %s8426_s21 = scalar_lea.vmem %s615_s30, 64  ;;  %s8636_s3 = smov [#allocation15]  }
 0x116   : > { %p8427_p11 = scmp.ne.s32.totalorder %s615_s30, %s8426_s21  ;;  %s8431_s2 = sshll.u32 %s8636_s3, 4  ;;  %s8432_s2 = int_to_ptr.vmem [resolvable:$false] %s8431_s2 }
 0x117   : > { %s8433_s19 = scalar_lea.vmem %s8432_s2, 128  ;;  %p8434_p6 = scmp.lt.s32.totalorder %s615_s30, %s8432_s2 }
 0x118   : > { %p8429_p10 = pnand %p8427_p11, %p8848_p5  ;;  %p8435_p7 = scmp.lt.s32.totalorder %s8433_s19, %s8426_s21 }
 0x11a   : > { %p8430_p12 = pneg %p8429_p10  ;;  %p8436_p4 = por %p8435_p7, %p8434_p6 }
 0x11c   : > { %p8437_p0 = pnand %p8436_p4, %p8430_p12 }
 0x11e   : > { %8440 = shalt.err (!%p8437_p0)
}
 0x11f   : > { %p11494_p1 = scmp.ne.s32.totalorder %s11485_s27, 0  ;;  %s11495_s22 = sshll.u32 %s8788_s25, 8 }
 0x120   : > { %s625_s0 = scalar_lea.vmem [#allocation16], %s11495_s22  ;;  %s8637_s14 = smov [#allocation5]  }
 0x121   : > { %7496 = dma.hbm_to_vmem [thread:$0]  (!%p11494_p1), %s9073_s17, 64, %s615_s30, %s8842_s28  }
 0x122   : > { %s632_s13 = sshll.u32 %s625_s0, 4  ;;  %s9104_s26 = sshll.u32 %s8637_s14, 4  ;;  %s9102_s13 = int_to_ptr.vmem [resolvable:$true] %s632_s13  ;;  %s441_s26 = int_to_ptr.vmem [resolvable:$true] %s9104_s26 }
 0x123   : > { %s8441_s15 = scalar_lea.hbm %s9080_s4, 4096  ;;  %s8446_s21 = scalar_lea.hbm %s11383_s11, 16384 }
 0x124   : > { %p8442_p4 = scmp.ne.s32.totalorder %s9080_s4, %s8441_s15  ;;  %p8447_p8 = scmp.lt.u32.totalorder %s9080_s4, %s11383_s11 }
 0x125   : > { %p8448_p3 = scmp.lt.u32.totalorder %s8446_s21, %s8441_s15  ;;  %p8450_p11 = scmp.lt.u32.totalorder %s8441_s15, %s9080_s4 }
 0x126   : > { %p8444_p9 = pnand %p8442_p4, %p8848_p5 }
 0x127   : > { %p8449_p2 = por %p8448_p3, %p8447_p8 }
 0x128   : > { %p8445_p13 = pneg %p8444_p9 }
 0x129   : > { %p8451_p10 = por %p8450_p11, %p8449_p2 }
 0x12b   : > { %p8452_p12 = pnand %p8451_p10, %p8445_p13 }
 0x12d   : > { %8455 = shalt.err (!%p8452_p12)
}
 0x12e   : > { %s8456_s17 = scalar_lea.vmem %s9102_s13, 4096  ;;  %s8638_s30 = smov [#allocation16]  }
 0x12f   : > { %p8457_p6 = scmp.ne.s32.totalorder %s9102_s13, %s8456_s17  ;;  %s8461_s19 = sshll.u32 %s8638_s30, 4  ;;  %s8462_s19 = int_to_ptr.vmem [resolvable:$false] %s8461_s19 }
 0x130   : > { %s8463_s22 = scalar_lea.vmem %s8462_s19, 8192  ;;  %p8464_p4 = scmp.lt.s32.totalorder %s9102_s13, %s8462_s19 }
 0x131   : > { %p8459_p7 = pnand %p8457_p6, %p8848_p5  ;;  %p8465_p9 = scmp.lt.s32.totalorder %s8463_s22, %s8456_s17 }
 0x133   : > { %p8460_p0 = pneg %p8459_p7  ;;  %p8466_p8 = por %p8465_p9, %p8464_p4 }
 0x135   : > { %p8467_p3 = pnand %p8466_p8, %p8460_p0 }
 0x137   : > { %8470 = shalt.err (!%p8467_p3)
}
 0x138   : > { %s11496_s0 = smov 4   ;;  %s11497_s14 = smov 64  }
 0x139   : > { %7499 = dma.hbm_to_vmem [thread:$0]  (!%p11494_p1), %s9080_s4, 4096, %s9102_s13, %s8842_s28, %s11497_s14, %s11497_s14, %s11496_s0  }
 0x13a   : > { %s8471_s16 = scalar_lea.hbm %s11373_s1, 2048  ;;  %p11498_p2 = scmp.ne.s32.totalorder %s11481_s24, 0 }
 0x13b   : > { %p8472_p13 = scmp.ne.s32.totalorder %s11373_s1, %s8471_s16  ;;  %p8478_p6 = scmp.lt.u32.totalorder %s8471_s16, %s11373_s1 }
 0x13c   : > { %p11499_p11 = pneg %p11498_p2 }
 0x13e   : > { %p8474_p10 = pnand %p8472_p13, %p11499_p11 }
 0x140   : > { %p8475_p12 = pneg %p8474_p10 }
 0x142   : > { %p8480_p7 = pnand %p8478_p6, %p8475_p12 }
 0x144   : > { %8483 = shalt.err (!%p8480_p7)
}
 0x145   : > { %s8484_s4 = scalar_lea.vmem %s441_s26, 2048  ;;  %p11500_p4 = pmov %p11499_p11 }
 0x146   : > { %p8485_p0 = scmp.ne.s32.totalorder %s441_s26, %s8484_s4  ;;  %p8492_p3 = scmp.lt.s32.totalorder %s441_s26, %s441_s26 }
 0x147   : > { %p8493_p1 = scmp.lt.s32.totalorder %s8484_s4, %s8484_s4 }
 0x148   : > { %p8487_p9 = pnand %p8485_p0, %p11500_p4 }
 0x149   : > { %p8494_p5 = por %p8493_p1, %p8492_p3 }
 0x14a   : > { %p8488_p8 = pneg %p8487_p9 }
 0x14c   : > { %p8495_p11 = pnand %p8494_p5, %p8488_p8 }
 0x14e   : > { %8498 = shalt.err (!%p8495_p11)
}
 0x14f   : > { %s11501_s13 = smov 8   ;;  %s11502_s30 = smov 128  }
 0x150   : > { %7468 = dma.hbm_to_vmem [thread:$0]  (!%p11498_p2), %s11373_s1, 2048, %s441_s26, [#allocation6], %s11502_s30, %s11502_s30, %s11501_s13  }
 0x151   : > { %s9159_s15 = scalar_lea.hbm %s11384_s12, %s8825_s20  ;;  %s645_s24 = scalar_lea.vmem [#allocation17], %s8788_s25 }
 0x152   : > { %s652_s23 = sshll.u32 %s645_s24, 4  ;;  %s8499_s16 = scalar_lea.hbm %s9159_s15, 16  ;;  %s653_s23 = int_to_ptr.vmem [resolvable:$true] %s652_s23 }
 0x153   : > { %p8500_p5 = scmp.ne.s32.totalorder %s9159_s15, %s8499_s16  ;;  %p11503_p1 = scmp.ne.s32.totalorder %s11488_s18, 0 }
 0x154   : > { %s8504_s26 = scalar_lea.hbm %s11384_s12, 64  ;;  %p8505_p2 = scmp.lt.u32.totalorder %s9159_s15, %s11384_s12 }
 0x155   : > { %p8502_p13 = pnand %p8500_p5, %p11503_p1  ;;  %p8506_p12 = scmp.lt.u32.totalorder %s8504_s26, %s8499_s16 }
 0x156   : > { %p8508_p7 = scmp.lt.u32.totalorder %s8499_s16, %s9159_s15 }
 0x157   : > { %p8503_p10 = pneg %p8502_p13  ;;  %p8507_p6 = por %p8506_p12, %p8505_p2 }
 0x159   : > { %p8509_p0 = por %p8508_p7, %p8507_p6 }
 0x15b   : > { %p8510_p4 = pnand %p8509_p0, %p8503_p10 }
 0x15d   : > { %8513 = shalt.err (!%p8510_p4)
}
 0x15e   : > { %s8514_s25 = scalar_lea.vmem %s653_s23, 16  ;;  %s8639_s20 = smov [#allocation17]  }
 0x15f   : > { %p8515_p9 = scmp.ne.s32.totalorder %s653_s23, %s8514_s25  ;;  %s8519_s4 = sshll.u32 %s8639_s20, 4  ;;  %s8520_s4 = int_to_ptr.vmem [resolvable:$false] %s8519_s4 }
 0x160   : > { %s8521_s13 = scalar_lea.vmem %s8520_s4, 32  ;;  %p8522_p11 = scmp.lt.s32.totalorder %s653_s23, %s8520_s4 }
 0x161   : > { %p8517_p8 = pnand %p8515_p9, %p11503_p1  ;;  %p8523_p5 = scmp.lt.s32.totalorder %s8521_s13, %s8514_s25 }
 0x163   : > { %p8518_p3 = pneg %p8517_p8  ;;  %p8524_p13 = por %p8523_p5, %p8522_p11 }
 0x165   : > { %p8525_p2 = pnand %p8524_p13, %p8518_p3 }
 0x167   : > { %8528 = shalt.err (!%p8525_p2)
}
 0x168   : > { %p11504_p12 = scmp.ne.s32.totalorder %s11485_s27, 0  ;;  %s11505_s30 = sld [smem:[#allocation31_spill]] }
 0x16a   : > { %7502 = dma.hbm_to_vmem [thread:$0]  (!%p11504_p12), %s9159_s15, 16, %s653_s23, %s8842_s28  }
 0x16e   : > { %p11506_p10 = scmp.ne.s32.totalorder %s11505_s30, 0 }
 0x170   : > { %661 = sbr.rel (%p11506_p10) target bundleno = 4537 (0x11b9), region = 72 }
 0x177   : > { %s11507_s18 = sld [smem:[#allocation27_spill]] }
 0x17d   : > { %p11508_p1 = scmp.eq.s32.totalorder %s11507_s18, 0 }
 0x17f   : > { %8580 = dma.done.wait (%p11508_p1), [#allocation3], 2048   ;;  %p11509_p6 = pmov %p11508_p1 }
 0x180   : > { %p11510_p7 = pmov %p11508_p1 }
 0x181   : > { %8582 = vsyncadd (%p11509_p6), [#allocation3], 4294965248 }
 0x182   : > { %8584 = dma.done.wait (%p11510_p7), [#allocation6], 2048   ;;  %p11511_p0 = pmov %p11508_p1 }
 0x183   : > { %s11512_s27 = sld [smem:[#allocation23_spill]]  ;;  %s11513_s19 = sld [smem:[#allocation29_spill]] }
 0x184   : > { %8586 = vsyncadd (%p11511_p0), [#allocation6], 4294965248  ;;  %s671_s22 = sand.u32 1, %s11507_s18  }
 0x185   : > { %s672_s0 = scalar_lea.sflag [#allocation3], %s671_s22 }
 0x189   : > { %s9192_s28 = sand.u32 1, %s11512_s27   ;;  %p11514_p4 = scmp.ne.s32.totalorder %s11513_s19, 0 }
 0x18a   : > { %s674_s14 = scalar_lea.vmem [#allocation7], %s9192_s28 }
 0x18b   : > { %8588 = dma.done.wait (%p11514_p4), %s672_s0, 12448  }
 0x18c   : > { %8590 = vsyncadd (%p11514_p4), %s672_s0, 4294954848  ;;  %s7427_s15 = smul.u32 192, %s9192_s28  ;;  %s6606_s24 = sshll.u32 %s9192_s28, 6 }
 0x18d   : > { %s6607_s23 = sshll.u32 %s9192_s28, 8  ;;  %s6608_s16 = sshll.u32 %s9192_s28, 2 }
 0x18e   : > { %s682_s21 = scalar_lea.vmem [#allocation8], %s9192_s28  ;;  %s9204_s3 = scalar_lea.vmem [#allocation9], %s7427_s15 }
 0x18f   : > { %s9206_s26 = scalar_lea.vmem [#allocation10], %s6606_s24  ;;  %s708_s2 = scalar_lea.vmem [#allocation11], %s9192_s28 }
 0x190   : > { %s716_s17 = scalar_lea.vmem [#allocation12], %s9192_s28  ;;  %s724_s25 = scalar_lea.vmem [#allocation13], %s9192_s28 }
 0x191   : > { %s9211_s20 = scalar_lea.vmem [#allocation14], %s6607_s23  ;;  %s9213_s4 = scalar_lea.vmem [#allocation15], %s6608_s16 }
 0x192   : > { %s9215_s13 = scalar_lea.vmem [#allocation16], %s6607_s23  ;;  %s759_s30 = scalar_lea.vmem [#allocation17], %s9192_s28 }
 0x193   : > { %s11515_s18 = sld [smem:[#allocation25_spill]] }
 0x199   : > { %p6610_p9 = scmp.ne.s32.totalorder %s11515_s18, 0 }
 0x19a   : > { %v849_v0 = vld [vmem:[#allocation2] sm:$0xff] (!%p6610_p9)  ;;  %v850_v1 = vld [vmem:[#allocation2 + $0x8] sm:$0xff] (!%p6610_p9)  ;;  %v851_v2 = vld [vmem:[#allocation2 + $0x10] sm:$0xff] (!%p6610_p9) }
 0x19b   : > { %848 = sbr.rel (%p6610_p9) target bundleno = 419 (0x1a3), region = 128  ;;  %865 = vst [vmem:[#allocation18] sm:$0xff] (!%p6610_p9), %v849_v0  ;;  %866 = vst [vmem:[#allocation18 + $0x8] sm:$0xff] (!%p6610_p9), %v850_v1  ;;  %v852_v3 = vld [vmem:[#allocation2 + $0x18] sm:$0xff] (!%p6610_p9)  ;;  %v853_v4 = vld [vmem:[#allocation2 + $0x20] sm:$0xff] (!%p6610_p9) }
 0x19c   : > { %867 = vst [vmem:[#allocation18 + $0x10] sm:$0xff] (!%p6610_p9), %v851_v2  ;;  %v854_v5 = vld [vmem:[#allocation2 + $0x28] sm:$0xff] (!%p6610_p9)  ;;  %868 = vst [vmem:[#allocation18 + $0x18] sm:$0xff] (!%p6610_p9), %v852_v3  ;;  %v855_v6 = vld [vmem:[#allocation2 + $0x30] sm:$0xff] (!%p6610_p9) }
 0x19d   : > { %869 = vst [vmem:[#allocation18 + $0x20] sm:$0xff] (!%p6610_p9), %v853_v4  ;;  %870 = vst [vmem:[#allocation18 + $0x28] sm:$0xff] (!%p6610_p9), %v854_v5  ;;  %v856_v7 = vld [vmem:[#allocation2 + $0x38] sm:$0xff] (!%p6610_p9)  ;;  %v857_v8 = vld [vmem:[#allocation2 + $0x40] sm:$0xff] (!%p6610_p9) }
 0x19e   : > { %871 = vst [vmem:[#allocation18 + $0x30] sm:$0xff] (!%p6610_p9), %v855_v6  ;;  %872 = vst [vmem:[#allocation18 + $0x38] sm:$0xff] (!%p6610_p9), %v856_v7  ;;  %v858_v9 = vld [vmem:[#allocation2 + $0x48] sm:$0xff] (!%p6610_p9)  ;;  %v859_v10 = vld [vmem:[#allocation2 + $0x50] sm:$0xff] (!%p6610_p9) }
 0x19f   : > { %873 = vst [vmem:[#allocation18 + $0x40] sm:$0xff] (!%p6610_p9), %v857_v8  ;;  %v860_v11 = vld [vmem:[#allocation2 + $0x58] sm:$0xff] (!%p6610_p9)  ;;  %874 = vst [vmem:[#allocation18 + $0x48] sm:$0xff] (!%p6610_p9), %v858_v9  ;;  %v861_v12 = vld [vmem:[#allocation2 + $0x60] sm:$0xff] (!%p6610_p9) }
 0x1a0   : > { %875 = vst [vmem:[#allocation18 + $0x50] sm:$0xff] (!%p6610_p9), %v859_v10  ;;  %876 = vst [vmem:[#allocation18 + $0x58] sm:$0xff] (!%p6610_p9), %v860_v11  ;;  %v862_v13 = vld [vmem:[#allocation2 + $0x68] sm:$0xff] (!%p6610_p9)  ;;  %v863_v14 = vld [vmem:[#allocation2 + $0x70] sm:$0xff] (!%p6610_p9) }
 0x1a1   : > { %877 = vst [vmem:[#allocation18 + $0x60] sm:$0xff] (!%p6610_p9), %v861_v12  ;;  %878 = vst [vmem:[#allocation18 + $0x68] sm:$0xff] (!%p6610_p9), %v862_v13  ;;  %v864_v15 = vld [vmem:[#allocation2 + $0x78] sm:$0xff] (!%p6610_p9) }
 0x1a2   : > { %879 = vst [vmem:[#allocation18 + $0x70] sm:$0xff] %v863_v14  ;;  %880 = vst [vmem:[#allocation18 + $0x78] sm:$0xff] %v864_v15 }
 0x1a3 PF: > { %v881_v16 = vld [vmem:[#allocation18] sm:$0xff]  ;;  %v897_v17 = vld [vmem:[#allocation5] sm:$0xff]  ;;  %v898_v20 = vld [vmem:[#allocation5 + $0x8] sm:$0xff]  ;;  %vm1602_vm0 = vcmask 261120   ;;  %s8641_s27 = smov 96   ;;  %s8642_s19 = smov 64  }
 0x1a4   : > { %v882_v18 = vld [vmem:[#allocation18 + $0x8] sm:$0xff]  ;;  %v9219_v19 = vadd.f32 %v897_v17, %v881_v16  ;;  %v883_v23 = vld [vmem:[#allocation18 + $0x10] sm:$0xff]  ;;  %v899_v24 = vld [vmem:[#allocation5 + $0x10] sm:$0xff]  ;;  %s8643_s22 = smov 32   ;;  %vm4515_vm1 = vcmask 523264   ;;  %vm4532_vm2 = vcmask 785408  }
 0x1a5   : > { %v9221_v21 = vadd.f32 %v898_v20, %v882_v18  ;;  %v884_v26 = vld [vmem:[#allocation18 + $0x18] sm:$0xff]  ;;  %v900_v27 = vld [vmem:[#allocation5 + $0x18] sm:$0xff]  ;;  %v9229_v28 = vadd.f32 %v899_v24, %v883_v23  ;;  %v901_v31 = vld [vmem:[#allocation5 + $0x20] sm:$0xff]  ;;  %s11628_s28 = sld [smem:[#allocation27_spill]]  ;;  %s8644_s0 = smov [#allocation18]  }
 0x1a6   : > { %11516 = vst [vmem:[#allocation32_spill] sm:$0xff] %v9219_v19  ;;  %931 = vadd.xlane.f32.xlu0 %v9219_v19  ;;  %v980_v22 = vmul.f32 %v9219_v19, %v9219_v19  ;;  %v9231_v29 = vadd.f32 %v900_v27, %v884_v26  ;;  %v885_v30 = vld [vmem:[#allocation18 + $0x20] sm:$0xff]  ;;  %v886_v33 = vld [vmem:[#allocation18 + $0x28] sm:$0xff]  ;;  %v902_v34 = vld [vmem:[#allocation5 + $0x28] sm:$0xff] }
 0x1a7   : > { %11517 = vst [vmem:[#allocation33_spill] sm:$0xff] %v9221_v21  ;;  %v981_v25 = vmul.f32 %v9221_v21, %v9221_v21  ;;  %11518 = vst [vmem:[#allocation34_spill] sm:$0xff] %v9229_v28  ;;  %v982_v32 = vmul.f32 %v9229_v28, %v9229_v28  ;;  %v9239_v36 = vadd.f32 %v901_v31, %v885_v30  ;;  %v7575_v37 = vld [vmem:[%s9204_s3 + $0x4] ss:$12 sps:$4 sm:$0xff]   ;;  %v7577_v39 = vld [vmem:[%s9204_s3] ss:$12 sps:$4 sm:$0xff]  }
 0x1a8   : > { %996 = vadd.xlane.f32.xlu1 %v980_v22  ;;  %11519 = vst [vmem:[#allocation35_spill] sm:$0xff] %v9231_v29  ;;  %v983_v35 = vmul.f32 %v9231_v29, %v9231_v29  ;;  %v9242_v38 = vadd.f32 %v902_v34, %v886_v33  ;;  %v887_v40 = vld [vmem:[#allocation18 + $0x30] sm:$0xff]  ;;  %v903_v41 = vld [vmem:[#allocation5 + $0x30] sm:$0xff]  ;;  %1368 = vmatprep.subr.bf16.mxu0 %v7575_v37  ;;  %v904_v44 = vld [vmem:[#allocation5 + $0x38] sm:$0xff] }
 0x1a9   : > { %11520 = vst [vmem:[#allocation36_spill] sm:$0xff] %v9239_v36  ;;  %v984_v42 = vmul.f32 %v9239_v36, %v9239_v36  ;;  %1369 = vmatpush1.bf16.msra.mxu0 %v7577_v39  ;;  %v888_v43 = vld [vmem:[#allocation18 + $0x38] sm:$0xff]  ;;  %v7580_v47 = vld [vmem:[%s9204_s3 + $0x18] ss:$12 sps:$4 sm:$0xff]   ;;  %v9253_v48 = vadd.f32 %v903_v41, %v887_v40  ;;  %v7581_v49 = vld [vmem:[%s9204_s3 + $0x34] ss:$12 sps:$4 sm:$0xff]  }
 0x1aa   : > { %933 = vadd.xlane.f32.xlu0 %v9221_v21  ;;  %11521 = vst [vmem:[#allocation37_spill] sm:$0xff] %v9242_v38  ;;  %v7578_v45 = vld [vmem:[%s9204_s3 + $0x1c] ss:$12 sps:$4 sm:$0xff]   ;;  %v985_v46 = vmul.f32 %v9242_v38, %v9242_v38  ;;  %v9257_v51 = vadd.f32 %v904_v44, %v888_v43  ;;  %v889_v52 = vld [vmem:[#allocation18 + $0x40] sm:$0xff]  ;;  %v7585_v59 = vld [vmem:[%s9204_s3 + $0x4c] ss:$12 sps:$4 sm:$0xff]  }
 0x1ab   : > { %1370 = vmatprep.subr.bf16.mxu0 %v7578_v45  ;;  %11522 = vst [vmem:[#allocation38_spill] sm:$0xff] %v9253_v48  ;;  %v7583_v50 = vld [vmem:[%s9204_s3 + $0x8] ss:$12 sps:$4 sm:$0xff]   ;;  %v905_v53 = vld [vmem:[#allocation5 + $0x40] sm:$0xff]  ;;  %v986_v55 = vmul.f32 %v9253_v48, %v9253_v48  ;;  %v7589_v0 = vld [vmem:[%s9204_s3 + $0x64] ss:$12 sps:$4 sm:$0xff]  }
 0x1ac   : > { %998 = vadd.xlane.f32.xlu1 %v981_v25  ;;  %11523 = vst [vmem:[#allocation39_spill] sm:$0xff] %v9257_v51  ;;  %7073 = vmatprep.subr.bf16.mxu1 %v7583_v50  ;;  %v7584_v54 = vld [vmem:[%s9204_s3 + $0x30] ss:$12 sps:$4 sm:$0xff]   ;;  %v906_v57 = vld [vmem:[#allocation5 + $0x48] sm:$0xff]  ;;  %v987_v58 = vmul.f32 %v9257_v51, %v9257_v51  ;;  %v7587_v60 = vld [vmem:[%s9204_s3 + $0x20] ss:$12 sps:$4 sm:$0xff]   ;;  %v9269_v62 = vadd.f32 %v905_v53, %v889_v52 }
 0x1ad   : > { %1371 = vmatpush1.bf16.msra.mxu0 %v7580_v47  ;;  %7074 = vmatpush3.bf16.msra.mxu1 %v7583_v50  ;;  %v890_v56 = vld [vmem:[#allocation18 + $0x48] sm:$0xff]  ;;  %v7588_v61 = vld [vmem:[%s9204_s3 + $0x48] ss:$12 sps:$4 sm:$0xff]   ;;  %v891_v2 = vld [vmem:[#allocation18 + $0x50] sm:$0xff]  ;;  %p7508_p8 = scmp.eq.s32.totalorder %s11628_s28, 3 }
 0x1ae   : > { %935 = vadd.xlane.f32.xlu0 %v9229_v28  ;;  %1372 = vmatprep.subr.bf16.mxu0 %v7581_v49  ;;  %11524 = vst [vmem:[#allocation40_spill] sm:$0xff] %v9269_v62  ;;  %v9271_v63 = vadd.f32 %v906_v57, %v890_v56  ;;  %v7591_v1 = vld [vmem:[%s9204_s3 + $0x38] ss:$12 sps:$4 sm:$0xff]   ;;  %v907_v3 = vld [vmem:[#allocation5 + $0x50] sm:$0xff]  ;;  %v988_v5 = vmul.f32 %v9269_v62, %v9269_v62  ;;  %v7593_v9 = vld [vmem:[%s9204_s3 + $0x7c] ss:$12 sps:$4 sm:$0xff]  }
 0x1af   : > { %7075 = vmatprep.subr.bf16.mxu1 %v7587_v60  ;;  %v7592_v4 = vld [vmem:[%s9204_s3 + $0x60] ss:$12 sps:$4 sm:$0xff]   ;;  %v908_v7 = vld [vmem:[#allocation5 + $0x58] sm:$0xff]  ;;  %v7595_v10 = vld [vmem:[%s9204_s3 + $0x50] ss:$12 sps:$4 sm:$0xff]   ;;  %v9285_v12 = vadd.f32 %v907_v3, %v891_v2 }
 0x1b0   : > { %937 = vadd.xlane.f32.xlu1 %v9231_v29  ;;  %11525 = vst [vmem:[#allocation41_spill] sm:$0xff] %v9271_v63  ;;  %v892_v6 = vld [vmem:[#allocation18 + $0x58] sm:$0xff]  ;;  %v989_v8 = vmul.f32 %v9271_v63, %v9271_v63  ;;  %v7596_v11 = vld [vmem:[%s9204_s3 + $0x78] ss:$12 sps:$4 sm:$0xff]   ;;  %v7597_v14 = vld [vmem:[%s9204_s3 + $0x94] ss:$12 sps:$4 sm:$0xff]  }
 0x1b1   : > { %1373 = vmatpush1.bf16.msra.mxu0 %v7584_v54  ;;  %7076 = vmatpush3.bf16.msra.mxu1 %v7587_v60  ;;  %11526 = vst [vmem:[#allocation42_spill] sm:$0xff] %v9285_v12  ;;  %v9287_v13 = vadd.f32 %v908_v7, %v892_v6  ;;  %v7599_v15 = vld [vmem:[%s9204_s3 + $0x68] ss:$12 sps:$4 sm:$0xff]   ;;  %v909_v17 = vld [vmem:[#allocation5 + $0x60] sm:$0xff]  ;;  %v990_v20 = vmul.f32 %v9285_v12, %v9285_v12  ;;  %v7601_v25 = vld [vmem:[%s9204_s3 + $0xac] ss:$12 sps:$4 sm:$0xff]  }
 0x1b2   : > { %1000 = vadd.xlane.f32.xlu0 %v982_v32  ;;  %1374 = vmatprep.subr.bf16.mxu0 %v7585_v59  ;;  %v893_v16 = vld [vmem:[#allocation18 + $0x60] sm:$0xff]  ;;  %v894_v22 = vld [vmem:[#allocation18 + $0x68] sm:$0xff]  ;;  %v910_v23 = vld [vmem:[#allocation5 + $0x68] sm:$0xff] }
 0x1b3   : > { %7077 = vmatprep.subr.bf16.mxu1 %v7591_v1  ;;  %11527 = vst [vmem:[#allocation43_spill] sm:$0xff] %v9287_v13  ;;  %v7600_v18 = vld [vmem:[%s9204_s3 + $0x90] ss:$12 sps:$4 sm:$0xff]   ;;  %v991_v24 = vmul.f32 %v9287_v13, %v9287_v13  ;;  %v7603_v26 = vld [vmem:[%s9204_s3 + $0x80] ss:$12 sps:$4 sm:$0xff]   ;;  %v9301_v30 = vadd.f32 %v909_v17, %v893_v16  ;;  %v9303_v31 = vadd.f32 %v910_v23, %v894_v22  ;;  %v912_v40 = vld [vmem:[#allocation5 + $0x78] sm:$0xff] }
 0x1b4   : > { %1002 = vadd.xlane.f32.xlu1 %v983_v35  ;;  %v7604_v27 = vld [vmem:[%s9204_s3 + $0xa8] ss:$12 sps:$4 sm:$0xff]   ;;  %v7605_v32 = vld [vmem:[%s9204_s3 + $0x98] ss:$12 sps:$4 sm:$0xff]   ;;  %v911_v34 = vld [vmem:[#allocation5 + $0x70] sm:$0xff]  ;;  %v11415_v35 = vmov 0  }
 0x1b5   : > { %1375 = vmatpush1.bf16.msra.mxu0 %v7588_v61  ;;  %7078 = vmatpush3.bf16.msra.mxu1 %v7591_v1  ;;  %11528 = vst [vmem:[#allocation44_spill] sm:$0xff] %v9301_v30  ;;  %11529 = vst [vmem:[#allocation45_spill] sm:$0xff] %v9303_v31  ;;  %v895_v33 = vld [vmem:[#allocation18 + $0x70] sm:$0xff]  ;;  %v992_v37 = vmul.f32 %v9301_v30, %v9301_v30  ;;  %v896_v39 = vld [vmem:[#allocation18 + $0x78] sm:$0xff]  ;;  %v993_v41 = vmul.f32 %v9303_v31, %v9303_v31 }
 0x1b6   : > { %939 = vadd.xlane.f32.xlu0 %v9239_v36  ;;  %1376 = vmatprep.subr.bf16.mxu0 %v7589_v0  ;;  %v9314_v43 = vadd.f32 %v911_v34, %v895_v33  ;;  %v9316_v44 = vadd.f32 %v912_v40, %v896_v39 }
 0x1b7   : > { %7079 = vmatprep.subr.bf16.mxu1 %v7595_v10  ;;  %1400 = vmatprep.mubr.bf16.mxu0 %v11415_v35 }
 0x1b8   : > { %941 = vadd.xlane.f32.xlu1 %v9242_v38  ;;  %11530 = vst [vmem:[#allocation46_spill] sm:$0xff] %v9314_v43  ;;  %11531 = vst [vmem:[#allocation47_spill] sm:$0xff] %v9316_v44  ;;  %v994_v45 = vmul.f32 %v9314_v43, %v9314_v43 }
 0x1b9   : > { %1377 = vmatpush1.bf16.msra.mxu0 %v7592_v4  ;;  %7080 = vmatpush3.bf16.msra.mxu1 %v7595_v10 }
 0x1ba   : > { %1004 = vadd.xlane.f32.xlu0 %v984_v42  ;;  %1378 = vmatprep.subr.bf16.mxu0 %v7593_v9  ;;  %v7606_v42 = vld [vmem:[%s9204_s3 + $0xb0] ss:$12 sps:$4 sm:$0xff]  }
 0x1bb   : > { %7081 = vmatprep.subr.bf16.mxu1 %v7599_v15 }
 0x1bc   : > { %1006 = vadd.xlane.f32.xlu1 %v985_v46  ;;  %v995_v46 = vmul.f32 %v9316_v44, %v9316_v44 }
 0x1bd   : > { %1379 = vmatpush1.bf16.msra.mxu0 %v7596_v11  ;;  %7082 = vmatpush3.bf16.msra.mxu1 %v7599_v15 }
 0x1be   : > { %943 = vadd.xlane.f32.xlu0 %v9253_v48  ;;  %1380 = vmatprep.subr.bf16.mxu0 %v7597_v14 }
 0x1bf   : > { %7083 = vmatprep.subr.bf16.mxu1 %v7603_v26 }
 0x1c0   : > { %945 = vadd.xlane.f32.xlu1 %v9257_v51 }
 0x1c1   : > { %1381 = vmatpush1.bf16.msra.mxu0 %v7600_v18  ;;  %7084 = vmatpush3.bf16.msra.mxu1 %v7603_v26 }
 0x1c2   : > { %1008 = vadd.xlane.f32.xlu0 %v986_v55  ;;  %1382 = vmatprep.subr.bf16.mxu0 %v7601_v25 }
 0x1c3   : > { %7085 = vmatprep.subr.bf16.mxu1 %v7605_v32 }
 0x1c4   : > { %1010 = vadd.xlane.f32.xlu1 %v987_v58 }
 0x1c5   : > { %1383 = vmatpush1.bf16.msra.mxu0 %v7604_v27  ;;  %7086 = vmatpush3.bf16.msra.mxu1 %v7605_v32 }
 0x1c6   : > { %947 = vadd.xlane.f32.xlu0 %v9269_v62  ;;  %7087 = vmatprep.subr.bf16.mxu1 %v7606_v42 }
 0x1c8   : > { %949 = vadd.xlane.f32.xlu1 %v9271_v63 }
 0x1c9   : > { %7088 = vmatpush3.bf16.msra.mxu1 %v7606_v42 }
 0x1ca   : > { %1012 = vadd.xlane.f32.xlu0 %v988_v5 }
 0x1cc   : > { %1014 = vadd.xlane.f32.xlu1 %v989_v8 }
 0x1ce   : > { %951 = vadd.xlane.f32.xlu0 %v9285_v12 }
 0x1d0   : > { %953 = vadd.xlane.f32.xlu1 %v9287_v13 }
 0x1d2   : > { %1016 = vadd.xlane.f32.xlu0 %v990_v20 }
 0x1d4   : > { %1018 = vadd.xlane.f32.xlu1 %v991_v24 }
 0x1d6   : > { %955 = vadd.xlane.f32.xlu0 %v9301_v30 }
 0x1d8   : > { %957 = vadd.xlane.f32.xlu1 %v9303_v31 }
 0x1da   : > { %1020 = vadd.xlane.f32.xlu0 %v992_v37 }
 0x1dc   : > { %1022 = vadd.xlane.f32.xlu1 %v993_v41 }
 0x1de   : > { %959 = vadd.xlane.f32.xlu0 %v9314_v43 }
 0x1e0   : > { %961 = vadd.xlane.f32.xlu1 %v9316_v44 }
 0x1e2   : > { %1024 = vadd.xlane.f32.xlu0 %v994_v45 }
 0x1e4   : > { %1026 = vadd.xlane.f32.xlu1 %v995_v46  ;;  %v9343_v46 = vld [vmem:[%s674_s14] ss:$0 sm:$0xff]  ;;  %s6310_s14 = sshll.u32 %s8644_s0, 4  ;;  %s6311_s14 = int_to_ptr.vmem [resolvable:$true] %s6310_s14 }
 0x1e5   : > { %s8529_s15 = scalar_lea.vmem %s6311_s14, 2048  ;;  %p8536_p13 = scmp.lt.s32.totalorder %s6311_s14, %s6311_s14 }
 0x1e6   : > { %p8530_p3 = scmp.ne.s32.totalorder %s6311_s14, %s8529_s15  ;;  %p8537_p2 = scmp.lt.s32.totalorder %s8529_s15, %s8529_s15 }
 0x1e8   : > { %p8531_p11 = pnand %p8530_p3, %p7508_p8  ;;  %p8538_p12 = por %p8537_p2, %p8536_p13 }
 0x1ea   : > { %p8532_p5 = pneg %p8531_p11 }
 0x1ec   : > { %p8539_p10 = pnand %p8538_p12, %p8532_p5 }
 0x233   : > { %v932_v47 = vpop.xlane.xlu0 %931 }
 0x234   : > { %v964_v49 = vmul.f32 0.0078125, %v932_v47 }
 0x235   : > { %v997_v50 = vpop.xlane.xlu1 %996 }
 0x236   : > { %v1044_v52 = vmul.f32 %v964_v49, %v964_v49  ;;  %v1028_v53 = vmul.f32 0.0078125, %v997_v50  ;;  %v1092_v26 = vsub.f32 %v9219_v19, %v964_v49 }
 0x237   : > { %v934_v54 = vpop.xlane.xlu0 %933 }
 0x238   : > { %v1060_v55 = vsub.f32 %v1028_v53, %v1044_v52  ;;  %v965_v56 = vmul.f32 0.0078125, %v934_v54 }
 0x239   : > { %v999_v57 = vpop.xlane.xlu1 %998 }
 0x23a   : > { %v1076_v58 = vmax.f32 %v1060_v55, 0.0  ;;  %v1045_v59 = vmul.f32 %v965_v56, %v965_v56  ;;  %v1029_v60 = vmul.f32 0.0078125, %v999_v57  ;;  %v1093_v47 = vsub.f32 %v9221_v21, %v965_v56 }
 0x23b   : > { %v936_v61 = vpop.xlane.xlu0 %935 }
 0x23c   : > { %v1108_v0 = vadd.f32 1e-05, %v1076_v58  ;;  %v1061_v1 = vsub.f32 %v1029_v60, %v1045_v59  ;;  %v9324_v2 = vmul.f32 0.0078125, %v936_v61 }
 0x23d   : > { %v938_v3 = vpop.xlane.xlu1 %937 }
 0x23e   : > { %7695 = vrsqrt.f32 %v1108_v0  ;;  %v1077_v4 = vmax.f32 %v1061_v1, 0.0  ;;  %v1046_v5 = vmul.f32 %v9324_v2, %v9324_v2  ;;  %v9328_v6 = vmul.f32 0.0078125, %v938_v3  ;;  %v9353_v0 = vld [vmem:[%s682_s21] ss:$0 sm:$0xff] }
 0x23f   : > { %v1001_v7 = vpop.xlane.xlu0 %1000 }
 0x240   : > { %v1109_v8 = vadd.f32 1e-05, %v1077_v4  ;;  %v1030_v9 = vmul.f32 0.0078125, %v1001_v7  ;;  %v1047_v11 = vmul.f32 %v9328_v6, %v9328_v6  ;;  %v1094_v7 = vsub.f32 %v9229_v28, %v9324_v2 }
 0x241   : > { %v1003_v10 = vpop.xlane.xlu1 %1002 }
 0x242   : > { %7697 = vrsqrt.f32 %v1109_v8  ;;  %v1062_v14 = vsub.f32 %v1030_v9, %v1046_v5  ;;  %v1031_v15 = vmul.f32 0.0078125, %v1003_v10 }
 0x243   : > { %v940_v16 = vpop.xlane.xlu0 %939 }
 0x244   : > { %v1078_v17 = vmax.f32 %v1062_v14, 0.0  ;;  %v1063_v18 = vsub.f32 %v1031_v15, %v1047_v11  ;;  %v9332_v20 = vmul.f32 0.0078125, %v940_v16 }
 0x245   : > { %v942_v22 = vpop.xlane.xlu1 %941 }
 0x246   : > { %v1110_v23 = vadd.f32 1e-05, %v1078_v17  ;;  %v1079_v24 = vmax.f32 %v1063_v18, 0.0  ;;  %v1048_v25 = vmul.f32 %v9332_v20, %v9332_v20  ;;  %v9337_v27 = vmul.f32 0.0078125, %v942_v22 }
 0x247   : > { %v1005_v32 = vpop.xlane.xlu0 %1004  ;;  %v1095_v17 = vsub.f32 %v9231_v29, %v9328_v6 }
 0x248   : > { %v7696_v33 = vpop.eup %7695  ;;  %7699 = vrsqrt.f32 %v1110_v23  ;;  %v1111_v34 = vadd.f32 1e-05, %v1079_v24  ;;  %v1032_v37 = vmul.f32 0.0078125, %v1005_v32  ;;  %v1049_v41 = vmul.f32 %v9337_v27, %v9337_v27 }
 0x249   : > { %v1007_v39 = vpop.xlane.xlu1 %1006  ;;  %v1140_v40 = vmul.f32 %v7696_v33, %v1092_v26 }
 0x24a   : > { %7701 = vrsqrt.f32 %v1111_v34  ;;  %v1064_v42 = vsub.f32 %v1032_v37, %v1048_v25  ;;  %v1033_v45 = vmul.f32 0.0078125, %v1007_v39 }
 0x24b   : > { %v944_v49 = vpop.xlane.xlu0 %943  ;;  %v1162_v58 = vmul.f32 %v9343_v46, %v1140_v40 }
 0x24c   : > { %v7698_v50 = vpop.eup %7697  ;;  %v1080_v52 = vmax.f32 %v1064_v42, 0.0  ;;  %v1065_v53 = vsub.f32 %v1033_v45, %v1049_v41  ;;  %v9346_v54 = vmul.f32 0.0078125, %v944_v49  ;;  %v1096_v49 = vsub.f32 %v9239_v36, %v9332_v20 }
 0x24d   : > { %v946_v55 = vpop.xlane.xlu1 %945  ;;  %v1141_v57 = vmul.f32 %v7698_v50, %v1093_v47  ;;  %v1184_v9 = vadd.f32 %v9353_v0, %v1162_v58 }
 0x24e   : > { %v1112_v59 = vadd.f32 1e-05, %v1080_v52  ;;  %v1081_v60 = vmax.f32 %v1065_v53, 0.0  ;;  %v1050_v61 = vmul.f32 %v9346_v54, %v9346_v54  ;;  %v9355_v1 = vmul.f32 0.0078125, %v946_v55 }
 0x24f   : > { %v1009_v56 = vpop.xlane.xlu0 %1008  ;;  %v1163_v3 = vmul.f32 %v9343_v46, %v1141_v57 }
 0x250   : > { %7703 = vrsqrt.f32 %v1112_v59  ;;  %v1113_v4 = vadd.f32 1e-05, %v1081_v60  ;;  %v1034_v5 = vmul.f32 0.0078125, %v1009_v56  ;;  %v1051_v14 = vmul.f32 %v9355_v1, %v9355_v1 }
 0x251   : > { %v1011_v8 = vpop.xlane.xlu1 %1010  ;;  %v1185_v10 = vadd.f32 %v9353_v0, %v1163_v3  ;;  %v1097_v60 = vsub.f32 %v9242_v38, %v9337_v27 }
 0x252   : > { %v7700_v11 = vpop.eup %7699  ;;  %7705 = vrsqrt.f32 %v1113_v4  ;;  %v1066_v15 = vsub.f32 %v1034_v5, %v1050_v61  ;;  %v1035_v16 = vmul.f32 0.0078125, %v1011_v8 }
 0x253   : > { %v948_v18 = vpop.xlane.xlu0 %947  ;;  %v1200_v22 = vpack.c.bf16 %v1185_v10, %v1184_v9  ;;  %v1142_v23 = vmul.f32 %v7700_v11, %v1094_v7 }
 0x254   : > { %v7702_v24 = vpop.eup %7701  ;;  %v1082_v2 = vmax.f32 %v1066_v15, 0.0  ;;  %v1067_v25 = vsub.f32 %v1035_v16, %v1051_v14  ;;  %v9366_v26 = vmul.f32 0.0078125, %v948_v18 }
 0x255   : > { %1401 = vmatmul.mubr.bf16.vlgmr.msra.gmra.mrb[0].mxu0 %v1200_v22  ;;  %7089 = vmatprep.mubr.bf16.mxu1 %v1200_v22  ;;  %v950_v32 = vpop.xlane.xlu1 %949  ;;  %v1143_v33 = vmul.f32 %v7702_v24, %v1095_v17  ;;  %v1164_v34 = vmul.f32 %v9343_v46, %v1142_v23  ;;  %v1098_v23 = vsub.f32 %v9253_v48, %v9346_v54 }
 0x256   : > { %v1114_v37 = vadd.f32 1e-05, %v1082_v2  ;;  %v1083_v39 = vmax.f32 %v1067_v25, 0.0  ;;  %v1052_v40 = vmul.f32 %v9366_v26, %v9366_v26  ;;  %1410 = vmatprep.mubr.bf16.mxu0 %v11415_v35  ;;  %v9372_v6 = vmul.f32 0.0078125, %v950_v32 }
 0x257   : > { %v1013_v41 = vpop.xlane.xlu0 %1012  ;;  %v1165_v42 = vmul.f32 %v9343_v46, %v1143_v33  ;;  %v1186_v52 = vadd.f32 %v9353_v0, %v1164_v34 }
 0x258   : > { %7707 = vrsqrt.f32 %v1114_v37  ;;  %v1115_v45 = vadd.f32 1e-05, %v1083_v39  ;;  %v1036_v47 = vmul.f32 0.0078125, %v1013_v41  ;;  %v1053_v57 = vmul.f32 %v9372_v6, %v9372_v6 }
 0x259   : > { %v1015_v50 = vpop.xlane.xlu1 %1014  ;;  %v1187_v53 = vadd.f32 %v9353_v0, %v1165_v42  ;;  %v1099_v39 = vsub.f32 %v9257_v51, %v9355_v1 }
 0x25a   : > { %v7704_v55 = vpop.eup %7703  ;;  %7709 = vrsqrt.f32 %v1115_v45  ;;  %v1068_v58 = vsub.f32 %v1036_v47, %v1052_v40  ;;  %v1037_v59 = vmul.f32 0.0078125, %v1015_v50 }
 0x25b   : > { %v952_v61 = vpop.xlane.xlu0 %951  ;;  %v1201_v56 = vpack.c.bf16 %v1187_v53, %v1186_v52  ;;  %v1144_v3 = vmul.f32 %v7704_v55, %v1096_v49 }
 0x25c   : > { %v7706_v4 = vpop.eup %7705  ;;  %v1084_v20 = vmax.f32 %v1068_v58, 0.0  ;;  %v1069_v5 = vsub.f32 %v1037_v59, %v1053_v57  ;;  %v9383_v7 = vmul.f32 0.0078125, %v952_v61 }
 0x25d   : > { %1411 = vmatmul.mubr.bf16.gmra.mrb[4].mxu0 %v1201_v56  ;;  %7090 = vmatmul.mubr.bf16.vlgmr.msra.gmra.mrb[0].mxu1 %v1201_v56  ;;  %v954_v8 = vpop.xlane.xlu1 %953  ;;  %v1145_v9 = vmul.f32 %v7706_v4, %v1097_v60  ;;  %v1166_v10 = vmul.f32 %v9343_v46, %v1144_v3  ;;  %v1100_v3 = vsub.f32 %v9269_v62, %v9366_v26 }
 0x25e   : > { %v1116_v11 = vadd.f32 1e-05, %v1084_v20  ;;  %v1085_v14 = vmax.f32 %v1069_v5, 0.0  ;;  %v1054_v15 = vmul.f32 %v9383_v7, %v9383_v7  ;;  %1420 = vmatprep.mubr.bf16.mxu0 %v11415_v35  ;;  %v9389_v27 = vmul.f32 0.0078125, %v954_v8 }
 0x25f   : > { %v1017_v16 = vpop.xlane.xlu0 %1016  ;;  %v1167_v17 = vmul.f32 %v9343_v46, %v1145_v9  ;;  %v1188_v2 = vadd.f32 %v9353_v0, %v1166_v10 }
 0x260   : > { %7711 = vrsqrt.f32 %v1116_v11  ;;  %v1117_v18 = vadd.f32 1e-05, %v1085_v14  ;;  %v1038_v22 = vmul.f32 0.0078125, %v1017_v16  ;;  %v1055_v33 = vmul.f32 %v9389_v27, %v9389_v27 }
 0x261   : > { %v1019_v24 = vpop.xlane.xlu1 %1018  ;;  %v1189_v25 = vadd.f32 %v9353_v0, %v1167_v17  ;;  %v1101_v14 = vsub.f32 %v9271_v63, %v9372_v6 }
 0x262   : > { %v7708_v32 = vpop.eup %7707  ;;  %7713 = vrsqrt.f32 %v1117_v18  ;;  %v1070_v34 = vsub.f32 %v1038_v22, %v1054_v15  ;;  %v1039_v37 = vmul.f32 0.0078125, %v1019_v24 }
 0x263   : > { %v956_v40 = vpop.xlane.xlu0 %955  ;;  %v1202_v41 = vpack.c.bf16 %v1189_v25, %v1188_v2  ;;  %v1146_v42 = vmul.f32 %v7708_v32, %v1098_v23 }
 0x264   : > { %v7710_v45 = vpop.eup %7709  ;;  %v1086_v54 = vmax.f32 %v1070_v34, 0.0  ;;  %v1071_v47 = vsub.f32 %v1039_v37, %v1055_v33  ;;  %v9400_v49 = vmul.f32 0.0078125, %v956_v40 }
 0x265   : > { %1421 = vmatmul.mubr.bf16.gmra.mrb[8].mxu0 %v1202_v41  ;;  %7093 = vmatprep.mubr.bf16.mxu1 %v1202_v41  ;;  %v958_v50 = vpop.xlane.xlu1 %957  ;;  %v1147_v52 = vmul.f32 %v7710_v45, %v1099_v39  ;;  %v1168_v53 = vmul.f32 %v9343_v46, %v1146_v42  ;;  %v1102_v42 = vsub.f32 %v9285_v12, %v9383_v7 }
 0x266   : > { %v1118_v55 = vadd.f32 1e-05, %v1086_v54  ;;  %v1087_v57 = vmax.f32 %v1071_v47, 0.0  ;;  %v1056_v58 = vmul.f32 %v9400_v49, %v9400_v49  ;;  %1430 = vmatprep.mubr.bf16.mxu0 %v11415_v35  ;;  %v9406_v1 = vmul.f32 0.0078125, %v958_v50 }
 0x267   : > { %v1021_v59 = vpop.xlane.xlu0 %1020  ;;  %v1169_v60 = vmul.f32 %v9343_v46, %v1147_v52  ;;  %v1190_v20 = vadd.f32 %v9353_v0, %v1168_v53 }
 0x268   : > { %7715 = vrsqrt.f32 %v1118_v55  ;;  %v1119_v61 = vadd.f32 1e-05, %v1087_v57  ;;  %v1040_v56 = vmul.f32 0.0078125, %v1021_v59  ;;  %v1057_v9 = vmul.f32 %v9406_v1, %v9406_v1 }
 0x269   : > { %v1023_v4 = vpop.xlane.xlu1 %1022  ;;  %v1191_v5 = vadd.f32 %v9353_v0, %v1169_v60  ;;  %v1103_v57 = vsub.f32 %v9287_v13, %v9389_v27  ;;  %v1104_v27 = vsub.f32 %v9301_v30, %v9400_v49 }
 0x26a   : > { %v7712_v8 = vpop.eup %7711  ;;  %7717 = vrsqrt.f32 %v1119_v61  ;;  %v1072_v10 = vsub.f32 %v1040_v56, %v1056_v58  ;;  %v1041_v11 = vmul.f32 0.0078125, %v1023_v4 }
 0x26b   : > { %v960_v15 = vpop.xlane.xlu0 %959  ;;  %v1203_v16 = vpack.c.bf16 %v1191_v5, %v1190_v20  ;;  %v1148_v17 = vmul.f32 %v7712_v8, %v1100_v3 }
 0x26c   : > { %v7714_v18 = vpop.eup %7713  ;;  %v1088_v26 = vmax.f32 %v1072_v10, 0.0  ;;  %v1073_v22 = vsub.f32 %v1041_v11, %v1057_v9  ;;  %v9417_v23 = vmul.f32 0.0078125, %v960_v15 }
 0x26d   : > { %1431 = vmatmul.mubr.bf16.gmra.mrb[12].mxu0 %v1203_v16  ;;  %7094 = vmatmul.mubr.bf16.gmra.mrb[4].mxu1 %v1203_v16  ;;  %v962_v24 = vpop.xlane.xlu1 %961  ;;  %v1149_v2 = vmul.f32 %v7714_v18, %v1101_v14  ;;  %v1170_v25 = vmul.f32 %v9343_v46, %v1148_v17  ;;  %v1105_v14 = vsub.f32 %v9303_v31, %v9406_v1 }
 0x26e   : > { %v1120_v32 = vadd.f32 1e-05, %v1088_v26  ;;  %v1089_v33 = vmax.f32 %v1073_v22, 0.0  ;;  %v1058_v34 = vmul.f32 %v9417_v23, %v9417_v23  ;;  %1440 = vmatprep.mubr.bf16.mxu0 %v11415_v35  ;;  %v979_v6 = vmul.f32 0.0078125, %v962_v24 }
 0x26f   : > { %v1025_v37 = vpop.xlane.xlu0 %1024  ;;  %v1171_v39 = vmul.f32 %v9343_v46, %v1149_v2  ;;  %v1192_v54 = vadd.f32 %v9353_v0, %v1170_v25  ;;  %v1106_v22 = vsub.f32 %v9314_v43, %v9417_v23 }
 0x270   : > { %7719 = vrsqrt.f32 %v1120_v32  ;;  %v1121_v40 = vadd.f32 1e-05, %v1089_v33  ;;  %v1042_v41 = vmul.f32 0.0078125, %v1025_v37  ;;  %v1059_v52 = vmul.f32 %v979_v6, %v979_v6 }
 0x271   : > { %v1027_v45 = vpop.xlane.xlu1 %1026  ;;  %v1193_v47 = vadd.f32 %v9353_v0, %v1171_v39  ;;  %v1107_v25 = vsub.f32 %v9316_v44, %v979_v6 }
 0x272   : > { %v7716_v50 = vpop.eup %7715  ;;  %7721 = vrsqrt.f32 %v1121_v40  ;;  %v1074_v53 = vsub.f32 %v1042_v41, %v1058_v34  ;;  %v1043_v55 = vmul.f32 0.0078125, %v1027_v45 }
 0x273   : > { %v1204_v58 = vpack.c.bf16 %v1193_v47, %v1192_v54  ;;  %v1150_v59 = vmul.f32 %v7716_v50, %v1102_v42 }
 0x274   : > { %v7718_v60 = vpop.eup %7717  ;;  %v1090_v61 = vmax.f32 %v1074_v53, 0.0  ;;  %v1075_v56 = vsub.f32 %v1043_v55, %v1059_v52 }
 0x275   : > { %1441 = vmatmul.mubr.bf16.gmra.mrb[16].mxu0 %v1204_v58  ;;  %7097 = vmatprep.mubr.bf16.mxu1 %v1204_v58  ;;  %v1151_v7 = vmul.f32 %v7718_v60, %v1103_v57  ;;  %v1172_v3 = vmul.f32 %v9343_v46, %v1150_v59 }
 0x276   : > { %v1122_v4 = vadd.f32 1e-05, %v1090_v61  ;;  %v1091_v20 = vmax.f32 %v1075_v56, 0.0  ;;  %1450 = vmatprep.mubr.bf16.mxu0 %v11415_v35 }
 0x277   : > { %v1173_v5 = vmul.f32 %v9343_v46, %v1151_v7  ;;  %v1194_v9 = vadd.f32 %v9353_v0, %v1172_v3 }
 0x278   : > { %7723 = vrsqrt.f32 %v1122_v4  ;;  %v1123_v8 = vadd.f32 1e-05, %v1091_v20 }
 0x279   : > { %v1195_v10 = vadd.f32 %v9353_v0, %v1173_v5 }
 0x27a   : > { %v7720_v11 = vpop.eup %7719  ;;  %7725 = vrsqrt.f32 %v1123_v8 }
 0x27b   : > { %v1205_v15 = vpack.c.bf16 %v1195_v10, %v1194_v9  ;;  %v1152_v16 = vmul.f32 %v7720_v11, %v1104_v27 }
 0x27c   : > { %v7722_v17 = vpop.eup %7721 }
 0x27d   : > { %1451 = vmatmul.mubr.bf16.gmra.mrb[20].mxu0 %v1205_v15  ;;  %7098 = vmatmul.mubr.bf16.gmra.mrb[8].mxu1 %v1205_v15  ;;  %v1153_v18 = vmul.f32 %v7722_v17, %v1105_v14  ;;  %v1174_v26 = vmul.f32 %v9343_v46, %v1152_v16 }
 0x27e   : > { %1460 = vmatprep.mubr.bf16.mxu0 %v11415_v35 }
 0x27f   : > { %v1175_v49 = vmul.f32 %v9343_v46, %v1153_v18  ;;  %v1196_v24 = vadd.f32 %v9353_v0, %v1174_v26 }
 0x281   : > { %v1197_v2 = vadd.f32 %v9353_v0, %v1175_v49 }
 0x282   : > { %v7724_v1 = vpop.eup %7723 }
 0x283   : > { %v1206_v32 = vpack.c.bf16 %v1197_v2, %v1196_v24  ;;  %v1154_v33 = vmul.f32 %v7724_v1, %v1106_v22 }
 0x284   : > { %v7726_v34 = vpop.eup %7725 }
 0x285   : > { %1461 = vmatmul.mubr.bf16.gmra.mrb[24].mxu0 %v1206_v32  ;;  %7101 = vmatprep.mubr.bf16.mxu1 %v1206_v32  ;;  %v1155_v37 = vmul.f32 %v7726_v34, %v1107_v25  ;;  %v1176_v39 = vmul.f32 %v9343_v46, %v1154_v33 }
 0x286   : > { %1470 = vmatprep.mubr.bf16.mxu0 %v11415_v35 }
 0x287   : > { %v1177_v40 = vmul.f32 %v9343_v46, %v1155_v37  ;;  %v1198_v23 = vadd.f32 %v9353_v0, %v1176_v39 }
 0x289   : > { %v1199_v41 = vadd.f32 %v9353_v0, %v1177_v40 }
 0x28b   : > { %v1207_v42 = vpack.c.bf16 %v1199_v41, %v1198_v23 }
 0x28d   : > { %1471 = vmatmul.mubr.bf16.gmra.mrb[28].mxu0 %v1207_v42  ;;  %7102 = vmatmul.mubr.bf16.gmra.mrb[12].mxu1 %v1207_v42 }
 0x328   : > { %v1402_v6 = vpop.f32.mrb[0].mxu0 }
 0x329   : > { %v1404_v45 = vpop.f32.mrb[1].mxu0 }
 0x32a   : > { %v1406_v54 = vpop.f32.mrb[2].mxu0 }
 0x32b   : > { %v9452_v47 = vpack.c.bf16 %v1406_v54, %v1402_v6  ;;  %v1408_v50 = vpop.f32.mrb[3].mxu0 }
 0x32c   : > { %v9454_v52 = vpack.c.bf16 %v1408_v50, %v1404_v45 }
 0x32d   : > { %7109 = vmatprep.mubr.msk.bf16.mxu1 %vm1602_vm0, %v9452_v47 }
 0x32e   : > { %7393 = vmatprep.subr.msk.bf16.mxu1 %vm1602_vm0, %v9454_v52  ;;  %v1610_v46 = vsel %vm1602_vm0, %v9454_v52, 0 }
 0x32f   : > { %7106 = vmatpush3.bf16.xpose.msra.mxu1 %v1610_v46 }
 0x330   : > { %v1412_v0 = vpop.f32.mrb[4].mxu0  ;;  %v7091_v53 = vpop.f32.mrb[0].mxu1 }
 0x331   : > { %v1414_v55 = vpop.f32.mrb[5].mxu0  ;;  %v1515_v57 = vpop.f32.mrb[1].mxu1 }
 0x332   : > { %v1416_v58 = vpop.f32.mrb[6].mxu0  ;;  %v7092_v59 = vpop.f32.mrb[2].mxu1 }
 0x333   : > { %v9462_v60 = vpack.c.bf16 %v1416_v58, %v1412_v0  ;;  %v9464_v61 = vpack.c.bf16 %v7092_v59, %v7091_v53  ;;  %v1418_v56 = vpop.f32.mrb[7].mxu0  ;;  %v1518_v7 = vpop.f32.mrb[3].mxu1 }
 0x334   : > { %v9466_v3 = vpack.c.bf16 %v1418_v56, %v1414_v55  ;;  %v9468_v4 = vpack.c.bf16 %v1518_v7, %v1515_v57 }
 0x336   : > { %7394 = vmatprep.subr.msk.bf16.mxu1 %vm1602_vm0, %v9466_v3  ;;  %v1613_v20 = vsel %vm1602_vm0, %v9466_v3, 0 }
 0x337   : > { %7108 = vmatpush3.bf16.xpose.msra.mxu1 %v1613_v20 }
 0x338   : > { %v1422_v5 = vpop.f32.mrb[8].mxu0 }
 0x339   : > { %v1424_v8 = vpop.f32.mrb[9].mxu0 }
 0x33a   : > { %v1426_v27 = vpop.f32.mrb[10].mxu0 }
 0x33b   : > { %v9474_v9 = vpack.c.bf16 %v1426_v27, %v1422_v5  ;;  %v1428_v10 = vpop.f32.mrb[11].mxu0 }
 0x33c   : > { %v9476_v11 = vpack.c.bf16 %v1428_v10, %v1424_v8 }
 0x33e   : > { %7110 = vmatmul.mubr.msk.bf16.vlgmr.msra.gmra.mrb[16].mxu1 %vm1602_vm0, %v9462_v60  ;;  %7395 = vmatprep.subr.msk.bf16.mxu1 %vm1602_vm0, %v9476_v11  ;;  %v1671_v14 = vsel %vm1602_vm0, %v9476_v11, 0 }
 0x33f   : > { %7114 = vmatpush3.bf16.xpose.msra.mxu1 %v1671_v14  ;;  %7117 = vmatprep.mubr.msk.bf16.mxu1 %vm1602_vm0, %v9474_v9 }
 0x340   : > { %v1432_v15 = vpop.f32.mrb[12].mxu0  ;;  %v7095_v16 = vpop.f32.mrb[4].mxu1 }
 0x341   : > { %v1434_v17 = vpop.f32.mrb[13].mxu0  ;;  %v1531_v18 = vpop.f32.mrb[5].mxu1 }
 0x342   : > { %v1436_v26 = vpop.f32.mrb[14].mxu0  ;;  %v7096_v49 = vpop.f32.mrb[6].mxu1 }
 0x343   : > { %v9486_v22 = vpack.c.bf16 %v1436_v26, %v1432_v15  ;;  %v9488_v24 = vpack.c.bf16 %v7096_v49, %v7095_v16  ;;  %v1438_v2 = vpop.f32.mrb[15].mxu0  ;;  %v1534_v1 = vpop.f32.mrb[7].mxu1 }
 0x344   : > { %v9490_v25 = vpack.c.bf16 %v1438_v2, %v1434_v17  ;;  %v9492_v32 = vpack.c.bf16 %v1534_v1, %v1531_v18 }
 0x346   : > { %7396 = vmatprep.subr.msk.bf16.mxu1 %vm1602_vm0, %v9490_v25  ;;  %v1674_v33 = vsel %vm1602_vm0, %v9490_v25, 0 }
 0x347   : > { %7116 = vmatpush3.bf16.xpose.msra.mxu1 %v1674_v33 }
 0x348   : > { %v1442_v34 = vpop.f32.mrb[16].mxu0 }
 0x349   : > { %v1444_v37 = vpop.f32.mrb[17].mxu0 }
 0x34a   : > { %v1446_v39 = vpop.f32.mrb[18].mxu0 }
 0x34b   : > { %v9498_v40 = vpack.c.bf16 %v1446_v39, %v1442_v34  ;;  %v1448_v23 = vpop.f32.mrb[19].mxu0 }
 0x34c   : > { %v9500_v41 = vpack.c.bf16 %v1448_v23, %v1444_v37 }
 0x34d   : > { %7125 = vmatprep.mubr.msk.bf16.mxu0 %vm1602_vm0, %v9498_v40 }
 0x34e   : > { %7118 = vmatmul.mubr.msk.bf16.vlgmr.msra.gmra.mrb[20].mxu1 %vm1602_vm0, %v9486_v22  ;;  %7397 = vmatprep.subr.msk.bf16.mxu0 %vm1602_vm0, %v9500_v41  ;;  %v1732_v42 = vsel %vm1602_vm0, %v9500_v41, 0 }
 0x34f   : > { %7122 = vmatpush3.bf16.xpose.msra.mxu0 %v1732_v42 }
 0x350   : > { %v1452_v6 = vpop.f32.mrb[20].mxu0  ;;  %v7099_v45 = vpop.f32.mrb[8].mxu1 }
 0x351   : > { %v1454_v54 = vpop.f32.mrb[21].mxu0  ;;  %v1547_v50 = vpop.f32.mrb[9].mxu1 }
 0x352   : > { %v1456_v46 = vpop.f32.mrb[22].mxu0  ;;  %v7100_v0 = vpop.f32.mrb[10].mxu1 }
 0x353   : > { %v9510_v53 = vpack.c.bf16 %v1456_v46, %v1452_v6  ;;  %v9512_v55 = vpack.c.bf16 %v7100_v0, %v7099_v45  ;;  %v1458_v57 = vpop.f32.mrb[23].mxu0  ;;  %v1550_v58 = vpop.f32.mrb[11].mxu1 }
 0x354   : > { %v9514_v59 = vpack.c.bf16 %v1458_v57, %v1454_v54  ;;  %v9516_v56 = vpack.c.bf16 %v1550_v58, %v1547_v50 }
 0x356   : > { %7398 = vmatprep.subr.msk.bf16.mxu0 %vm1602_vm0, %v9514_v59  ;;  %v1735_v7 = vsel %vm1602_vm0, %v9514_v59, 0 }
 0x357   : > { %7124 = vmatpush3.bf16.xpose.msra.mxu0 %v1735_v7 }
 0x358   : > { %v1462_v20 = vpop.f32.mrb[24].mxu0  ;;  %7137 = vmatprep.subr.bf16.mxu0 %v9468_v4 }
 0x359   : > { %v1464_v5 = vpop.f32.mrb[25].mxu0 }
 0x35a   : > { %v1466_v8 = vpop.f32.mrb[26].mxu0 }
 0x35b   : > { %v9523_v27 = vpack.c.bf16 %v1466_v8, %v1462_v20  ;;  %v1468_v10 = vpop.f32.mrb[27].mxu0 }
 0x35c   : > { %v9525_v14 = vpack.c.bf16 %v1468_v10, %v1464_v5 }
 0x35d   : > { %7133 = vmatprep.mubr.msk.bf16.mxu1 %vm1602_vm0, %v9523_v27 }
 0x35e   : > { %7126 = vmatmul.mubr.msk.bf16.vlgmr.msra.gmra.mrb[32].mxu0 %vm1602_vm0, %v9510_v53  ;;  %7399 = vmatprep.subr.msk.bf16.mxu1 %vm1602_vm0, %v9525_v14  ;;  %v1793_v15 = vsel %vm1602_vm0, %v9525_v14, 0 }
 0x35f   : > { %7130 = vmatpush3.bf16.xpose.msra.mxu1 %v1793_v15  ;;  %7138 = vmatpush3.bf16.msra.mxu0 %v9468_v4 }
 0x360   : > { %v1472_v16 = vpop.f32.mrb[28].mxu0  ;;  %v7103_v17 = vpop.f32.mrb[12].mxu1  ;;  %7139 = vmatprep.subr.bf16.mxu0 %v9464_v61 }
 0x361   : > { %v1474_v18 = vpop.f32.mrb[29].mxu0  ;;  %v1563_v26 = vpop.f32.mrb[13].mxu1 }
 0x362   : > { %v1476_v49 = vpop.f32.mrb[30].mxu0  ;;  %v7104_v2 = vpop.f32.mrb[14].mxu1 }
 0x363   : > { %v9537_v1 = vpack.c.bf16 %v1476_v49, %v1472_v16  ;;  %v9539_v33 = vpack.c.bf16 %v7104_v2, %v7103_v17  ;;  %v1478_v34 = vpop.f32.mrb[31].mxu0  ;;  %v1566_v37 = vpop.f32.mrb[15].mxu1  ;;  %7140 = vmatpush3.bf16.msra.mxu0 %v9464_v61 }
 0x364   : > { %v9542_v39 = vpack.c.bf16 %v1478_v34, %v1474_v18  ;;  %v9544_v23 = vpack.c.bf16 %v1566_v37, %v1563_v26  ;;  %7153 = vmatprep.subr.bf16.mxu0 %v9516_v56 }
 0x366   : > { %7400 = vmatprep.subr.msk.bf16.mxu1 %vm1602_vm0, %v9542_v39  ;;  %v1796_v42 = vsel %vm1602_vm0, %v9542_v39, 0 }
 0x367   : > { %7132 = vmatpush3.bf16.xpose.msra.mxu1 %v1796_v42 }
 0x368   : > { %7145 = vmatprep.subr.bf16.mxu1 %v9492_v32 }
 0x36e   : > { %7134 = vmatmul.mubr.msk.bf16.vlgmr.msra.gmra.mrb[24].mxu1 %vm1602_vm0, %v9537_v1 }
 0x36f   : > { %7146 = vmatpush3.bf16.msra.mxu1 %v9492_v32 }
 0x370   : > { %7147 = vmatprep.subr.bf16.mxu1 %v9488_v24 }
 0x373   : > { %7148 = vmatpush3.bf16.msra.mxu1 %v9488_v24 }
 0x374   : > { %7161 = vmatprep.subr.bf16.mxu1 %v9544_v23 }
 0x411   : > { %v9558_v6 = vpop.f32.mrb[16].mxu1 }
 0x412   : > { %v1649_v45 = vpop.f32.mrb[17].mxu1 }
 0x413   : > { %v9560_v54 = vpop.f32.mrb[18].mxu1  ;;  %v1847_v10 = vsel %vm1602_vm0, %v1649_v45, -inf }
 0x414   : > { %v9562_v50 = vpop.f32.mrb[19].mxu1 }
 0x415   : > { %v1850_v15 = vsel %vm1602_vm0, %v9562_v50, -inf }
 0x421   : > { %v9564_v46 = vpop.f32.mrb[20].mxu1 }
 0x422   : > { %v9566_v0 = vpop.f32.mrb[21].mxu1  ;;  %v1865_v5 = vsel %vm1602_vm0, %v9564_v46, -inf }
 0x423   : > { %v9568_v57 = vpop.f32.mrb[22].mxu1  ;;  %v1859_v58 = vsel %vm1602_vm0, %v9566_v0, -inf }
 0x424   : > { %1860 = vmax.xlane.f32.xlu0 %v1859_v58  ;;  %v9572_v7 = vpop.f32.mrb[23].mxu1  ;;  %v1868_v8 = vsel %vm1602_vm0, %v9568_v57, -inf }
 0x425   : > { %v1862_v20 = vsel %vm1602_vm0, %v9572_v7, -inf }
 0x426   : > { %1863 = vmax.xlane.f32.xlu1 %v1862_v20 }
 0x428   : > { %1866 = vmax.xlane.f32.xlu0 %v1865_v5 }
 0x42a   : > { %1869 = vmax.xlane.f32.xlu1 %v1868_v8  ;;  %v1853_v8 = vsel %vm1602_vm0, %v9558_v6, -inf }
 0x42c   : > { %1848 = vmax.xlane.f32.xlu0 %v1847_v10  ;;  %v1856_v10 = vsel %vm1602_vm0, %v9560_v54, -inf }
 0x42e   : > { %1851 = vmax.xlane.f32.xlu1 %v1850_v15 }
 0x431   : > { %v9583_v16 = vpop.f32.mrb[32].mxu0 }
 0x432   : > { %v9585_v17 = vpop.f32.mrb[33].mxu0 }
 0x433   : > { %v9587_v18 = vpop.f32.mrb[34].mxu0  ;;  %v1871_v15 = vsel %vm1602_vm0, %v9585_v17, -inf }
 0x434   : > { %v9589_v26 = vpop.f32.mrb[35].mxu0 }
 0x441   : > { %v9591_v49 = vpop.f32.mrb[24].mxu1 }
 0x442   : > { %v9593_v2 = vpop.f32.mrb[25].mxu1  ;;  %v1889_v34 = vsel %vm1602_vm0, %v9591_v49, -inf }
 0x443   : > { %1890 = vmax.xlane.f32.xlu0 %v1889_v34  ;;  %v9597_v37 = vpop.f32.mrb[26].mxu1  ;;  %v1883_v20 = vsel %vm1602_vm0, %v9593_v2, -inf  ;;  %v1874_v34 = vsel %vm1602_vm0, %v9589_v26, -inf }
 0x444   : > { %v9599_v42 = vpop.f32.mrb[27].mxu1  ;;  %v1892_v58 = vsel %vm1602_vm0, %v9597_v37, -inf }
 0x445   : > { %1893 = vmax.xlane.f32.xlu1 %v1892_v58  ;;  %v1886_v5 = vsel %vm1602_vm0, %v9599_v42, -inf  ;;  %v1877_v58 = vsel %vm1602_vm0, %v9583_v16, -inf }
 0x447   : > { %1884 = vmax.xlane.f32.xlu0 %v1883_v20  ;;  %v1880_v20 = vsel %vm1602_vm0, %v9587_v18, -inf }
 0x449   : > { %1887 = vmax.xlane.f32.xlu1 %v1886_v5 }
 0x44b   : > { %1854 = vmax.xlane.f32.xlu0 %v1853_v8 }
 0x44d   : > { %1857 = vmax.xlane.f32.xlu1 %v1856_v10 }
 0x44f   : > { %1872 = vmax.xlane.f32.xlu0 %v1871_v15 }
 0x451   : > { %1875 = vmax.xlane.f32.xlu1 %v1874_v34 }
 0x453   : > { %1878 = vmax.xlane.f32.xlu0 %v1877_v58 }
 0x455   : > { %1881 = vmax.xlane.f32.xlu1 %v1880_v20 }
 0x4b1   : > { %v1861_v5 = vpop.xlane.xlu0 %1860 }
 0x4b2   : > { %v1899_v21 = vsub.f32 %v9566_v0, %v1861_v5 }
 0x4b3   : > { %v1864_v8 = vpop.xlane.xlu1 %1863 }
 0x4b5   : > { %v1867_v35 = vpop.xlane.xlu0 %1866 }
 0x4b6   : > { %v1901_v51 = vsub.f32 %v9564_v46, %v1867_v35  ;;  %v1919_v35 = vmul.f32 1.442695, %v1899_v21 }
 0x4b7   : > { %v1870_v10 = vpop.xlane.xlu1 %1869 }
 0x4b8   : > { %v1902_v28 = vsub.f32 %v9568_v57, %v1870_v10 }
 0x4b9   : > { %v1849_v44 = vpop.xlane.xlu0 %1848 }
 0x4ba   : > { %v1895_v34 = vsub.f32 %v1649_v45, %v1849_v44 }
 0x4bb   : > { %v1852_v43 = vpop.xlane.xlu1 %1851 }
 0x4bc   : > { %v1896_v58 = vsub.f32 %v9562_v50, %v1852_v43  ;;  %v1911_v20 = vmul.f32 1.442695, %v1895_v34  ;;  %v1923_v43 = vmul.f32 1.442695, %v1901_v51  ;;  %v1925_v50 = vmul.f32 1.442695, %v1902_v28 }
 0x4be   : > { %v1913_v29 = vmul.f32 1.442695, %v1896_v58 }
 0x4d0   : > { %v1891_v31 = vpop.xlane.xlu0 %1890 }
 0x4d2   : > { %v9619_v15 = vpop.xlane.xlu1 %1893 }
 0x4d4   : > { %v9621_v30 = vpop.xlane.xlu0 %1884 }
 0x4d6   : > { %v9623_v13 = vpop.xlane.xlu1 %1887 }
 0x4d8   : > { %v1855_v12 = vpop.xlane.xlu0 %1854 }
 0x4d9   : > { %v1897_v63 = vsub.f32 %v9558_v6, %v1855_v12  ;;  %v1900_v6 = vsub.f32 %v9572_v7, %v1864_v8 }
 0x4da   : > { %v1858_v62 = vpop.xlane.xlu1 %1857 }
 0x4db   : > { %v1915_v48 = vmul.f32 1.442695, %v1897_v63  ;;  %v1898_v38 = vsub.f32 %v9560_v54, %v1858_v62  ;;  %v1921_v54 = vmul.f32 1.442695, %v1900_v6 }
 0x4dc   : > { %v1873_v36 = vpop.xlane.xlu0 %1872 }
 0x4dd   : > { %7727 = vpow2.f32 %v1915_v48  ;;  %v1917_v44 = vmul.f32 1.442695, %v1898_v38  ;;  %v1903_v51 = vsub.f32 %v9585_v17, %v1873_v36  ;;  %v1909_v36 = vsub.f32 %v9591_v49, %v1891_v31 }
 0x4de   : > { %7729 = vpow2.f32 %v1911_v20  ;;  %v1876_v45 = vpop.xlane.xlu1 %1875  ;;  %v1907_v49 = vsub.f32 %v9593_v2, %v9621_v30 }
 0x4df   : > { %7731 = vpow2.f32 %v1917_v44  ;;  %v1904_v21 = vsub.f32 %v9589_v26, %v1876_v45  ;;  %v1927_v17 = vmul.f32 1.442695, %v1903_v51  ;;  %v1910_v26 = vsub.f32 %v9597_v37, %v9619_v15 }
 0x4e0   : > { %v1879_v12 = vpop.xlane.xlu0 %1878  ;;  %7733 = vpow2.f32 %v1913_v29  ;;  %v1939_v31 = vmul.f32 1.442695, %v1909_v36  ;;  %v1908_v15 = vsub.f32 %v9599_v42, %v9623_v13  ;;  %v1935_v30 = vmul.f32 1.442695, %v1907_v49 }
 0x4e1   : > { %7735 = vpow2.f32 %v1923_v43  ;;  %v1905_v62 = vsub.f32 %v9583_v16, %v1879_v12  ;;  %v1929_v8 = vmul.f32 1.442695, %v1904_v21  ;;  %v1941_v37 = vmul.f32 1.442695, %v1910_v26 }
 0x4e2   : > { %v1882_v63 = vpop.xlane.xlu1 %1881  ;;  %7737 = vpow2.f32 %v1925_v50  ;;  %v1937_v12 = vmul.f32 1.442695, %v1908_v15 }
 0x4e3   : > { %v1906_v38 = vsub.f32 %v9587_v18, %v1882_v63  ;;  %7739 = vpow2.f32 %v1919_v35  ;;  %v1931_v46 = vmul.f32 1.442695, %v1905_v62 }
 0x4e4   : > { %7741 = vpow2.f32 %v1921_v54 }
 0x4e5   : > { %v1933_v57 = vmul.f32 1.442695, %v1906_v38  ;;  %7743 = vpow2.f32 %v1931_v46 }
 0x4e7   : > { %v9634_v48 = vpop.eup %7727  ;;  %7745 = vpow2.f32 %v1933_v57 }
 0x4e8   : > { %v9637_v0 = vpop.eup %7729  ;;  %v1949_v28 = vsel %vm1602_vm0, %v9634_v48, 0.0  ;;  %7747 = vpow2.f32 %v1927_v17 }
 0x4e9   : > { %v9641_v29 = vpop.eup %7731  ;;  %1950 = vadd.xlane.f32.xlu0 %v1949_v28  ;;  %v1943_v18 = vsel %vm1602_vm0, %v9637_v0, 0.0  ;;  %7749 = vpow2.f32 %v1929_v8 }
 0x4ea   : > { %v1952_v7 = vsel %vm1602_vm0, %v9641_v29, 0.0  ;;  %v9646_v16 = vpop.eup %7733  ;;  %7751 = vpow2.f32 %v1939_v31 }
 0x4eb   : > { %1953 = vadd.xlane.f32.xlu1 %v1952_v7  ;;  %v9651_v5 = vpop.eup %7735  ;;  %v1946_v10 = vsel %vm1602_vm0, %v9646_v16, 0.0  ;;  %7753 = vpow2.f32 %v1941_v37 }
 0x4ec   : > { %v9657_v34 = vpop.eup %7737  ;;  %v1961_v58 = vsel %vm1602_vm0, %v9651_v5, 0.0  ;;  %7755 = vpow2.f32 %v1935_v30 }
 0x4ed   : > { %1944 = vadd.xlane.f32.xlu0 %v1943_v18  ;;  %v9663_v20 = vpop.eup %7739  ;;  %v1964_v44 = vsel %vm1602_vm0, %v9657_v34, 0.0  ;;  %7757 = vpow2.f32 %v1937_v12 }
 0x4ee   : > { %v9669_v45 = vpop.eup %7741  ;;  %v1955_v2 = vsel %vm1602_vm0, %v9663_v20, 0.0 }
 0x4ef   : > { %1947 = vadd.xlane.f32.xlu1 %v1946_v10  ;;  %v9673_v43 = vpop.eup %7743  ;;  %v1958_v13 = vsel %vm1602_vm0, %v9669_v45, 0.0 }
 0x4f0   : > { %v1973_v6 = vsel %vm1602_vm0, %v9673_v43, 0.0 }
 0x4f1   : > { %1962 = vadd.xlane.f32.xlu0 %v1961_v58  ;;  %v9677_v42 = vpop.eup %7745 }
 0x4f2   : > { %v9681_v50 = vpop.eup %7747  ;;  %v1976_v63 = vsel %vm1602_vm0, %v9677_v42, 0.0 }
 0x4f3   : > { %1965 = vadd.xlane.f32.xlu1 %v1964_v44  ;;  %v9685_v35 = vpop.eup %7749  ;;  %v1967_v62 = vsel %vm1602_vm0, %v9681_v50, 0.0 }
 0x4f4   : > { %v9689_v54 = vpop.eup %7751  ;;  %v1970_v38 = vsel %vm1602_vm0, %v9685_v35, 0.0 }
 0x4f5   : > { %1956 = vadd.xlane.f32.xlu0 %v1955_v2  ;;  %v9693_v51 = vpop.eup %7753  ;;  %v1985_v46 = vsel %vm1602_vm0, %v9689_v54, 0.0 }
 0x4f6   : > { %v9697_v28 = vpop.eup %7755  ;;  %v1988_v21 = vsel %vm1602_vm0, %v9693_v51, 0.0 }
 0x4f7   : > { %1959 = vadd.xlane.f32.xlu1 %v1958_v13  ;;  %v9701_v57 = vpop.eup %7757  ;;  %v1979_v7 = vsel %vm1602_vm0, %v9697_v28, 0.0 }
 0x4f8   : > { %v1982_v36 = vsel %vm1602_vm0, %v9701_v57, 0.0 }
 0x4f9   : > { %1974 = vadd.xlane.f32.xlu0 %v1973_v6 }
 0x4fb   : > { %1977 = vadd.xlane.f32.xlu1 %v1976_v63 }
 0x4fd   : > { %1968 = vadd.xlane.f32.xlu0 %v1967_v62 }
 0x4ff   : > { %1971 = vadd.xlane.f32.xlu1 %v1970_v38 }
 0x501   : > { %1986 = vadd.xlane.f32.xlu0 %v1985_v46 }
 0x503   : > { %1989 = vadd.xlane.f32.xlu1 %v1988_v21 }
 0x505   : > { %1980 = vadd.xlane.f32.xlu0 %v1979_v7 }
 0x507   : > { %1983 = vadd.xlane.f32.xlu1 %v1982_v36 }
 0x518   : > { %2269 = vrot.lane.b32.xlu1 %v9466_v3, %s8641_s27 }
 0x51b   : > { %2267 = vrot.lane.b32.xlu0 %v9454_v52, %s8641_s27 }
 0x51c   : > { %2261 = vrot.lane.b32.xlu1 %v9452_v47, %s8641_s27 }
 0x51f   : > { %2413 = vrot.lane.b32.xlu0 %v9500_v41, %s8641_s27 }
 0x520   : > { %2340 = vrot.lane.b32.xlu1 %v9476_v11, %s8641_s27 }
 0x523   : > { %2342 = vrot.lane.b32.xlu0 %v9490_v25, %s8641_s27 }
 0x524   : > { %2263 = vrot.lane.b32.xlu1 %v9462_v60, %s8641_s27 }
 0x527   : > { %2407 = vrot.lane.b32.xlu0 %v9498_v40, %s8641_s27 }
 0x528   : > { %2415 = vrot.lane.b32.xlu1 %v9514_v59, %s8641_s27 }
 0x52b   : > { %2409 = vrot.lane.b32.xlu0 %v9510_v53, %s8641_s27 }
 0x52c   : > { %2334 = vrot.lane.b32.xlu1 %v9474_v9, %s8641_s27 }
 0x52f   : > { %2336 = vrot.lane.b32.xlu0 %v9486_v22, %s8641_s27 }
 0x530   : > { %2486 = vrot.lane.b32.xlu1 %v9525_v14, %s8641_s27 }
 0x533   : > { %2480 = vrot.lane.b32.xlu0 %v9523_v27, %s8641_s27 }
 0x534   : > { %2488 = vrot.lane.b32.xlu1 %v9542_v39, %s8641_s27 }
 0x537   : > { %2737 = vrot.lane.b32.xlu0 %v9468_v4, %s8641_s27 }
 0x538   : > { %2482 = vrot.lane.b32.xlu1 %v9537_v1, %s8641_s27 }
 0x53b   : > { %2863 = vrot.lane.b32.xlu0 %v9516_v56, %s8641_s27 }
 0x53c   : > { %2739 = vrot.lane.b32.xlu1 %v9464_v61, %s8641_s27 }
 0x53f   : > { %2800 = vrot.lane.b32.xlu0 %v9492_v32, %s8641_s27 }
 0x540   : > { %2865 = vrot.lane.b32.xlu1 %v9512_v55, %s8641_s27 }
 0x543   : > { %2999 = vrot.lane.b32.xlu0 %v9454_v52, %s8642_s19 }
 0x544   : > { %2802 = vrot.lane.b32.xlu1 %v9488_v24, %s8641_s27 }
 0x548   : > { %2926 = vrot.lane.b32.xlu1 %v9544_v23, %s8641_s27 }
 0x576   : > { %v1951_v17 = vpop.xlane.xlu0 %1950 }
 0x578   : > { %v1954_v18 = vpop.xlane.xlu1 %1953 }
 0x579   : > { %7759 = vrcp.f32 %v1954_v18 }
 0x57a   : > { %v1945_v26 = vpop.xlane.xlu0 %1944 }
 0x57b   : > { %7761 = vrcp.f32 %v1945_v26 }
 0x57c   : > { %7763 = vrcp.f32 %v1951_v17  ;;  %v1948_v8 = vpop.xlane.xlu1 %1947 }
 0x57d   : > { %7765 = vrcp.f32 %v1948_v8 }
 0x57e   : > { %v1963_v10 = vpop.xlane.xlu0 %1962 }
 0x580   : > { %v1966_v31 = vpop.xlane.xlu1 %1965 }
 0x581   : > { %7767 = vrcp.f32 %v1966_v31 }
 0x582   : > { %v1957_v49 = vpop.xlane.xlu0 %1956 }
 0x583   : > { %7769 = vrcp.f32 %v1957_v49  ;;  %v7760_v58 = vpop.eup %7759 }
 0x584   : > { %7771 = vrcp.f32 %v1963_v10  ;;  %v1960_v37 = vpop.xlane.xlu1 %1959  ;;  %v2010_v12 = vmul.f32 %v7760_v58, %v9641_v29 }
 0x585   : > { %v7762_v15 = vpop.eup %7761  ;;  %7773 = vrcp.f32 %v1960_v37 }
 0x586   : > { %v7764_v44 = vpop.eup %7763  ;;  %v1975_v30 = vpop.xlane.xlu0 %1974  ;;  %v2007_v6 = vmul.f32 %v7762_v15, %v9637_v0 }
 0x587   : > { %v7766_v2 = vpop.eup %7765  ;;  %v2009_v62 = vmul.f32 %v7764_v44, %v9634_v48 }
 0x588   : > { %v1978_v13 = vpop.xlane.xlu1 %1977  ;;  %v2008_v63 = vmul.f32 %v7766_v2, %v9646_v16 }
 0x589   : > { %7775 = vrcp.f32 %v1978_v13  ;;  %v2024_v21 = vpack.c.bf16 %v2010_v12, %v2009_v62 }
 0x58a   : > { %v1969_v38 = vpop.xlane.xlu0 %1968  ;;  %v2023_v46 = vpack.c.bf16 %v2008_v63, %v2007_v6 }
 0x58b   : > { %7777 = vrcp.f32 %v1969_v38  ;;  %v7768_v7 = vpop.eup %7767 }
 0x58c   : > { %7779 = vrcp.f32 %v1975_v30  ;;  %7141 = vmatprep.mubr.msk.bf16.mxu0 %vm1602_vm0, %v2023_v46  ;;  %v1972_v36 = vpop.xlane.xlu1 %1971  ;;  %v2014_v48 = vmul.f32 %v7768_v7, %v9657_v34 }
 0x58d   : > { %v7770_v17 = vpop.eup %7769  ;;  %7781 = vrcp.f32 %v1972_v36  ;;  %7142 = vmatmul.mubr.msk.bf16.vlgmr.msra.gmra.mrb[36].mxu0 %vm1602_vm0, %v2024_v21 }
 0x58e   : > { %v7772_v29 = vpop.eup %7771  ;;  %7154 = vmatpush3.bf16.msra.mxu0 %v9516_v56  ;;  %v1987_v0 = vpop.xlane.xlu0 %1986  ;;  %v2011_v26 = vmul.f32 %v7770_v17, %v9663_v20 }
 0x58f   : > { %v7774_v16 = vpop.eup %7773  ;;  %7155 = vmatprep.subr.bf16.mxu0 %v9512_v55  ;;  %v2013_v10 = vmul.f32 %v7772_v29, %v9651_v5 }
 0x590   : > { %v1990_v18 = vpop.xlane.xlu1 %1989  ;;  %v2012_v8 = vmul.f32 %v7774_v16, %v9669_v45 }
 0x591   : > { %7783 = vrcp.f32 %v1990_v18  ;;  %v2026_v58 = vpack.c.bf16 %v2014_v48, %v2013_v10 }
 0x592   : > { %7156 = vmatpush3.bf16.msra.mxu0 %v9512_v55  ;;  %v1981_v31 = vpop.xlane.xlu0 %1980  ;;  %v2025_v49 = vpack.c.bf16 %v2012_v8, %v2011_v26 }
 0x593   : > { %7785 = vrcp.f32 %v1981_v31  ;;  %v7776_v37 = vpop.eup %7775 }
 0x594   : > { %7787 = vrcp.f32 %v1987_v0  ;;  %7149 = vmatprep.mubr.msk.bf16.mxu1 %vm1602_vm0, %v2025_v49  ;;  %v1984_v34 = vpop.xlane.xlu1 %1983  ;;  %v2018_v44 = vmul.f32 %v7776_v37, %v9677_v42 }
 0x595   : > { %v7778_v15 = vpop.eup %7777  ;;  %7789 = vrcp.f32 %v1984_v34  ;;  %7150 = vmatmul.mubr.msk.bf16.vlgmr.msra.gmra.mrb[28].mxu1 %vm1602_vm0, %v2026_v58 }
 0x596   : > { %v7780_v20 = vpop.eup %7779  ;;  %7162 = vmatpush3.bf16.msra.mxu1 %v9544_v23  ;;  %v2268_v5 = vpop.permute.xlu0 %2267  ;;  %v2015_v2 = vmul.f32 %v7778_v15, %v9681_v50 }
 0x597   : > { %v7782_v45 = vpop.eup %7781  ;;  %7163 = vmatprep.subr.bf16.mxu1 %v9539_v33  ;;  %v2017_v13 = vmul.f32 %v7780_v20, %v9673_v43  ;;  %v2278_v8 = vsel %vm1602_vm0, %v2268_v5, 0 }
 0x598   : > { %v2270_v30 = vpop.permute.xlu1 %2269  ;;  %v2016_v12 = vmul.f32 %v7782_v45, %v9685_v35 }
 0x599   : > { %v2028_v62 = vpack.c.bf16 %v2018_v44, %v2017_v13  ;;  %v2281_v31 = vsel %vm1602_vm0, %v2270_v30, 0 }
 0x59a   : > { %7164 = vmatpush3.bf16.msra.mxu1 %v9539_v33  ;;  %v2414_v6 = vpop.permute.xlu0 %2413  ;;  %v2027_v63 = vpack.c.bf16 %v2016_v12, %v2015_v2 }
 0x59b   : > { %7401 = vmatprep.subr.msk.bf16.mxu1 %vm1602_vm0, %v2268_v5  ;;  %7405 = vmatprep.subr.msk.bf16.mxu0 %vm1602_vm0, %v2414_v6  ;;  %v2424_v42 = vsel %vm1602_vm0, %v2414_v6, 0  ;;  %v7784_v38 = vpop.eup %7783 }
 0x59c   : > { %7157 = vmatprep.mubr.msk.bf16.mxu0 %vm1602_vm0, %v2027_v63  ;;  %v2262_v46 = vpop.permute.xlu1 %2261  ;;  %v2022_v7 = vmul.f32 %v7784_v38, %v9693_v51 }
 0x59d   : > { %v7786_v50 = vpop.eup %7785  ;;  %7158 = vmatmul.mubr.msk.bf16.vlgmr.msra.gmra.mrb[40].mxu0 %vm1602_vm0, %v2028_v62 }
 0x59e   : > { %v7788_v35 = vpop.eup %7787  ;;  %7186 = vmatpush3.bf16.xpose.msra.mxu0 %v2424_v42  ;;  %v2343_v43 = vpop.permute.xlu0 %2342  ;;  %v2019_v17 = vmul.f32 %v7786_v50, %v9697_v28 }
 0x59f   : > { %v7790_v21 = vpop.eup %7789  ;;  %v2021_v0 = vmul.f32 %v7788_v35, %v9689_v54  ;;  %v2354_v45 = vsel %vm1602_vm0, %v2343_v43, 0 }
 0x5a0   : > { %v2341_v36 = vpop.permute.xlu1 %2340  ;;  %v2020_v29 = vmul.f32 %v7790_v21, %v9701_v57 }
 0x5a1   : > { %v2030_v18 = vpack.c.bf16 %v2022_v7, %v2021_v0  ;;  %v2351_v15 = vsel %vm1602_vm0, %v2341_v36, 0 }
 0x5a2   : > { %v2408_v16 = vpop.permute.xlu0 %2407  ;;  %v2029_v48 = vpack.c.bf16 %v2020_v29, %v2019_v17 }
 0x5a3   : > { %7189 = vmatprep.mubr.msk.bf16.mxu0 %vm1602_vm0, %v2408_v16 }
 0x5a4   : > { %7165 = vmatprep.mubr.msk.bf16.mxu1 %vm1602_vm0, %v2029_v48  ;;  %v2264_v26 = vpop.permute.xlu1 %2263 }
 0x5a5   : > { %7166 = vmatmul.mubr.msk.bf16.vlgmr.msra.gmra.mrb[32].mxu1 %vm1602_vm0, %v2030_v18 }
 0x5a6   : > { %7170 = vmatpush3.bf16.xpose.msra.mxu1 %v2278_v8  ;;  %v2410_v51 = vpop.permute.xlu0 %2409  ;;  %7173 = vmatprep.mubr.msk.bf16.mxu1 %vm1602_vm0, %v2262_v46 }
 0x5a7   : > { %7402 = vmatprep.subr.msk.bf16.mxu1 %vm1602_vm0, %v2270_v30 }
 0x5a8   : > { %v2416_v28 = vpop.permute.xlu1 %2415 }
 0x5a9   : > { %7406 = vmatprep.subr.msk.bf16.mxu0 %vm1602_vm0, %v2416_v28  ;;  %v2427_v54 = vsel %vm1602_vm0, %v2416_v28, 0 }
 0x5aa   : > { %v2337_v57 = vpop.permute.xlu0 %2336  ;;  %7188 = vmatpush3.bf16.xpose.msra.mxu0 %v2427_v54 }
 0x5ac   : > { %v2335_v10 = vpop.permute.xlu1 %2334 }
 0x5ae   : > { %7172 = vmatpush3.bf16.xpose.msra.mxu1 %v2281_v31  ;;  %v2481_v49 = vpop.permute.xlu0 %2480 }
 0x5af   : > { %7403 = vmatprep.subr.msk.bf16.mxu1 %vm1602_vm0, %v2341_v36 }
 0x5b0   : > { %v2487_v58 = vpop.permute.xlu1 %2486 }
 0x5b1   : > { %7190 = vmatmul.mubr.msk.bf16.vlgmr.msra.gmra.mrb[44].mxu0 %vm1602_vm0, %v2410_v51  ;;  %v2497_v30 = vsel %vm1602_vm0, %v2487_v58, 0 }
 0x5b2   : > { %v2738_v37 = vpop.permute.xlu0 %2737 }
 0x5b3   : > { %7201 = vmatprep.subr.bf16.mxu0 %v2738_v37 }
 0x5b4   : > { %7202 = vmatpush3.bf16.msra.mxu0 %v2738_v37  ;;  %v2489_v34 = vpop.permute.xlu1 %2488 }
 0x5b5   : > { %7174 = vmatmul.mubr.msk.bf16.vlgmr.msra.gmra.mrb[36].mxu1 %vm1602_vm0, %v2264_v26  ;;  %v2500_v2 = vsel %vm1602_vm0, %v2489_v34, 0 }
 0x5b6   : > { %7178 = vmatpush3.bf16.xpose.msra.mxu1 %v2351_v15  ;;  %7181 = vmatprep.mubr.msk.bf16.mxu1 %vm1602_vm0, %v2335_v10  ;;  %v9802_v44 = vpop.permute.xlu0 %2863 }
 0x5b7   : > { %7404 = vmatprep.subr.msk.bf16.mxu1 %vm1602_vm0, %v2343_v43 }
 0x5b8   : > { %v2483_v20 = vpop.permute.xlu1 %2482 }
 0x5ba   : > { %v2801_v12 = vpop.permute.xlu0 %2800 }
 0x5bc   : > { %v2740_v5 = vpop.permute.xlu1 %2739 }
 0x5bd   : > { %7203 = vmatprep.subr.bf16.mxu0 %v2740_v5 }
 0x5be   : > { %7180 = vmatpush3.bf16.xpose.msra.mxu1 %v2354_v45  ;;  %7204 = vmatpush3.bf16.msra.mxu0 %v2740_v5 }
 0x5bf   : > { %7407 = vmatprep.subr.msk.bf16.mxu1 %vm1602_vm0, %v2487_v58  ;;  %7217 = vmatprep.subr.bf16.mxu0 %v9802_v44 }
 0x5c0   : > { %v9811_v13 = vpop.permute.xlu1 %2865 }
 0x5c4   : > { %v2803_v6 = vpop.permute.xlu1 %2802 }
 0x5c5   : > { %7182 = vmatmul.mubr.msk.bf16.vlgmr.msra.gmra.mrb[40].mxu1 %vm1602_vm0, %v2337_v57 }
 0x5c6   : > { %7194 = vmatpush3.bf16.xpose.msra.mxu1 %v2497_v30  ;;  %7197 = vmatprep.mubr.msk.bf16.mxu1 %vm1602_vm0, %v2481_v49 }
 0x5c7   : > { %7408 = vmatprep.subr.msk.bf16.mxu1 %vm1602_vm0, %v2489_v34 }
 0x5c8   : > { %v9814_v63 = vpop.permute.xlu1 %2926 }
 0x5ce   : > { %7196 = vmatpush3.bf16.xpose.msra.mxu1 %v2500_v2 }
 0x5cf   : > { %7209 = vmatprep.subr.bf16.mxu1 %v2801_v12 }
 0x5d5   : > { %7198 = vmatmul.mubr.msk.bf16.vlgmr.msra.gmra.mrb[44].mxu1 %vm1602_vm0, %v2483_v20 }
 0x5d6   : > { %7210 = vmatpush3.bf16.msra.mxu1 %v2801_v12 }
 0x5d7   : > { %7211 = vmatprep.subr.bf16.mxu1 %v2803_v6 }
 0x5da   : > { %7212 = vmatpush3.bf16.msra.mxu1 %v2803_v6 }
 0x5db   : > { %7225 = vmatprep.subr.bf16.mxu1 %v9814_v63 }
 0x660   : > { %v9817_v62 = vpop.f32.mrb[36].mxu0 }
 0x661   : > { %11532 = vst [vmem:[#allocation48_spill] sm:$0xff] %v9817_v62  ;;  %v9819_v42 = vpop.f32.mrb[37].mxu0 }
 0x662   : > { %11533 = vst [vmem:[#allocation49_spill] sm:$0xff] %v9819_v42  ;;  %v9821_v38 = vpop.f32.mrb[38].mxu0 }
 0x663   : > { %11534 = vst [vmem:[#allocation50_spill] sm:$0xff] %v9821_v38  ;;  %v9825_v50 = vpop.f32.mrb[39].mxu0 }
 0x664   : > { %11535 = vst [vmem:[#allocation51_spill] sm:$0xff] %v9825_v50 }
 0x668   : > { %v9829_v43 = vpop.f32.mrb[28].mxu1 }
 0x669   : > { %11536 = vst [vmem:[#allocation52_spill] sm:$0xff] %v9829_v43  ;;  %v9831_v21 = vpop.f32.mrb[29].mxu1 }
 0x66a   : > { %11537 = vst [vmem:[#allocation53_spill] sm:$0xff] %v9831_v21  ;;  %v9833_v7 = vpop.f32.mrb[30].mxu1 }
 0x66b   : > { %11538 = vst [vmem:[#allocation54_spill] sm:$0xff] %v9833_v7  ;;  %v9837_v17 = vpop.f32.mrb[31].mxu1 }
 0x66c   : > { %11539 = vst [vmem:[#allocation55_spill] sm:$0xff] %v9837_v17 }
 0x670   : > { %v9841_v0 = vpop.f32.mrb[40].mxu0 }
 0x671   : > { %11540 = vst [vmem:[#allocation56_spill] sm:$0xff] %v9841_v0  ;;  %v9843_v16 = vpop.f32.mrb[41].mxu0 }
 0x672   : > { %11541 = vst [vmem:[#allocation57_spill] sm:$0xff] %v9843_v16  ;;  %v9845_v48 = vpop.f32.mrb[42].mxu0 }
 0x673   : > { %11542 = vst [vmem:[#allocation58_spill] sm:$0xff] %v9845_v48  ;;  %v9849_v26 = vpop.f32.mrb[43].mxu0 }
 0x674   : > { %11543 = vst [vmem:[#allocation59_spill] sm:$0xff] %v9849_v26 }
 0x678   : > { %v9853_v51 = vpop.f32.mrb[32].mxu1 }
 0x679   : > { %11544 = vst [vmem:[#allocation60_spill] sm:$0xff] %v9853_v51  ;;  %v9855_v28 = vpop.f32.mrb[33].mxu1 }
 0x67a   : > { %11545 = vst [vmem:[#allocation61_spill] sm:$0xff] %v9855_v28  ;;  %v9857_v54 = vpop.f32.mrb[34].mxu1 }
 0x67b   : > { %11546 = vst [vmem:[#allocation62_spill] sm:$0xff] %v9857_v54  ;;  %v9861_v10 = vpop.f32.mrb[35].mxu1 }
 0x67c   : > { %11547 = vst [vmem:[#allocation63_spill] sm:$0xff] %v9861_v10 }
 0x684   : > { %v7191_v49 = vpop.f32.mrb[44].mxu0 }
 0x685   : > { %v2463_v58 = vpop.f32.mrb[45].mxu0  ;;  %v2581_v37 = vsel %vm1602_vm0, %v7191_v49, -inf }
 0x686   : > { %2582 = vmax.xlane.f32.xlu0 %v2581_v37  ;;  %v7192_v34 = vpop.f32.mrb[46].mxu0  ;;  %v2575_v30 = vsel %vm1602_vm0, %v2463_v58, -inf }
 0x687   : > { %v2466_v15 = vpop.f32.mrb[47].mxu0  ;;  %v2584_v20 = vsel %vm1602_vm0, %v7192_v34, -inf }
 0x688   : > { %v7175_v5 = vpop.f32.mrb[36].mxu1  ;;  %2585 = vmax.xlane.f32.xlu1 %v2584_v20  ;;  %v2578_v6 = vsel %vm1602_vm0, %v2466_v15, -inf }
 0x689   : > { %v9867_v45 = vpop.f32.mrb[37].mxu1  ;;  %v2557_v37 = vsel %vm1602_vm0, %v7175_v5, -inf }
 0x68a   : > { %v9870_v2 = vpop.f32.mrb[38].mxu1  ;;  %2576 = vmax.xlane.f32.xlu0 %v2575_v30  ;;  %v2551_v20 = vsel %vm1602_vm0, %v9867_v45, -inf }
 0x68b   : > { %v9872_v12 = vpop.f32.mrb[39].mxu1  ;;  %v2560_v31 = vsel %vm1602_vm0, %v9870_v2, -inf }
 0x68c   : > { %2579 = vmax.xlane.f32.xlu1 %v2578_v6  ;;  %v2554_v57 = vsel %vm1602_vm0, %v9872_v12, -inf }
 0x68e   : > { %2558 = vmax.xlane.f32.xlu0 %v2557_v37 }
 0x690   : > { %2555 = vmax.xlane.f32.xlu1 %v2554_v57 }
 0x692   : > { %2552 = vmax.xlane.f32.xlu0 %v2551_v20 }
 0x696   : > { %2561 = vmax.xlane.f32.xlu0 %v2560_v31 }
 0x698   : > { %v9882_v30 = vpop.f32.mrb[40].mxu1 }
 0x699   : > { %v9884_v18 = vpop.f32.mrb[41].mxu1  ;;  %v2569_v6 = vsel %vm1602_vm0, %v9882_v30, -inf }
 0x69a   : > { %v9888_v37 = vpop.f32.mrb[42].mxu1  ;;  %2570 = vmax.xlane.f32.xlu0 %v2569_v6  ;;  %v2563_v20 = vsel %vm1602_vm0, %v9884_v18, -inf }
 0x69b   : > { %v9890_v8 = vpop.f32.mrb[43].mxu1  ;;  %v2572_v57 = vsel %vm1602_vm0, %v9888_v37, -inf }
 0x69c   : > { %2573 = vmax.xlane.f32.xlu1 %v2572_v57  ;;  %v2566_v31 = vsel %vm1602_vm0, %v9890_v8, -inf }
 0x69e   : > { %2564 = vmax.xlane.f32.xlu0 %v2563_v20 }
 0x6a0   : > { %2567 = vmax.xlane.f32.xlu1 %v2566_v31 }
 0x6a8   : > { %v9898_v36 = vpop.f32.mrb[44].mxu1 }
 0x6a9   : > { %v9900_v29 = vpop.f32.mrb[45].mxu1  ;;  %v2593_v6 = vsel %vm1602_vm0, %v9898_v36, -inf }
 0x6aa   : > { %2594 = vmax.xlane.f32.xlu0 %v2593_v6  ;;  %v9904_v46 = vpop.f32.mrb[46].mxu1  ;;  %v2587_v57 = vsel %vm1602_vm0, %v9900_v29, -inf  ;;  %v9918_v6 = vpop.permute.xlu0 %2999 }
 0x6ab   : > { %v9906_v35 = vpop.f32.mrb[47].mxu1  ;;  %v2596_v20 = vsel %vm1602_vm0, %v9904_v46, -inf }
 0x6ac   : > { %v2590_v31 = vsel %vm1602_vm0, %v9906_v35, -inf }
 0x6ae   : > { %2588 = vmax.xlane.f32.xlu0 %v2587_v57 }
 0x6b1   : > { %3001 = vrot.lane.b32.xlu1 %v9466_v3, %s8642_s19 }
 0x6c4   : > { %2928 = vrot.lane.b32.xlu0 %v9539_v33, %s8641_s27 }
 0x6d5   : > { %2597 = vmax.xlane.f32.xlu1 %v2596_v20 }
 0x6d9   : > { %2591 = vmax.xlane.f32.xlu1 %v2590_v31 }
 0x713   : > { %v2583_v19 = vpop.xlane.xlu0 %2582 }
 0x714   : > { %v2609_v51 = vsub.f32 %v7191_v49, %v2583_v19 }
 0x715   : > { %v2586_v54 = vpop.xlane.xlu1 %2585 }
 0x716   : > { %v2635_v57 = vmul.f32 1.442695, %v2609_v51  ;;  %v2610_v28 = vsub.f32 %v7192_v34, %v2586_v54 }
 0x717   : > { %v2577_v10 = vpop.xlane.xlu0 %2576 }
 0x718   : > { %7791 = vpow2.f32 %v2635_v57  ;;  %v2637_v0 = vmul.f32 1.442695, %v2610_v28  ;;  %v2607_v48 = vsub.f32 %v2463_v58, %v2577_v10 }
 0x719   : > { %v2580_v16 = vpop.xlane.xlu1 %2579 }
 0x71a   : > { %7793 = vpow2.f32 %v2637_v0  ;;  %v2631_v26 = vmul.f32 1.442695, %v2607_v48  ;;  %v2608_v43 = vsub.f32 %v2466_v15, %v2580_v16 }
 0x71b   : > { %v2559_v20 = vpop.xlane.xlu0 %2558 }
 0x71c   : > { %7795 = vpow2.f32 %v2631_v26  ;;  %v2633_v7 = vmul.f32 1.442695, %v2608_v43  ;;  %v2601_v21 = vsub.f32 %v7175_v5, %v2559_v20 }
 0x71d   : > { %v2556_v17 = vpop.xlane.xlu1 %2555 }
 0x71e   : > { %7797 = vpow2.f32 %v2633_v7  ;;  %v2619_v31 = vmul.f32 1.442695, %v2601_v21  ;;  %v2600_v28 = vsub.f32 %v9872_v12, %v2556_v17 }
 0x71f   : > { %v2553_v62 = vpop.xlane.xlu0 %2552 }
 0x720   : > { %7799 = vpow2.f32 %v2619_v31  ;;  %v2599_v19 = vsub.f32 %v9867_v45, %v2553_v62  ;;  %v2617_v62 = vmul.f32 1.442695, %v2600_v28 }
 0x722   : > { %v9921_v51 = vpop.eup %7791  ;;  %v2615_v54 = vmul.f32 1.442695, %v2599_v19 }
 0x723   : > { %v2562_v10 = vpop.xlane.xlu0 %2561  ;;  %v2677_v0 = vsel %vm1602_vm0, %v9921_v51, 0.0 }
 0x724   : > { %v9926_v16 = vpop.eup %7793  ;;  %7801 = vpow2.f32 %v2615_v54  ;;  %v2602_v43 = vsub.f32 %v9870_v2, %v2562_v10  ;;  %2678 = vadd.xlane.f32.xlu0 %v2677_v0 }
 0x725   : > { %v2680_v21 = vsel %vm1602_vm0, %v9926_v16, 0.0 }
 0x726   : > { %v9931_v7 = vpop.eup %7795  ;;  %v2621_v48 = vmul.f32 1.442695, %v2602_v43  ;;  %2681 = vadd.xlane.f32.xlu1 %v2680_v21 }
 0x727   : > { %v2571_v17 = vpop.xlane.xlu0 %2570  ;;  %v2671_v26 = vsel %vm1602_vm0, %v9931_v7, 0.0 }
 0x728   : > { %v9935_v49 = vpop.eup %7797  ;;  %7803 = vpow2.f32 %v2621_v48  ;;  %v2605_v58 = vsub.f32 %v9882_v30, %v2571_v17  ;;  %2672 = vadd.xlane.f32.xlu0 %v2671_v26 }
 0x729   : > { %v2674_v34 = vsel %vm1602_vm0, %v9935_v49, 0.0  ;;  %7805 = vpow2.f32 %v2617_v62  ;;  %v2574_v21 = vpop.xlane.xlu1 %2573 }
 0x72a   : > { %v9940_v15 = vpop.eup %7799  ;;  %v2627_v5 = vmul.f32 1.442695, %v2605_v58  ;;  %2675 = vadd.xlane.f32.xlu1 %v2674_v34  ;;  %v2606_v62 = vsub.f32 %v9888_v37, %v2574_v21 }
 0x72b   : > { %v2565_v45 = vpop.xlane.xlu0 %2564  ;;  %v2653_v2 = vsel %vm1602_vm0, %v9940_v15, 0.0 }
 0x72c   : > { %7807 = vpow2.f32 %v2627_v5  ;;  %v2603_v12 = vsub.f32 %v9884_v18, %v2565_v45  ;;  %2654 = vadd.xlane.f32.xlu0 %v2653_v2  ;;  %v2629_v26 = vmul.f32 1.442695, %v2606_v62 }
 0x72d   : > { %v2568_v48 = vpop.xlane.xlu1 %2567 }
 0x72e   : > { %v9945_v57 = vpop.eup %7801  ;;  %v2623_v30 = vmul.f32 1.442695, %v2603_v12  ;;  %v2604_v58 = vsub.f32 %v9890_v8, %v2568_v48 }
 0x72f   : > { %v2647_v20 = vsel %vm1602_vm0, %v9945_v57, 0.0 }
 0x730   : > { %7809 = vpow2.f32 %v2623_v30  ;;  %2648 = vadd.xlane.f32.xlu0 %v2647_v20  ;;  %v2625_v5 = vmul.f32 1.442695, %v2604_v58 }
 0x731   : > { %v9971_v34 = vpop.permute.xlu1 %3001  ;;  %7811 = vpow2.f32 %v2629_v26 }
 0x732   : > { %v9949_v31 = vpop.eup %7803  ;;  %7813 = vpow2.f32 %v2625_v5 }
 0x733   : > { %v2656_v19 = vsel %vm1602_vm0, %v9949_v31, 0.0  ;;  %v9953_v28 = vpop.eup %7805 }
 0x734   : > { %2657 = vadd.xlane.f32.xlu1 %v2656_v19  ;;  %v2650_v10 = vsel %vm1602_vm0, %v9953_v28, 0.0 }
 0x736   : > { %v9955_v54 = vpop.eup %7807 }
 0x737   : > { %v2665_v18 = vsel %vm1602_vm0, %v9955_v54, 0.0  ;;  %v2595_v17 = vpop.xlane.xlu0 %2594 }
 0x738   : > { %2666 = vadd.xlane.f32.xlu0 %v2665_v18  ;;  %2651 = vadd.xlane.f32.xlu1 %v2650_v10  ;;  %v2613_v45 = vsub.f32 %v9898_v36, %v2595_v17 }
 0x73a   : > { %v9961_v0 = vpop.eup %7809  ;;  %v2643_v20 = vmul.f32 1.442695, %v2613_v45 }
 0x73b   : > { %v2659_v43 = vsel %vm1602_vm0, %v9961_v0, 0.0  ;;  %v2589_v2 = vpop.xlane.xlu0 %2588  ;;  %v9977_v8 = vpop.eup %7811 }
 0x73c   : > { %2660 = vadd.xlane.f32.xlu0 %v2659_v43  ;;  %v2611_v12 = vsub.f32 %v9900_v29, %v2589_v2  ;;  %7815 = vpow2.f32 %v2643_v20  ;;  %v2668_v36 = vsel %vm1602_vm0, %v9977_v8, 0.0  ;;  %v9981_v29 = vpop.eup %7813 }
 0x73d   : > { %v2662_v62 = vsel %vm1602_vm0, %v9981_v29, 0.0 }
 0x73e   : > { %v2639_v19 = vmul.f32 1.442695, %v2611_v12 }
 0x73f   : > { %v10033_v2 = vpop.permute.xlu0 %2928 }
 0x740   : > { %7817 = vpow2.f32 %v2639_v19 }
 0x746   : > { %v9985_v48 = vpop.eup %7815 }
 0x749   : > { %3068 = vrot.lane.b32.xlu1 %v9476_v11, %s8642_s19 }
 0x752   : > { %2995 = vrot.lane.b32.xlu0 %v9452_v47, %s8642_s19 }
 0x762   : > { %v2598_v30 = vpop.xlane.xlu1 %2597 }
 0x763   : > { %v2614_v37 = vsub.f32 %v9904_v46, %v2598_v30  ;;  %v9987_v46 = vpop.eup %7817 }
 0x764   : > { %v2683_v58 = vsel %vm1602_vm0, %v9987_v46, 0.0 }
 0x765   : > { %v2645_v21 = vmul.f32 1.442695, %v2614_v37 }
 0x766   : > { %v2592_v18 = vpop.xlane.xlu1 %2591 }
 0x767   : > { %v2612_v10 = vsub.f32 %v9906_v35, %v2592_v18  ;;  %v2689_v35 = vsel %vm1602_vm0, %v9985_v48, 0.0 }
 0x769   : > { %v2641_v43 = vmul.f32 1.442695, %v2612_v10 }
 0x76b   : > { %7819 = vpow2.f32 %v2641_v43 }
 0x76c   : > { %7821 = vpow2.f32 %v2645_v21 }
 0x76d   : > { %2669 = vadd.xlane.f32.xlu1 %v2668_v36 }
 0x771   : > { %2663 = vadd.xlane.f32.xlu1 %v2662_v62 }
 0x775   : > { %v9991_v17 = vpop.eup %7819  ;;  %2690 = vadd.xlane.f32.xlu1 %v2689_v35 }
 0x776   : > { %v2686_v26 = vsel %vm1602_vm0, %v9991_v17, 0.0  ;;  %v9997_v5 = vpop.eup %7821 }
 0x777   : > { %2687 = vadd.xlane.f32.xlu0 %v2686_v26  ;;  %v2692_v45 = vsel %vm1602_vm0, %v9997_v5, 0.0 }
 0x779   : > { %2684 = vadd.xlane.f32.xlu1 %v2683_v58 }
 0x77d   : > { %2693 = vadd.xlane.f32.xlu1 %v2692_v45 }
 0x78d   : > { %3137 = vrot.lane.b32.xlu0 %v9500_v41, %s8642_s19 }
 0x78e   : > { %2997 = vrot.lane.b32.xlu1 %v9462_v60, %s8642_s19 }
 0x791   : > { %3070 = vrot.lane.b32.xlu0 %v9490_v25, %s8642_s19 }
 0x792   : > { %3139 = vrot.lane.b32.xlu1 %v9514_v59, %s8642_s19 }
 0x795   : > { %3133 = vrot.lane.b32.xlu0 %v9498_v40, %s8642_s19 }
 0x796   : > { %3064 = vrot.lane.b32.xlu1 %v9474_v9, %s8642_s19 }
 0x799   : > { %3135 = vrot.lane.b32.xlu0 %v9510_v53, %s8642_s19 }
 0x79a   : > { %3206 = vrot.lane.b32.xlu1 %v9525_v14, %s8642_s19 }
 0x79d   : > { %3066 = vrot.lane.b32.xlu0 %v9486_v22, %s8642_s19 }
 0x79e   : > { %3208 = vrot.lane.b32.xlu1 %v9542_v39, %s8642_s19 }
 0x7a1   : > { %3202 = vrot.lane.b32.xlu0 %v9523_v27, %s8642_s19 }
 0x7a2   : > { %3204 = vrot.lane.b32.xlu1 %v9537_v1, %s8642_s19 }
 0x7a5   : > { %3455 = vrot.lane.b32.xlu0 %v9468_v4, %s8642_s19 }
 0x7a6   : > { %3457 = vrot.lane.b32.xlu1 %v9464_v61, %s8642_s19 }
 0x7a9   : > { %3577 = vrot.lane.b32.xlu0 %v9516_v56, %s8642_s19 }
 0x7aa   : > { %3579 = vrot.lane.b32.xlu1 %v9512_v55, %s8642_s19 }
 0x7ad   : > { %3516 = vrot.lane.b32.xlu0 %v9492_v32, %s8642_s19 }
 0x7ae   : > { %3518 = vrot.lane.b32.xlu1 %v9488_v24, %s8642_s19 }
 0x7b1   : > { %3711 = vrot.lane.b32.xlu0 %v9454_v52, %s8643_s22  ;;  %v2679_v12 = vpop.xlane.xlu0 %2678 }
 0x7b2   : > { %3638 = vrot.lane.b32.xlu1 %v9544_v23, %s8642_s19 }
 0x7b3   : > { %v2682_v20 = vpop.xlane.xlu1 %2681 }
 0x7b5   : > { %v2673_v30 = vpop.xlane.xlu0 %2672 }
 0x7b6   : > { %7823 = vrcp.f32 %v2673_v30 }
 0x7b7   : > { %v2676_v18 = vpop.xlane.xlu1 %2675 }
 0x7b8   : > { %7825 = vrcp.f32 %v2676_v18 }
 0x7b9   : > { %v2655_v19 = vpop.xlane.xlu0 %2654 }
 0x7bd   : > { %v2649_v10 = vpop.xlane.xlu0 %2648 }
 0x7c0   : > { %v7824_v21 = vpop.eup %7823 }
 0x7c1   : > { %v2658_v37 = vpop.xlane.xlu1 %2657 }
 0x7c2   : > { %7827 = vrcp.f32 %v2658_v37  ;;  %v7826_v52 = vpop.eup %7825 }
 0x7c3   : > { %7829 = vrcp.f32 %v2649_v10  ;;  %v2720_v18 = vmul.f32 %v7826_v52, %v9935_v49 }
 0x7c4   : > { %7831 = vrcp.f32 %v2655_v19 }
 0x7c5   : > { %v2652_v43 = vpop.xlane.xlu1 %2651  ;;  %v2667_v19 = vpop.xlane.xlu0 %2666 }
 0x7c6   : > { %7833 = vrcp.f32 %v2652_v43 }
 0x7c7   : > { %7835 = vrcp.f32 %v2682_v20  ;;  %v2719_v20 = vmul.f32 %v7824_v21, %v9931_v7 }
 0x7c8   : > { %7837 = vrcp.f32 %v2679_v12 }
 0x7c9   : > { %v2731_v12 = vpack.c.bf16 %v2720_v18, %v2719_v20 }
 0x7cc   : > { %v7828_v36 = vpop.eup %7827 }
 0x7cd   : > { %v7830_v62 = vpop.eup %7829  ;;  %v2714_v58 = vmul.f32 %v7828_v36, %v9949_v31 }
 0x7ce   : > { %v7832_v35 = vpop.eup %7831  ;;  %v2711_v45 = vmul.f32 %v7830_v62, %v9945_v57  ;;  %v2661_v57 = vpop.xlane.xlu0 %2660 }
 0x7cf   : > { %v2713_v37 = vmul.f32 %v7832_v35, %v9940_v15 }
 0x7d0   : > { %v7834_v26 = vpop.eup %7833 }
 0x7d1   : > { %v2712_v30 = vmul.f32 %v7834_v26, %v9953_v28  ;;  %v2728_v43 = vpack.c.bf16 %v2714_v58, %v2713_v37  ;;  %v7836_v38 = vpop.eup %7835 }
 0x7d2   : > { %v7838_v31 = vpop.eup %7837  ;;  %v2722_v49 = vmul.f32 %v7836_v38, %v9926_v16  ;;  %v2996_v28 = vpop.permute.xlu0 %2995  ;;  %v3013_v38 = vsel %vm1602_vm0, %v9971_v34, 0 }
 0x7d3   : > { %v2727_v10 = vpack.c.bf16 %v2712_v30, %v2711_v45  ;;  %v2721_v15 = vmul.f32 %v7838_v31, %v9921_v51 }
 0x7d5   : > { %7205 = vmatprep.mubr.msk.bf16.mxu0 %vm1602_vm0, %v2727_v10  ;;  %v2732_v7 = vpack.c.bf16 %v2722_v49, %v2721_v15 }
 0x7d6   : > { %7206 = vmatmul.mubr.msk.bf16.vlgmr.msra.gmra.mrb[48].mxu0 %vm1602_vm0, %v2728_v43 }
 0x7d7   : > { %7218 = vmatpush3.bf16.msra.mxu0 %v9802_v44  ;;  %7221 = vmatprep.mubr.msk.bf16.mxu0 %vm1602_vm0, %v2731_v12  ;;  %v3010_v44 = vsel %vm1602_vm0, %v9918_v6, 0 }
 0x7d8   : > { %7219 = vmatprep.subr.bf16.mxu0 %v9811_v13 }
 0x7db   : > { %7220 = vmatpush3.bf16.msra.mxu0 %v9811_v13  ;;  %v3069_v13 = vpop.permute.xlu1 %3068 }
 0x7dc   : > { %7409 = vmatprep.subr.msk.bf16.mxu0 %vm1602_vm0, %v9918_v6 }
 0x7de   : > { %7222 = vmatmul.mubr.msk.bf16.vlgmr.msra.gmra.mrb[52].mxu0 %vm1602_vm0, %v2732_v7 }
 0x7df   : > { %7237 = vmatprep.mubr.msk.bf16.mxu0 %vm1602_vm0, %v2996_v28 }
 0x7e4   : > { %7234 = vmatpush3.bf16.xpose.msra.mxu0 %v3010_v44 }
 0x7e5   : > { %7410 = vmatprep.subr.msk.bf16.mxu0 %vm1602_vm0, %v9971_v34 }
 0x7ec   : > { %7236 = vmatpush3.bf16.xpose.msra.mxu0 %v3013_v38 }
 0x7fa   : > { %v2670_v51 = vpop.xlane.xlu1 %2669 }
 0x7fb   : > { %7839 = vrcp.f32 %v2670_v51 }
 0x7fc   : > { %7841 = vrcp.f32 %v2661_v57 }
 0x7fd   : > { %7843 = vrcp.f32 %v2667_v19 }
 0x7fe   : > { %v2664_v16 = vpop.xlane.xlu1 %2663 }
 0x7ff   : > { %7845 = vrcp.f32 %v2664_v16 }
 0x802   : > { %v2691_v21 = vpop.xlane.xlu1 %2690 }
 0x804   : > { %v2688_v52 = vpop.xlane.xlu0 %2687 }
 0x805   : > { %7847 = vrcp.f32 %v2688_v52  ;;  %v7840_v36 = vpop.eup %7839 }
 0x806   : > { %v2685_v6 = vpop.xlane.xlu1 %2684  ;;  %v7842_v62 = vpop.eup %7841  ;;  %v2718_v34 = vmul.f32 %v7840_v36, %v9977_v8 }
 0x807   : > { %7849 = vrcp.f32 %v2685_v6  ;;  %v7844_v35 = vpop.eup %7843  ;;  %v2715_v30 = vmul.f32 %v7842_v62, %v9961_v0 }
 0x808   : > { %v3138_v26 = vpop.permute.xlu0 %3137  ;;  %7851 = vrcp.f32 %v2691_v21  ;;  %v2717_v37 = vmul.f32 %v7844_v35, %v9955_v54  ;;  %v3079_v21 = vsel %vm1602_vm0, %v3069_v13, 0 }
 0x809   : > { %v7846_v58 = vpop.eup %7845  ;;  %7413 = vmatprep.subr.msk.bf16.mxu0 %vm1602_vm0, %v3138_v26  ;;  %v3148_v8 = vsel %vm1602_vm0, %v3138_v26, 0 }
 0x80a   : > { %v2694_v45 = vpop.xlane.xlu1 %2693  ;;  %v2716_v18 = vmul.f32 %v7846_v58, %v9981_v29  ;;  %v2730_v20 = vpack.c.bf16 %v2718_v34, %v2717_v37 }
 0x80b   : > { %7853 = vrcp.f32 %v2694_v45 }
 0x80c   : > { %v3071_v19 = vpop.permute.xlu0 %3070  ;;  %v2729_v10 = vpack.c.bf16 %v2716_v18, %v2715_v30 }
 0x80d   : > { %v3082_v36 = vsel %vm1602_vm0, %v3071_v19, 0 }
 0x80e   : > { %7213 = vmatprep.mubr.msk.bf16.mxu1 %vm1602_vm0, %v2729_v10  ;;  %v2998_v43 = vpop.permute.xlu1 %2997 }
 0x80f   : > { %v7848_v12 = vpop.eup %7847  ;;  %7214 = vmatmul.mubr.msk.bf16.vlgmr.msra.gmra.mrb[48].mxu1 %vm1602_vm0, %v2730_v20  ;;  %7238 = vmatmul.mubr.msk.bf16.vlgmr.msra.gmra.mrb[56].mxu0 %vm1602_vm0, %v2998_v43 }
 0x810   : > { %v3134_v31 = vpop.permute.xlu0 %3133  ;;  %7226 = vmatpush3.bf16.msra.mxu1 %v9814_v63  ;;  %7250 = vmatpush3.bf16.xpose.msra.mxu0 %v3148_v8  ;;  %v2724_v49 = vmul.f32 %v7848_v12, %v9991_v17 }
 0x811   : > { %v7850_v0 = vpop.eup %7849  ;;  %7227 = vmatprep.subr.bf16.mxu1 %v10033_v2  ;;  %7253 = vmatprep.mubr.msk.bf16.mxu0 %vm1602_vm0, %v3134_v31 }
 0x812   : > { %v3140_v54 = vpop.permute.xlu1 %3139  ;;  %v2723_v29 = vmul.f32 %v7850_v0, %v9987_v46  ;;  %v7852_v57 = vpop.eup %7851 }
 0x813   : > { %7414 = vmatprep.subr.msk.bf16.mxu0 %vm1602_vm0, %v3140_v54  ;;  %v2725_v63 = vmul.f32 %v7852_v57, %v9985_v48  ;;  %v3151_v46 = vsel %vm1602_vm0, %v3140_v54, 0 }
 0x814   : > { %v3136_v15 = vpop.permute.xlu0 %3135  ;;  %7228 = vmatpush3.bf16.msra.mxu1 %v10033_v2  ;;  %v2733_v7 = vpack.c.bf16 %v2724_v49, %v2723_v29 }
 0x815   : > { %v7854_v28 = vpop.eup %7853  ;;  %7411 = vmatprep.subr.msk.bf16.mxu1 %vm1602_vm0, %v3069_v13 }
 0x816   : > { %v2726_v44 = vmul.f32 %v7854_v28, %v9997_v5  ;;  %7229 = vmatprep.mubr.msk.bf16.mxu1 %vm1602_vm0, %v2733_v7  ;;  %v3065_v38 = vpop.permute.xlu1 %3064 }
 0x818   : > { %v3067_v17 = vpop.permute.xlu0 %3066  ;;  %7252 = vmatpush3.bf16.xpose.msra.mxu0 %v3151_v46  ;;  %v2734_v51 = vpack.c.bf16 %v2726_v44, %v2725_v63 }
 0x81a   : > { %7230 = vmatmul.mubr.msk.bf16.vlgmr.msra.gmra.mrb[52].mxu1 %vm1602_vm0, %v2734_v51  ;;  %v3207_v16 = vpop.permute.xlu1 %3206 }
 0x81b   : > { %7245 = vmatprep.mubr.msk.bf16.mxu1 %vm1602_vm0, %v3065_v38  ;;  %v3217_v13 = vsel %vm1602_vm0, %v3207_v16, 0 }
 0x81c   : > { %v3203_v2 = vpop.permute.xlu0 %3202 }
 0x81d   : > { %7242 = vmatpush3.bf16.xpose.msra.mxu1 %v3079_v21 }
 0x81e   : > { %7412 = vmatprep.subr.msk.bf16.mxu1 %vm1602_vm0, %v3071_v19  ;;  %v3209_v48 = vpop.permute.xlu1 %3208 }
 0x81f   : > { %7254 = vmatmul.mubr.msk.bf16.vlgmr.msra.gmra.mrb[60].mxu0 %vm1602_vm0, %v3136_v15  ;;  %v3220_v35 = vsel %vm1602_vm0, %v3209_v48, 0 }
 0x820   : > { %v3456_v5 = vpop.permute.xlu0 %3455 }
 0x821   : > { %7265 = vmatprep.subr.bf16.mxu0 %v3456_v5 }
 0x822   : > { %7266 = vmatpush3.bf16.msra.mxu0 %v3456_v5  ;;  %v3205_v52 = vpop.permute.xlu1 %3204 }
 0x824   : > { %v10095_v62 = vpop.permute.xlu0 %3577 }
 0x825   : > { %7244 = vmatpush3.bf16.xpose.msra.mxu1 %v3082_v36 }
 0x826   : > { %7415 = vmatprep.subr.msk.bf16.mxu1 %vm1602_vm0, %v3207_v16  ;;  %v3458_v6 = vpop.permute.xlu1 %3457 }
 0x827   : > { %7267 = vmatprep.subr.bf16.mxu0 %v3458_v6 }
 0x828   : > { %7268 = vmatpush3.bf16.msra.mxu0 %v3458_v6  ;;  %v3517_v26 = vpop.permute.xlu0 %3516 }
 0x829   : > { %7281 = vmatprep.subr.bf16.mxu0 %v10095_v62 }
 0x82a   : > { %v10103_v58 = vpop.permute.xlu1 %3579 }
 0x82c   : > { %7246 = vmatmul.mubr.msk.bf16.vlgmr.msra.gmra.mrb[56].mxu1 %vm1602_vm0, %v3067_v17 }
 0x82d   : > { %7258 = vmatpush3.bf16.xpose.msra.mxu1 %v3217_v13  ;;  %7261 = vmatprep.mubr.msk.bf16.mxu1 %vm1602_vm0, %v3203_v2 }
 0x82e   : > { %7416 = vmatprep.subr.msk.bf16.mxu1 %vm1602_vm0, %v3209_v48  ;;  %v3519_v34 = vpop.permute.xlu1 %3518 }
 0x832   : > { %v10106_v45 = vpop.permute.xlu1 %3638 }
 0x835   : > { %7260 = vmatpush3.bf16.xpose.msra.mxu1 %v3220_v35 }
 0x836   : > { %7273 = vmatprep.subr.bf16.mxu1 %v3517_v26 }
 0x83c   : > { %7262 = vmatmul.mubr.msk.bf16.vlgmr.msra.gmra.mrb[60].mxu1 %vm1602_vm0, %v3205_v52 }
 0x83d   : > { %7274 = vmatpush3.bf16.msra.mxu1 %v3517_v26 }
 0x83e   : > { %7275 = vmatprep.subr.bf16.mxu1 %v3519_v34 }
 0x841   : > { %7276 = vmatpush3.bf16.msra.mxu1 %v3519_v34 }
 0x842   : > { %7289 = vmatprep.subr.bf16.mxu1 %v10106_v45 }
 0x8a9   : > { %v10109_v30 = vpop.f32.mrb[48].mxu0 }
 0x8aa   : > { %v10111_v18 = vpop.f32.mrb[49].mxu0 }
 0x8ab   : > { %v10113_v37 = vpop.f32.mrb[50].mxu0 }
 0x8ac   : > { %v10117_v10 = vpop.f32.mrb[51].mxu0 }
 0x8b1   : > { %v10121_v43 = vpop.f32.mrb[52].mxu0 }
 0x8b2   : > { %11548 = vst [vmem:[#allocation64_spill] sm:$0xff] %v10121_v43  ;;  %v10123_v12 = vpop.f32.mrb[53].mxu0 }
 0x8b3   : > { %11549 = vst [vmem:[#allocation65_spill] sm:$0xff] %v10123_v12  ;;  %v10125_v8 = vpop.f32.mrb[54].mxu0 }
 0x8b4   : > { %v10129_v0 = vpop.f32.mrb[55].mxu0 }
 0x8b5   : > { %11550 = vst [vmem:[#allocation66_spill] sm:$0xff] %v10129_v0 }
 0x8e2   : > { %v10133_v29 = vpop.f32.mrb[48].mxu1  ;;  %v10135_v49 = vpop.f32.mrb[56].mxu0 }
 0x8e3   : > { %v10137_v57 = vpop.f32.mrb[49].mxu1  ;;  %v10139_v15 = vpop.f32.mrb[57].mxu0  ;;  %v3277_v7 = vsel %vm1602_vm0, %v10135_v49, -inf }
 0x8e4   : > { %v10143_v28 = vpop.f32.mrb[50].mxu1  ;;  %3278 = vmax.xlane.f32.xlu0 %v3277_v7  ;;  %v10145_v63 = vpop.f32.mrb[58].mxu0  ;;  %v3271_v16 = vsel %vm1602_vm0, %v10139_v15, -inf }
 0x8e5   : > { %v10149_v38 = vpop.f32.mrb[51].mxu1  ;;  %v10151_v46 = vpop.f32.mrb[59].mxu0  ;;  %v3280_v2 = vsel %vm1602_vm0, %v10145_v63, -inf }
 0x8e6   : > { %v3274_v51 = vsel %vm1602_vm0, %v10151_v46, -inf }
 0x8e7   : > { %3275 = vmax.xlane.f32.xlu1 %v3274_v51 }
 0x8e8   : > { %3272 = vmax.xlane.f32.xlu0 %v3271_v16 }
 0x8ec   : > { %3281 = vmax.xlane.f32.xlu0 %v3280_v2 }
 0x8ed   : > { %v10161_v21 = vpop.f32.mrb[52].mxu1 }
 0x8ee   : > { %11551 = vst [vmem:[#allocation67_spill] sm:$0xff] %v10161_v21  ;;  %v10163_v48 = vpop.f32.mrb[53].mxu1 }
 0x8ef   : > { %11552 = vst [vmem:[#allocation68_spill] sm:$0xff] %v10163_v48  ;;  %v10165_v5 = vpop.f32.mrb[54].mxu1 }
 0x8f0   : > { %11553 = vst [vmem:[#allocation69_spill] sm:$0xff] %v10165_v5  ;;  %v10169_v36 = vpop.f32.mrb[55].mxu1 }
 0x8f1   : > { %11554 = vst [vmem:[#allocation70_spill] sm:$0xff] %v10169_v36 }
 0x8f2   : > { %v7255_v13 = vpop.f32.mrb[60].mxu0 }
 0x8f3   : > { %v10173_v35 = vpop.f32.mrb[61].mxu0  ;;  %v3301_v26 = vsel %vm1602_vm0, %v7255_v13, -inf }
 0x8f4   : > { %3302 = vmax.xlane.f32.xlu0 %v3301_v26  ;;  %v10176_v34 = vpop.f32.mrb[62].mxu0  ;;  %v3295_v16 = vsel %vm1602_vm0, %v10173_v35, -inf }
 0x8f5   : > { %v10178_v7 = vpop.f32.mrb[63].mxu0  ;;  %v3304_v51 = vsel %vm1602_vm0, %v10176_v34, -inf }
 0x8f6   : > { %3305 = vmax.xlane.f32.xlu1 %v3304_v51  ;;  %v3298_v2 = vsel %vm1602_vm0, %v10178_v7, -inf }
 0x8f8   : > { %3296 = vmax.xlane.f32.xlu0 %v3295_v16 }
 0x8fa   : > { %3299 = vmax.xlane.f32.xlu1 %v3298_v2 }
 0x8ff   : > { %v10186_v6 = vpop.f32.mrb[56].mxu1 }
 0x900   : > { %v10188_v52 = vpop.f32.mrb[57].mxu1  ;;  %v3289_v26 = vsel %vm1602_vm0, %v10186_v6, -inf }
 0x901   : > { %3290 = vmax.xlane.f32.xlu0 %v3289_v26  ;;  %v10192_v54 = vpop.f32.mrb[58].mxu1  ;;  %v3283_v16 = vsel %vm1602_vm0, %v10188_v52, -inf }
 0x902   : > { %v10194_v31 = vpop.f32.mrb[59].mxu1  ;;  %v3292_v51 = vsel %vm1602_vm0, %v10192_v54, -inf }
 0x903   : > { %3293 = vmax.xlane.f32.xlu1 %v3292_v51  ;;  %v3286_v2 = vsel %vm1602_vm0, %v10194_v31, -inf }
 0x905   : > { %3284 = vmax.xlane.f32.xlu0 %v3283_v16 }
 0x907   : > { %3287 = vmax.xlane.f32.xlu1 %v3286_v2 }
 0x90f   : > { %v10202_v17 = vpop.f32.mrb[60].mxu1 }
 0x910   : > { %v10204_v44 = vpop.f32.mrb[61].mxu1  ;;  %v3313_v26 = vsel %vm1602_vm0, %v10202_v17, -inf }
 0x911   : > { %3314 = vmax.xlane.f32.xlu0 %v3313_v26  ;;  %v10208_v19 = vpop.f32.mrb[62].mxu1  ;;  %v3307_v16 = vsel %vm1602_vm0, %v10204_v44, -inf  ;;  %v10222_v26 = vpop.permute.xlu0 %3711 }
 0x912   : > { %v10210_v20 = vpop.f32.mrb[63].mxu1  ;;  %v3316_v51 = vsel %vm1602_vm0, %v10208_v19, -inf }
 0x913   : > { %3317 = vmax.xlane.f32.xlu1 %v3316_v51  ;;  %v3310_v2 = vsel %vm1602_vm0, %v10210_v20, -inf }
 0x915   : > { %3308 = vmax.xlane.f32.xlu0 %v3307_v16 }
 0x917   : > { %3311 = vmax.xlane.f32.xlu1 %v3310_v2 }
 0x928   : > { %3713 = vrot.lane.b32.xlu1 %v9466_v3, %s8643_s22 }
 0x92b   : > { %3640 = vrot.lane.b32.xlu0 %v9539_v33, %s8642_s19 }
 0x971   : > { %v3279_v42 = vpop.xlane.xlu0 %3278 }
 0x972   : > { %v3321_v50 = vsub.f32 %v10135_v49, %v3279_v42 }
 0x974   : > { %v3339_v51 = vmul.f32 1.442695, %v3321_v50  ;;  %v3276_v48 = vpop.xlane.xlu1 %3275 }
 0x975   : > { %v3273_v36 = vpop.xlane.xlu0 %3272  ;;  %v3320_v21 = vsub.f32 %v10151_v46, %v3276_v48 }
 0x976   : > { %7855 = vpow2.f32 %v3339_v51  ;;  %v3319_v16 = vsub.f32 %v10139_v15, %v3273_v36 }
 0x977   : > { %v3337_v12 = vmul.f32 1.442695, %v3320_v21 }
 0x978   : > { %v3335_v2 = vmul.f32 1.442695, %v3319_v16 }
 0x979   : > { %v3282_v5 = vpop.xlane.xlu0 %3281 }
 0x97a   : > { %7857 = vpow2.f32 %v3335_v2  ;;  %v3322_v3 = vsub.f32 %v10145_v63, %v3282_v5 }
 0x97c   : > { %v3341_v0 = vmul.f32 1.442695, %v3322_v3 }
 0x97e   : > { %7859 = vpow2.f32 %v3341_v0 }
 0x97f   : > { %7861 = vpow2.f32 %v3337_v12 }
 0x980   : > { %v10228_v43 = vpop.eup %7855 }
 0x981   : > { %v3303_v42 = vpop.xlane.xlu0 %3302  ;;  %v3373_v50 = vsel %vm1602_vm0, %v10228_v43, 0.0 }
 0x982   : > { %v3329_v49 = vsub.f32 %v7255_v13, %v3303_v42  ;;  %3374 = vadd.xlane.f32.xlu0 %v3373_v50 }
 0x983   : > { %v3306_v15 = vpop.xlane.xlu1 %3305 }
 0x984   : > { %v10232_v36 = vpop.eup %7857  ;;  %v3355_v46 = vmul.f32 1.442695, %v3329_v49  ;;  %v3330_v48 = vsub.f32 %v10176_v34, %v3306_v15 }
 0x985   : > { %v3297_v51 = vpop.xlane.xlu0 %3296  ;;  %v3367_v63 = vsel %vm1602_vm0, %v10232_v36, 0.0 }
 0x986   : > { %7863 = vpow2.f32 %v3355_v46  ;;  %v3357_v0 = vmul.f32 1.442695, %v3330_v48  ;;  %v3327_v12 = vsub.f32 %v10173_v35, %v3297_v51  ;;  %3368 = vadd.xlane.f32.xlu0 %v3367_v63 }
 0x987   : > { %v3300_v21 = vpop.xlane.xlu1 %3299 }
 0x988   : > { %v10238_v5 = vpop.eup %7859  ;;  %7865 = vpow2.f32 %v3357_v0  ;;  %v3351_v13 = vmul.f32 1.442695, %v3327_v12  ;;  %v3328_v16 = vsub.f32 %v10178_v7, %v3300_v21 }
 0x989   : > { %v3376_v2 = vsel %vm1602_vm0, %v10238_v5, 0.0  ;;  %v10243_v34 = vpop.eup %7861 }
 0x98a   : > { %7867 = vpow2.f32 %v3351_v13  ;;  %v3353_v3 = vmul.f32 1.442695, %v3328_v16  ;;  %3377 = vadd.xlane.f32.xlu1 %v3376_v2  ;;  %v3370_v35 = vsel %vm1602_vm0, %v10243_v34, 0.0 }
 0x98c   : > { %7869 = vpow2.f32 %v3353_v3 }
 0x98e   : > { %v3291_v42 = vpop.xlane.xlu0 %3290  ;;  %3371 = vadd.xlane.f32.xlu1 %v3370_v35 }
 0x98f   : > { %v3325_v50 = vsub.f32 %v10186_v6, %v3291_v42 }
 0x990   : > { %v10248_v49 = vpop.eup %7863  ;;  %v3294_v15 = vpop.xlane.xlu1 %3293 }
 0x991   : > { %v3347_v7 = vmul.f32 1.442695, %v3325_v50  ;;  %v3326_v46 = vsub.f32 %v10192_v54, %v3294_v15  ;;  %v3397_v48 = vsel %vm1602_vm0, %v10248_v49, 0.0 }
 0x992   : > { %v10253_v51 = vpop.eup %7865  ;;  %v3285_v63 = vpop.xlane.xlu0 %3284  ;;  %3398 = vadd.xlane.f32.xlu0 %v3397_v48 }
 0x993   : > { %7871 = vpow2.f32 %v3347_v7  ;;  %v3349_v0 = vmul.f32 1.442695, %v3326_v46  ;;  %v3323_v12 = vsub.f32 %v10188_v52, %v3285_v63  ;;  %v3400_v6 = vsel %vm1602_vm0, %v10253_v51, 0.0 }
 0x994   : > { %v10258_v21 = vpop.eup %7867  ;;  %3401 = vadd.xlane.f32.xlu1 %v3400_v6  ;;  %v3288_v13 = vpop.xlane.xlu1 %3287 }
 0x995   : > { %7873 = vpow2.f32 %v3349_v0  ;;  %v3343_v54 = vmul.f32 1.442695, %v3323_v12  ;;  %v3324_v16 = vsub.f32 %v10194_v31, %v3288_v13  ;;  %v3391_v2 = vsel %vm1602_vm0, %v10258_v21, 0.0 }
 0x996   : > { %v10263_v3 = vpop.eup %7869  ;;  %3392 = vadd.xlane.f32.xlu0 %v3391_v2 }
 0x997   : > { %7875 = vpow2.f32 %v3343_v54  ;;  %v3345_v35 = vmul.f32 1.442695, %v3324_v16  ;;  %v3394_v52 = vsel %vm1602_vm0, %v10263_v3, 0.0 }
 0x998   : > { %3395 = vadd.xlane.f32.xlu1 %v3394_v52 }
 0x999   : > { %7877 = vpow2.f32 %v3345_v35 }
 0x99d   : > { %v10267_v42 = vpop.eup %7871 }
 0x99e   : > { %v3385_v50 = vsel %vm1602_vm0, %v10267_v42, 0.0  ;;  %v3315_v12 = vpop.xlane.xlu0 %3314 }
 0x99f   : > { %v10271_v15 = vpop.eup %7873  ;;  %3386 = vadd.xlane.f32.xlu0 %v3385_v50  ;;  %v3333_v54 = vsub.f32 %v10202_v17, %v3315_v12 }
 0x9a0   : > { %v3388_v31 = vsel %vm1602_vm0, %v10271_v15, 0.0  ;;  %v3318_v0 = vpop.xlane.xlu1 %3317 }
 0x9a1   : > { %v10275_v7 = vpop.eup %7875  ;;  %3389 = vadd.xlane.f32.xlu1 %v3388_v31  ;;  %v3363_v35 = vmul.f32 1.442695, %v3333_v54  ;;  %v3334_v50 = vsub.f32 %v10208_v19, %v3318_v0 }
 0x9a2   : > { %v3379_v46 = vsel %vm1602_vm0, %v10275_v7, 0.0  ;;  %v3309_v16 = vpop.xlane.xlu0 %3308 }
 0x9a3   : > { %v10279_v48 = vpop.eup %7877  ;;  %3380 = vadd.xlane.f32.xlu0 %v3379_v46  ;;  %v3331_v52 = vsub.f32 %v10204_v44, %v3309_v16  ;;  %v3365_v31 = vmul.f32 1.442695, %v3334_v50 }
 0x9a4   : > { %v3382_v63 = vsel %vm1602_vm0, %v10279_v48, 0.0  ;;  %v3312_v6 = vpop.xlane.xlu1 %3311 }
 0x9a5   : > { %3383 = vadd.xlane.f32.xlu1 %v3382_v63  ;;  %v3332_v13 = vsub.f32 %v10210_v20, %v3312_v6 }
 0x9a7   : > { %v3361_v2 = vmul.f32 1.442695, %v3332_v13 }
 0x9a9   : > { %7879 = vpow2.f32 %v3361_v2 }
 0x9aa   : > { %7881 = vpow2.f32 %v3363_v35 }
 0x9b3   : > { %v10291_v46 = vpop.eup %7879 }
 0x9b4   : > { %v3406_v20 = vsel %vm1602_vm0, %v10291_v46, 0.0 }
 0x9b6   : > { %3709 = vrot.lane.b32.xlu1 %v9462_v60, %s8643_s22  ;;  %v3359_v60 = vmul.f32 1.442695, %v3331_v52 }
 0x9b8   : > { %7883 = vpow2.f32 %v3359_v60 }
 0x9b9   : > { %3707 = vrot.lane.b32.xlu0 %v9452_v47, %s8643_s22  ;;  %7885 = vpow2.f32 %v3365_v31  ;;  %v10293_v47 = vpop.eup %7881 }
 0x9ba   : > { %v3409_v17 = vsel %vm1602_vm0, %v10293_v47, 0.0 }
 0x9c2   : > { %v10299_v44 = vpop.eup %7883 }
 0x9c3   : > { %v3403_v19 = vsel %vm1602_vm0, %v10299_v44, 0.0  ;;  %v10303_v63 = vpop.eup %7885 }
 0x9c4   : > { %v3412_v0 = vsel %vm1602_vm0, %v10303_v63, 0.0 }
 0x9d8   : > { %3407 = vadd.xlane.f32.xlu0 %v3406_v20 }
 0x9da   : > { %3410 = vadd.xlane.f32.xlu1 %v3409_v17 }
 0x9de   : > { %3404 = vadd.xlane.f32.xlu1 %v3403_v19 }
 0x9e2   : > { %3413 = vadd.xlane.f32.xlu1 %v3412_v0 }
 0x9ee   : > { %3780 = vrot.lane.b32.xlu0 %v9476_v11, %s8643_s22 }
 0x9f2   : > { %3776 = vrot.lane.b32.xlu0 %v9474_v9, %s8643_s22  ;;  %v10331_v9 = vpop.permute.xlu0 %3640 }
 0x9f3   : > { %3782 = vrot.lane.b32.xlu1 %v9490_v25, %s8643_s22 }
 0x9f6   : > { %3849 = vrot.lane.b32.xlu0 %v9500_v41, %s8643_s22 }
 0x9f7   : > { %3778 = vrot.lane.b32.xlu1 %v9486_v22, %s8643_s22  ;;  %v10333_v22 = vpop.permute.xlu1 %3713 }
 0x9fa   : > { %3845 = vrot.lane.b32.xlu0 %v9498_v40, %s8643_s22 }
 0x9fb   : > { %3851 = vrot.lane.b32.xlu1 %v9514_v59, %s8643_s22 }
 0x9fe   : > { %3918 = vrot.lane.b32.xlu0 %v9525_v14, %s8643_s22 }
 0x9ff   : > { %3847 = vrot.lane.b32.xlu1 %v9510_v53, %s8643_s22 }
 0xa02   : > { %3914 = vrot.lane.b32.xlu0 %v9523_v27, %s8643_s22 }
 0xa03   : > { %3920 = vrot.lane.b32.xlu1 %v9542_v39, %s8643_s22 }
 0xa07   : > { %3916 = vrot.lane.b32.xlu1 %v9537_v1, %s8643_s22 }
 0xa0f   : > { %v3375_v11 = vpop.xlane.xlu0 %3374 }
 0xa13   : > { %v3369_v25 = vpop.xlane.xlu0 %3368 }
 0xa17   : > { %v3378_v40 = vpop.xlane.xlu1 %3377 }
 0xa18   : > { %7887 = vrcp.f32 %v3378_v40 }
 0xa19   : > { %7889 = vrcp.f32 %v3369_v25 }
 0xa1a   : > { %7891 = vrcp.f32 %v3375_v11 }
 0xa1b   : > { %v3372_v41 = vpop.xlane.xlu1 %3371 }
 0xa1c   : > { %7893 = vrcp.f32 %v3372_v41 }
 0xa1f   : > { %v3399_v53 = vpop.xlane.xlu0 %3398 }
 0xa21   : > { %v3402_v59 = vpop.xlane.xlu1 %3401 }
 0xa22   : > { %v7888_v27 = vpop.eup %7887  ;;  %7895 = vrcp.f32 %v3402_v59 }
 0xa23   : > { %v3393_v14 = vpop.xlane.xlu0 %3392  ;;  %v7890_v39 = vpop.eup %7889  ;;  %v3434_v13 = vmul.f32 %v7888_v27, %v10238_v5 }
 0xa24   : > { %7897 = vrcp.f32 %v3393_v14  ;;  %v7892_v1 = vpop.eup %7891  ;;  %v3431_v54 = vmul.f32 %v7890_v39, %v10232_v36 }
 0xa25   : > { %7899 = vrcp.f32 %v3399_v53  ;;  %v3396_v12 = vpop.xlane.xlu1 %3395  ;;  %v3433_v2 = vmul.f32 %v7892_v1, %v10228_v43 }
 0xa26   : > { %v7894_v6 = vpop.eup %7893  ;;  %7901 = vrcp.f32 %v3396_v12 }
 0xa27   : > { %v3432_v16 = vmul.f32 %v7894_v6, %v10243_v34  ;;  %v3448_v52 = vpack.c.bf16 %v3434_v13, %v3433_v2 }
 0xa29   : > { %v3447_v35 = vpack.c.bf16 %v3432_v16, %v3431_v54 }
 0xa2b   : > { %7269 = vmatprep.mubr.msk.bf16.mxu0 %vm1602_vm0, %v3447_v35 }
 0xa2c   : > { %v3387_v50 = vpop.xlane.xlu0 %3386  ;;  %7270 = vmatmul.mubr.msk.bf16.vlgmr.msra.gmra.mrb[64].mxu0 %vm1602_vm0, %v3448_v52  ;;  %v7896_v60 = vpop.eup %7895 }
 0xa2d   : > { %7282 = vmatpush3.bf16.msra.mxu0 %v10095_v62  ;;  %v3442_v34 = vmul.f32 %v7896_v60, %v10253_v51 }
 0xa2e   : > { %v7898_v31 = vpop.eup %7897  ;;  %7283 = vmatprep.subr.bf16.mxu0 %v10103_v58  ;;  %v3390_v5 = vpop.xlane.xlu1 %3389 }
 0xa2f   : > { %v7900_v20 = vpop.eup %7899  ;;  %7903 = vrcp.f32 %v3390_v5  ;;  %v3439_v17 = vmul.f32 %v7898_v31, %v10258_v21 }
 0xa30   : > { %v7902_v36 = vpop.eup %7901  ;;  %v3381_v43 = vpop.xlane.xlu0 %3380  ;;  %v3441_v0 = vmul.f32 %v7900_v20, %v10248_v49 }
 0xa31   : > { %7905 = vrcp.f32 %v3381_v43  ;;  %7284 = vmatpush3.bf16.msra.mxu0 %v10103_v58  ;;  %v3440_v19 = vmul.f32 %v7902_v36, %v10263_v3  ;;  %v3722_v58 = vsel %vm1602_vm0, %v10222_v26, 0 }
 0xa32   : > { %7907 = vrcp.f32 %v3387_v50  ;;  %7417 = vmatprep.subr.msk.bf16.mxu0 %vm1602_vm0, %v10222_v26  ;;  %v3384_v62 = vpop.xlane.xlu1 %3383  ;;  %v3452_v25 = vpack.c.bf16 %v3442_v34, %v3441_v0  ;;  %v3725_v26 = vsel %vm1602_vm0, %v10333_v22, 0 }
 0xa33   : > { %7909 = vrcp.f32 %v3384_v62  ;;  %v3451_v11 = vpack.c.bf16 %v3440_v19, %v3439_v17 }
 0xa34   : > { %v3708_v51 = vpop.permute.xlu0 %3707 }
 0xa35   : > { %7285 = vmatprep.mubr.msk.bf16.mxu0 %vm1602_vm0, %v3451_v11 }
 0xa36   : > { %7286 = vmatmul.mubr.msk.bf16.vlgmr.msra.gmra.mrb[68].mxu0 %vm1602_vm0, %v3452_v25 }
 0xa37   : > { %7301 = vmatprep.mubr.msk.bf16.mxu0 %vm1602_vm0, %v3708_v51 }
 0xa39   : > { %v7904_v21 = vpop.eup %7903 }
 0xa3a   : > { %7298 = vmatpush3.bf16.xpose.msra.mxu0 %v3722_v58  ;;  %v3438_v41 = vmul.f32 %v7904_v21, %v10271_v15  ;;  %v3710_v15 = vpop.permute.xlu1 %3709 }
 0xa3b   : > { %v7906_v49 = vpop.eup %7905  ;;  %7418 = vmatprep.subr.msk.bf16.mxu0 %vm1602_vm0, %v10333_v22 }
 0xa3c   : > { %v7908_v3 = vpop.eup %7907  ;;  %v3435_v53 = vmul.f32 %v7906_v49, %v10275_v7 }
 0xa3d   : > { %v7910_v40 = vpop.eup %7909  ;;  %v3437_v27 = vmul.f32 %v7908_v3, %v10267_v42 }
 0xa3e   : > { %v3436_v59 = vmul.f32 %v7910_v40, %v10279_v48 }
 0xa3f   : > { %v3450_v39 = vpack.c.bf16 %v3438_v41, %v3437_v27 }
 0xa40   : > { %v3449_v14 = vpack.c.bf16 %v3436_v59, %v3435_v53 }
 0xa42   : > { %7277 = vmatprep.mubr.msk.bf16.mxu1 %vm1602_vm0, %v3449_v14  ;;  %7300 = vmatpush3.bf16.xpose.msra.mxu0 %v3725_v26 }
 0xa43   : > { %7278 = vmatmul.mubr.msk.bf16.vlgmr.msra.gmra.mrb[64].mxu1 %vm1602_vm0, %v3450_v39 }
 0xa44   : > { %7290 = vmatpush3.bf16.msra.mxu1 %v10106_v45 }
 0xa45   : > { %7291 = vmatprep.subr.bf16.mxu1 %v10331_v9 }
 0xa48   : > { %7292 = vmatpush3.bf16.msra.mxu1 %v10331_v9 }
 0xa49   : > { %7302 = vmatmul.mubr.msk.bf16.vlgmr.msra.gmra.mrb[72].mxu0 %vm1602_vm0, %v3710_v15 }
 0xa65   : > { %v3408_v42 = vpop.xlane.xlu0 %3407 }
 0xa66   : > { %7911 = vrcp.f32 %v3408_v42 }
 0xa67   : > { %v3411_v7 = vpop.xlane.xlu1 %3410 }
 0xa69   : > { %v3781_v48 = vpop.permute.xlu0 %3780 }
 0xa6a   : > { %7419 = vmatprep.subr.msk.bf16.mxu1 %vm1602_vm0, %v3781_v48 }
 0xa6b   : > { %v3405_v22 = vpop.xlane.xlu1 %3404 }
 0xa6c   : > { %7913 = vrcp.f32 %v3405_v22 }
 0xa6d   : > { %v3777_v1 = vpop.permute.xlu0 %3776  ;;  %7915 = vrcp.f32 %v3411_v7 }
 0xa6f   : > { %v3414_v12 = vpop.xlane.xlu1 %3413 }
 0xa70   : > { %7917 = vrcp.f32 %v3414_v12  ;;  %v7912_v13 = vpop.eup %7911 }
 0xa71   : > { %v3850_v45 = vpop.permute.xlu0 %3849  ;;  %v3444_v52 = vmul.f32 %v7912_v13, %v10291_v46  ;;  %v3791_v46 = vsel %vm1602_vm0, %v3781_v48, 0 }
 0xa72   : > { %7421 = vmatprep.subr.msk.bf16.mxu0 %vm1602_vm0, %v3850_v45  ;;  %v3860_v6 = vsel %vm1602_vm0, %v3850_v45, 0 }
 0xa73   : > { %7314 = vmatpush3.bf16.xpose.msra.mxu0 %v3860_v6  ;;  %v3783_v9 = vpop.permute.xlu1 %3782 }
 0xa75   : > { %v3846_v54 = vpop.permute.xlu0 %3845 }
 0xa76   : > { %v7914_v16 = vpop.eup %7913  ;;  %7317 = vmatprep.mubr.msk.bf16.mxu0 %vm1602_vm0, %v3846_v54 }
 0xa77   : > { %v3779_v2 = vpop.permute.xlu1 %3778  ;;  %v3443_v35 = vmul.f32 %v7914_v16, %v10299_v44  ;;  %v7916_v50 = vpop.eup %7915  ;;  %v3794_v44 = vsel %vm1602_vm0, %v3783_v9, 0 }
 0xa78   : > { %v3445_v5 = vmul.f32 %v7916_v50, %v10293_v47 }
 0xa79   : > { %v3453_v60 = vpack.c.bf16 %v3444_v52, %v3443_v35 }
 0xa7a   : > { %v7918_v31 = vpop.eup %7917 }
 0xa7b   : > { %v3446_v20 = vmul.f32 %v7918_v31, %v10303_v63  ;;  %7293 = vmatprep.mubr.msk.bf16.mxu1 %vm1602_vm0, %v3453_v60  ;;  %v3852_v36 = vpop.permute.xlu1 %3851  ;;  %v3919_v63 = vpop.permute.xlu0 %3918 }
 0xa7c   : > { %7422 = vmatprep.subr.msk.bf16.mxu0 %vm1602_vm0, %v3852_v36  ;;  %v3863_v34 = vsel %vm1602_vm0, %v3852_v36, 0  ;;  %v3929_v19 = vsel %vm1602_vm0, %v3919_v63, 0 }
 0xa7d   : > { %7316 = vmatpush3.bf16.xpose.msra.mxu0 %v3863_v34  ;;  %v3454_v43 = vpack.c.bf16 %v3446_v20, %v3445_v5 }
 0xa7f   : > { %7294 = vmatmul.mubr.msk.bf16.vlgmr.msra.gmra.mrb[68].mxu1 %vm1602_vm0, %v3454_v43  ;;  %v3848_v47 = vpop.permute.xlu1 %3847  ;;  %v3915_v17 = vpop.permute.xlu0 %3914 }
 0xa80   : > { %7306 = vmatpush3.bf16.xpose.msra.mxu1 %v3791_v46  ;;  %7309 = vmatprep.mubr.msk.bf16.mxu1 %vm1602_vm0, %v3777_v1 }
 0xa81   : > { %7420 = vmatprep.subr.msk.bf16.mxu1 %vm1602_vm0, %v3783_v9 }
 0xa83   : > { %v3921_v0 = vpop.permute.xlu1 %3920 }
 0xa84   : > { %7318 = vmatmul.mubr.msk.bf16.vlgmr.msra.gmra.mrb[76].mxu0 %vm1602_vm0, %v3848_v47  ;;  %v3932_v62 = vsel %vm1602_vm0, %v3921_v0, 0 }
 0xa87   : > { %v3917_v11 = vpop.permute.xlu1 %3916 }
 0xa88   : > { %7308 = vmatpush3.bf16.xpose.msra.mxu1 %v3794_v44 }
 0xa89   : > { %7423 = vmatprep.subr.msk.bf16.mxu1 %vm1602_vm0, %v3919_v63 }
 0xa8f   : > { %7310 = vmatmul.mubr.msk.bf16.vlgmr.msra.gmra.mrb[72].mxu1 %vm1602_vm0, %v3779_v2 }
 0xa90   : > { %7322 = vmatpush3.bf16.xpose.msra.mxu1 %v3929_v19  ;;  %7325 = vmatprep.mubr.msk.bf16.mxu1 %vm1602_vm0, %v3915_v17 }
 0xa91   : > { %7424 = vmatprep.subr.msk.bf16.mxu1 %vm1602_vm0, %v3921_v0 }
 0xa98   : > { %7324 = vmatpush3.bf16.xpose.msra.mxu1 %v3932_v62 }
 0xa9f   : > { %7326 = vmatmul.mubr.msk.bf16.vlgmr.msra.gmra.mrb[76].mxu1 %vm1602_vm0, %v3917_v11 }
 0xaff   : > { %v10393_v25 = vpop.f32.mrb[64].mxu0 }
 0xb00   : > { %v10395_v51 = vpop.f32.mrb[65].mxu0 }
 0xb01   : > { %v10397_v58 = vpop.f32.mrb[66].mxu0 }
 0xb02   : > { %v3700_v21 = vpack.c.bf16 %v10397_v58, %v10393_v25  ;;  %v10401_v49 = vpop.f32.mrb[67].mxu0 }
 0xb03   : > { %v3699_v3 = vpack.c.bf16 %v10401_v49, %v10395_v51 }
 0xb09   : > { %v10405_v40 = vpop.f32.mrb[68].mxu0 }
 0xb0a   : > { %v10407_v41 = vpop.f32.mrb[69].mxu0 }
 0xb0b   : > { %v10409_v53 = vpop.f32.mrb[70].mxu0 }
 0xb0c   : > { %v3704_v59 = vpack.c.bf16 %v10409_v53, %v10405_v40  ;;  %v10413_v27 = vpop.f32.mrb[71].mxu0  ;;  %v11566_v53 = vld [vmem:[#allocation69_spill] sm:$0xff] }
 0xb16   : > { %v10417_v26 = vpop.f32.mrb[64].mxu1 }
 0xb17   : > { %v10419_v39 = vpop.f32.mrb[65].mxu1 }
 0xb18   : > { %v10421_v15 = vpop.f32.mrb[66].mxu1 }
 0xb19   : > { %v3702_v42 = vpack.c.bf16 %v10421_v15, %v10417_v26  ;;  %v10425_v7 = vpop.f32.mrb[67].mxu1  ;;  %v11562_v26 = vld [vmem:[#allocation66_spill] sm:$0xff]  ;;  %v11563_v15 = vld [vmem:[#allocation65_spill] sm:$0xff] }
 0xb1a   : > { %v3701_v48 = vpack.c.bf16 %v10425_v7, %v10419_v39  ;;  %v11564_v39 = vpack.c.bf16 %v11562_v26, %v11563_v15  ;;  %v11586_v15 = vld [vmem:[#allocation59_spill] sm:$0xff] }
 0xb1c   : > { %v10429_v22 = vpop.f32.mrb[72].mxu0 }
 0xb1d   : > { %v10431_v1 = vpop.f32.mrb[73].mxu0  ;;  %v3989_v12 = vsel %vm1602_vm0, %v10429_v22, -inf }
 0xb1e   : > { %3990 = vmax.xlane.f32.xlu0 %v3989_v12  ;;  %v10435_v45 = vpop.f32.mrb[74].mxu0  ;;  %v3983_v13 = vsel %vm1602_vm0, %v10431_v1, -inf }
 0xb1f   : > { %v10437_v6 = vpop.f32.mrb[75].mxu0  ;;  %v3992_v54 = vsel %vm1602_vm0, %v10435_v45, -inf }
 0xb20   : > { %v3986_v9 = vsel %vm1602_vm0, %v10437_v6, -inf }
 0xb21   : > { %3987 = vmax.xlane.f32.xlu1 %v3986_v9 }
 0xb22   : > { %3984 = vmax.xlane.f32.xlu0 %v3983_v13 }
 0xb26   : > { %3993 = vmax.xlane.f32.xlu0 %v3992_v54 }
 0xb52   : > { %v10445_v16 = vpop.f32.mrb[68].mxu1 }
 0xb53   : > { %v10447_v2 = vpop.f32.mrb[69].mxu1 }
 0xb54   : > { %v10449_v35 = vpop.f32.mrb[70].mxu1 }
 0xb55   : > { %v10453_v50 = vpop.f32.mrb[71].mxu1 }
 0xb57   : > { %v10457_v31 = vpop.f32.mrb[76].mxu0 }
 0xb58   : > { %v10459_v5 = vpop.f32.mrb[77].mxu0  ;;  %v4013_v20 = vsel %vm1602_vm0, %v10457_v31, -inf }
 0xb59   : > { %4014 = vmax.xlane.f32.xlu0 %v4013_v20  ;;  %v10463_v36 = vpop.f32.mrb[78].mxu0  ;;  %v4007_v46 = vsel %vm1602_vm0, %v10459_v5, -inf }
 0xb5a   : > { %v10465_v34 = vpop.f32.mrb[79].mxu0  ;;  %v4016_v43 = vsel %vm1602_vm0, %v10463_v36, -inf }
 0xb5b   : > { %4017 = vmax.xlane.f32.xlu1 %v4016_v43  ;;  %v4010_v47 = vsel %vm1602_vm0, %v10465_v34, -inf }
 0xb5d   : > { %4008 = vmax.xlane.f32.xlu0 %v4007_v46 }
 0xb5f   : > { %4011 = vmax.xlane.f32.xlu1 %v4010_v47 }
 0xb62   : > { %v10473_v44 = vpop.f32.mrb[72].mxu1 }
 0xb63   : > { %v10475_v63 = vpop.f32.mrb[73].mxu1  ;;  %v4001_v17 = vsel %vm1602_vm0, %v10473_v44, -inf }
 0xb64   : > { %v10479_v19 = vpop.f32.mrb[74].mxu1  ;;  %4002 = vmax.xlane.f32.xlu0 %v4001_v17  ;;  %v3995_v11 = vsel %vm1602_vm0, %v10475_v63, -inf }
 0xb65   : > { %v10481_v0 = vpop.f32.mrb[75].mxu1  ;;  %v4004_v62 = vsel %vm1602_vm0, %v10479_v19, -inf }
 0xb66   : > { %4005 = vmax.xlane.f32.xlu1 %v4004_v62  ;;  %v3998_v12 = vsel %vm1602_vm0, %v10481_v0, -inf }
 0xb68   : > { %3996 = vmax.xlane.f32.xlu0 %v3995_v11 }
 0xb6a   : > { %3999 = vmax.xlane.f32.xlu1 %v3998_v12 }
 0xb72   : > { %v10489_v9 = vpop.f32.mrb[76].mxu1 }
 0xb73   : > { %v10491_v13 = vpop.f32.mrb[77].mxu1  ;;  %v4025_v43 = vsel %vm1602_vm0, %v10489_v9, -inf }
 0xb74   : > { %v10493_v54 = vpop.f32.mrb[78].mxu1  ;;  %v4019_v47 = vsel %vm1602_vm0, %v10491_v13, -inf }
 0xb75   : > { %v10495_v20 = vpop.f32.mrb[79].mxu1  ;;  %v4028_v46 = vsel %vm1602_vm0, %v10493_v54, -inf }
 0xb76   : > { %v4022_v17 = vsel %vm1602_vm0, %v10495_v20, -inf }
 0xb7b   : > { %4169 = vrot.lane.b32.xlu1 %v9464_v61, %s8643_s22 }
 0xb7e   : > { %4167 = vrot.lane.b32.xlu0 %v9468_v4, %s8643_s22 }
 0xb9d   : > { %4026 = vmax.xlane.f32.xlu0 %v4025_v43 }
 0xb9f   : > { %4029 = vmax.xlane.f32.xlu1 %v4028_v46 }
 0xba1   : > { %4020 = vmax.xlane.f32.xlu0 %v4019_v47 }
 0xba3   : > { %4023 = vmax.xlane.f32.xlu1 %v4022_v17 }
 0xbab   : > { %v3991_v61 = vpop.xlane.xlu0 %3990 }
 0xbac   : > { %v4033_v11 = vsub.f32 %v10429_v22, %v3991_v61 }
 0xbae   : > { %v3988_v43 = vpop.xlane.xlu1 %3987  ;;  %v4051_v46 = vmul.f32 1.442695, %v4033_v11 }
 0xbaf   : > { %v3985_v4 = vpop.xlane.xlu0 %3984  ;;  %v4032_v60 = vsub.f32 %v10437_v6, %v3988_v43 }
 0xbb0   : > { %v4031_v47 = vsub.f32 %v10431_v1, %v3985_v4  ;;  %7919 = vpow2.f32 %v4051_v46 }
 0xbb1   : > { %v4049_v14 = vmul.f32 1.442695, %v4032_v60 }
 0xbb2   : > { %v4047_v52 = vmul.f32 1.442695, %v4031_v47 }
 0xbb3   : > { %v3994_v62 = vpop.xlane.xlu0 %3993 }
 0xbb4   : > { %4230 = vrot.lane.b32.xlu1 %v9488_v24, %s8643_s22  ;;  %v4034_v12 = vsub.f32 %v10435_v45, %v3994_v62 }
 0xbb6   : > { %v4053_v17 = vmul.f32 1.442695, %v4034_v12 }
 0xbb7   : > { %4228 = vrot.lane.b32.xlu0 %v9492_v32, %s8643_s22 }
 0xbb8   : > { %7921 = vpow2.f32 %v4053_v17 }
 0xbb9   : > { %7923 = vpow2.f32 %v4047_v52 }
 0xbba   : > { %7925 = vpow2.f32 %v4049_v14  ;;  %v10517_v24 = vpop.eup %7919 }
 0xbbb   : > { %v4085_v22 = vsel %vm1602_vm0, %v10517_v24, 0.0 }
 0xbc2   : > { %v10519_v32 = vpop.eup %7921 }
 0xbc3   : > { %v10523_v45 = vpop.eup %7923  ;;  %v4088_v1 = vsel %vm1602_vm0, %v10519_v32, 0.0 }
 0xbc4   : > { %v10527_v6 = vpop.eup %7925  ;;  %v4079_v52 = vsel %vm1602_vm0, %v10523_v45, 0.0 }
 0xbc5   : > { %v4082_v14 = vsel %vm1602_vm0, %v10527_v6, 0.0 }
 0xbd6   : > { %4086 = vadd.xlane.f32.xlu0 %v4085_v22 }
 0xbd8   : > { %4089 = vadd.xlane.f32.xlu1 %v4088_v1 }
 0xbda   : > { %4080 = vadd.xlane.f32.xlu0 %v4079_v52 }
 0xbdc   : > { %4083 = vadd.xlane.f32.xlu1 %v4082_v14 }
 0xbe6   : > { %v4015_v60 = vpop.xlane.xlu0 %4014 }
 0xbe7   : > { %v4041_v61 = vsub.f32 %v10457_v31, %v4015_v60 }
 0xbe8   : > { %v4018_v4 = vpop.xlane.xlu1 %4017 }
 0xbe9   : > { %v4067_v62 = vmul.f32 1.442695, %v4041_v61  ;;  %v4042_v11 = vsub.f32 %v10463_v36, %v4018_v4 }
 0xbea   : > { %v4009_v12 = vpop.xlane.xlu0 %4008 }
 0xbeb   : > { %7927 = vpow2.f32 %v4067_v62  ;;  %v4039_v43 = vsub.f32 %v10459_v5, %v4009_v12  ;;  %v4069_v47 = vmul.f32 1.442695, %v4042_v11 }
 0xbec   : > { %v4012_v46 = vpop.xlane.xlu1 %4011 }
 0xbed   : > { %v4063_v17 = vmul.f32 1.442695, %v4039_v43  ;;  %v4040_v22 = vsub.f32 %v10465_v34, %v4012_v46 }
 0xbef   : > { %7929 = vpow2.f32 %v4063_v17  ;;  %v4065_v14 = vmul.f32 1.442695, %v4040_v22 }
 0xbf0   : > { %7931 = vpow2.f32 %v4069_v47 }
 0xbf1   : > { %v4003_v1 = vpop.xlane.xlu0 %4002 }
 0xbf2   : > { %v4037_v52 = vsub.f32 %v10473_v44, %v4003_v1 }
 0xbf3   : > { %v4006_v31 = vpop.xlane.xlu1 %4005 }
 0xbf4   : > { %v4059_v60 = vmul.f32 1.442695, %v4037_v52  ;;  %v4038_v61 = vsub.f32 %v10479_v19, %v4006_v31 }
 0xbf5   : > { %v10539_v36 = vpop.eup %7927  ;;  %v3997_v4 = vpop.xlane.xlu0 %3996 }
 0xbf6   : > { %7933 = vpow2.f32 %v4059_v60  ;;  %v4061_v5 = vmul.f32 1.442695, %v4038_v61  ;;  %v4035_v62 = vsub.f32 %v10475_v63, %v3997_v4  ;;  %v4109_v11 = vsel %vm1602_vm0, %v10539_v36, 0.0 }
 0xbf7   : > { %7935 = vpow2.f32 %v4065_v14  ;;  %v4000_v34 = vpop.xlane.xlu1 %3999  ;;  %4110 = vadd.xlane.f32.xlu0 %v4109_v11 }
 0xbf8   : > { %7937 = vpow2.f32 %v4061_v5  ;;  %v4055_v44 = vmul.f32 1.442695, %v4035_v62  ;;  %v4036_v12 = vsub.f32 %v10481_v0, %v4000_v34 }
 0xbf9   : > { %v10545_v43 = vpop.eup %7929  ;;  %v4168_v19 = vpop.permute.xlu0 %4167 }
 0xbfa   : > { %v4057_v46 = vmul.f32 1.442695, %v4036_v12  ;;  %7329 = vmatprep.subr.bf16.mxu0 %v4168_v19  ;;  %v4103_v47 = vsel %vm1602_vm0, %v10545_v43, 0.0  ;;  %v10549_v17 = vpop.eup %7931  ;;  %7939 = vpow2.f32 %v4055_v44 }
 0xbfb   : > { %7330 = vmatpush3.bf16.msra.mxu0 %v4168_v19  ;;  %v4170_v63 = vpop.permute.xlu1 %4169  ;;  %4104 = vadd.xlane.f32.xlu1 %v4103_v47  ;;  %v4112_v22 = vsel %vm1602_vm0, %v10549_v17, 0.0 }
 0xbfc   : > { %7941 = vpow2.f32 %v4057_v46  ;;  %7331 = vmatprep.subr.bf16.mxu0 %v4170_v63 }
 0xbff   : > { %7332 = vmatpush3.bf16.msra.mxu0 %v4170_v63  ;;  %4113 = vadd.xlane.f32.xlu1 %v4112_v22 }
 0xc00   : > { %v10553_v0 = vpop.eup %7933 }
 0xc01   : > { %v10555_v1 = vpop.eup %7935  ;;  %v4097_v52 = vsel %vm1602_vm0, %v10553_v0, 0.0 }
 0xc02   : > { %v10559_v14 = vpop.eup %7937  ;;  %4098 = vadd.xlane.f32.xlu0 %v4097_v52  ;;  %v4106_v61 = vsel %vm1602_vm0, %v10555_v1, 0.0 }
 0xc03   : > { %v4100_v31 = vsel %vm1602_vm0, %v10559_v14, 0.0 }
 0xc04   : > { %4101 = vadd.xlane.f32.xlu1 %v4100_v31  ;;  %v10563_v60 = vpop.eup %7939 }
 0xc05   : > { %v4091_v62 = vsel %vm1602_vm0, %v10563_v60, 0.0 }
 0xc06   : > { %v10567_v4 = vpop.eup %7941  ;;  %4107 = vadd.xlane.f32.xlu0 %v4106_v61 }
 0xc07   : > { %v4094_v5 = vsel %vm1602_vm0, %v10567_v4, 0.0 }
 0xc08   : > { %4095 = vadd.xlane.f32.xlu1 %v4094_v5 }
 0xc0a   : > { %4092 = vadd.xlane.f32.xlu0 %v4091_v62 }
 0xc2a   : > { %v4027_v11 = vpop.xlane.xlu0 %4026 }
 0xc2b   : > { %v4045_v34 = vsub.f32 %v10489_v9, %v4027_v11 }
 0xc2c   : > { %v4030_v44 = vpop.xlane.xlu1 %4029 }
 0xc2d   : > { %v4075_v12 = vmul.f32 1.442695, %v4045_v34  ;;  %v4046_v19 = vsub.f32 %v10493_v54, %v4030_v44 }
 0xc2e   : > { %v4021_v46 = vpop.xlane.xlu0 %4020 }
 0xc2f   : > { %7943 = vpow2.f32 %v4075_v12  ;;  %v4043_v47 = vsub.f32 %v10491_v13, %v4021_v46  ;;  %v4077_v63 = vmul.f32 1.442695, %v4046_v19  ;;  %v11555_v19 = vpack.c.bf16 %v10117_v10, %v10111_v18 }
 0xc30   : > { %v4024_v22 = vpop.xlane.xlu1 %4023 }
 0xc31   : > { %v4071_v52 = vmul.f32 1.442695, %v4043_v47  ;;  %v4044_v31 = vsub.f32 %v10495_v20, %v4024_v22 }
 0xc32   : > { %v4229_v61 = vpop.permute.xlu0 %4228 }
 0xc33   : > { %7945 = vpow2.f32 %v4071_v52  ;;  %v4073_v5 = vmul.f32 1.442695, %v4044_v31  ;;  %7337 = vmatprep.subr.bf16.mxu1 %v4229_v61 }
 0xc34   : > { %7947 = vpow2.f32 %v4077_v63  ;;  %7338 = vmatpush3.bf16.msra.mxu1 %v4229_v61  ;;  %v4231_v9 = vpop.permute.xlu1 %4230 }
 0xc35   : > { %7949 = vpow2.f32 %v4073_v5  ;;  %7339 = vmatprep.subr.bf16.mxu1 %v4231_v9 }
 0xc38   : > { %7340 = vmatpush3.bf16.msra.mxu1 %v4231_v9 }
 0xc39   : > { %v10577_v54 = vpop.eup %7943 }
 0xc3a   : > { %v4121_v13 = vsel %vm1602_vm0, %v10577_v54, 0.0 }
 0xc3b   : > { %4122 = vadd.xlane.f32.xlu0 %v4121_v13 }
 0xc3d   : > { %v10581_v62 = vpop.eup %7945 }
 0xc3e   : > { %v10583_v11 = vpop.eup %7947  ;;  %v4115_v20 = vsel %vm1602_vm0, %v10581_v62, 0.0 }
 0xc3f   : > { %v10587_v34 = vpop.eup %7949  ;;  %4116 = vadd.xlane.f32.xlu1 %v4115_v20  ;;  %v4124_v12 = vsel %vm1602_vm0, %v10583_v11, 0.0 }
 0xc40   : > { %v4118_v44 = vsel %vm1602_vm0, %v10587_v34, 0.0 }
 0xc41   : > { %4119 = vadd.xlane.f32.xlu0 %v4118_v44 }
 0xc43   : > { %4125 = vadd.xlane.f32.xlu1 %v4124_v12 }
 0xc54   : > { %4291 = vrot.lane.b32.xlu1 %v9512_v55, %s8643_s22  ;;  %v11556_v55 = vpack.c.bf16 %v10113_v37, %v10109_v30 }
 0xc57   : > { %4289 = vrot.lane.b32.xlu0 %v9516_v56, %s8643_s22 }
 0xc58   : > { %4350 = vrot.lane.b32.xlu1 %v9544_v23, %s8643_s22 }
 0xc5b   : > { %4427 = vrot.lane.b32.xlu0 %v11555_v19, %s8643_s22 }
 0xc5c   : > { %4352 = vrot.lane.b32.xlu1 %v9539_v33, %s8643_s22 }
 0xc5f   : > { %4451 = vrot.lane.b32.xlu0 %v3699_v3, %s8642_s19 }
 0xc60   : > { %4429 = vrot.lane.b32.xlu1 %v11556_v55, %s8643_s22 }
 0xc63   : > { %v4087_v56 = vpop.xlane.xlu0 %4086 }
 0xc64   : > { %4453 = vrot.lane.b32.xlu1 %v3700_v21, %s8642_s19 }
 0xc65   : > { %v4090_v23 = vpop.xlane.xlu1 %4089 }
 0xc66   : > { %7951 = vrcp.f32 %v4090_v23 }
 0xc67   : > { %v4081_v18 = vpop.xlane.xlu0 %4080 }
 0xc68   : > { %7953 = vrcp.f32 %v4081_v18 }
 0xc69   : > { %7955 = vrcp.f32 %v4087_v56  ;;  %v4084_v33 = vpop.xlane.xlu1 %4083 }
 0xc6a   : > { %7957 = vrcp.f32 %v4084_v33 }
 0xc70   : > { %v7952_v10 = vpop.eup %7951 }
 0xc71   : > { %v4146_v30 = vmul.f32 %v7952_v10, %v10519_v32 }
 0xc72   : > { %v7954_v51 = vpop.eup %7953 }
 0xc73   : > { %v7956_v49 = vpop.eup %7955  ;;  %v4143_v37 = vmul.f32 %v7954_v51, %v10523_v45 }
 0xc74   : > { %v7958_v3 = vpop.eup %7957  ;;  %v4145_v25 = vmul.f32 %v7956_v49, %v10517_v24 }
 0xc75   : > { %v4144_v46 = vmul.f32 %v7958_v3, %v10527_v6 }
 0xc76   : > { %v4160_v21 = vpack.c.bf16 %v4146_v30, %v4145_v25 }
 0xc77   : > { %v4159_v58 = vpack.c.bf16 %v4144_v46, %v4143_v37 }
 0xc79   : > { %7333 = vmatprep.mubr.msk.bf16.mxu0 %vm1602_vm0, %v4159_v58 }
 0xc7a   : > { %7334 = vmatmul.mubr.msk.bf16.vlgmr.msra.gmra.mrb[80].mxu0 %vm1602_vm0, %v4160_v21 }
 0xc84   : > { %v4111_v63 = vpop.xlane.xlu0 %4110 }
 0xc88   : > { %v4105_v47 = vpop.xlane.xlu1 %4104 }
 0xc89   : > { %7959 = vrcp.f32 %v4105_v47 }
 0xc8c   : > { %v4114_v22 = vpop.xlane.xlu1 %4113 }
 0xc8f   : > { %v4099_v52 = vpop.xlane.xlu0 %4098 }
 0xc91   : > { %v4102_v31 = vpop.xlane.xlu1 %4101 }
 0xc93   : > { %v4108_v61 = vpop.xlane.xlu0 %4107  ;;  %v7960_v24 = vpop.eup %7959 }
 0xc94   : > { %7961 = vrcp.f32 %v4108_v61  ;;  %v4151_v9 = vmul.f32 %v7960_v24, %v10545_v43  ;;  %v7612_v24 = vld [vmem:[%s9206_s26 + $0x28] sm:$0xff]  }
 0xc95   : > { %7963 = vrcp.f32 %v4102_v31  ;;  %v4096_v32 = vpop.xlane.xlu1 %4095 }
 0xc96   : > { %7965 = vrcp.f32 %v4096_v32  ;;  %v7608_v32 = vld [vmem:[%s9206_s26 + $0x8] sm:$0xff]  }
 0xc97   : > { %7967 = vrcp.f32 %v4099_v52  ;;  %v4093_v45 = vpop.xlane.xlu0 %4092 }
 0xc98   : > { %7969 = vrcp.f32 %v4093_v45  ;;  %v7611_v45 = vld [vmem:[%s9206_s26 + $0x20] sm:$0xff]  }
 0xc99   : > { %7971 = vrcp.f32 %v4114_v22 }
 0xc9a   : > { %7973 = vrcp.f32 %v4111_v63 }
 0xc9e   : > { %v7962_v6 = vpop.eup %7961 }
 0xc9f   : > { %v7964_v5 = vpop.eup %7963  ;;  %v4152_v13 = vmul.f32 %v7962_v6, %v10555_v1  ;;  %v7613_v6 = vld [vmem:[%s9206_s26 + $0x30] sm:$0xff]  }
 0xca0   : > { %v7966_v20 = vpop.eup %7965  ;;  %v4150_v55 = vmul.f32 %v7964_v5, %v10559_v14  ;;  %v7614_v5 = vld [vmem:[%s9206_s26 + $0x38] sm:$0xff]  }
 0xca1   : > { %v7968_v44 = vpop.eup %7967  ;;  %v4163_v12 = vpack.c.bf16 %v4152_v13, %v4151_v9  ;;  %v4148_v23 = vmul.f32 %v7966_v20, %v10567_v4 }
 0xca2   : > { %v7970_v19 = vpop.eup %7969  ;;  %v4149_v18 = vmul.f32 %v7968_v44, %v10553_v0 }
 0xca3   : > { %7349 = vmatprep.mubr.msk.bf16.mxu0 %vm1602_vm0, %v4163_v12  ;;  %v4147_v56 = vmul.f32 %v7970_v19, %v10563_v60  ;;  %v7972_v60 = vpop.eup %7971 }
 0xca4   : > { %v4162_v10 = vpack.c.bf16 %v4150_v55, %v4149_v18  ;;  %v7974_v0 = vpop.eup %7973  ;;  %v4154_v3 = vmul.f32 %v7972_v60, %v10549_v17  ;;  %v11558_v55 = vpack.c.bf16 %v10143_v28, %v10133_v29 }
 0xca5   : > { %v4161_v33 = vpack.c.bf16 %v4148_v23, %v4147_v56  ;;  %v4153_v37 = vmul.f32 %v7974_v0, %v10539_v36  ;;  %v11559_v56 = vpack.c.bf16 %v10149_v38, %v10137_v57  ;;  %v11560_v57 = vld [vmem:[#allocation64_spill] sm:$0xff] }
 0xca6   : > { %v11561_v38 = vpack.c.bf16 %v10125_v8, %v11560_v57 }
 0xca7   : > { %7341 = vmatprep.mubr.msk.bf16.mxu1 %vm1602_vm0, %v4161_v33  ;;  %v4164_v21 = vpack.c.bf16 %v4154_v3, %v4153_v37  ;;  %v11570_v3 = vld [vmem:[#allocation68_spill] sm:$0xff] }
 0xca8   : > { %7342 = vmatmul.mubr.msk.bf16.vlgmr.msra.gmra.mrb[80].mxu1 %vm1602_vm0, %v4162_v10 }
 0xcc8   : > { %v4123_v43 = vpop.xlane.xlu0 %4122 }
 0xccc   : > { %v4117_v1 = vpop.xlane.xlu1 %4116 }
 0xccd   : > { %7975 = vrcp.f32 %v4117_v1 }
 0xcce   : > { %7977 = vrcp.f32 %v4123_v43  ;;  %v4120_v14 = vpop.xlane.xlu0 %4119 }
 0xccf   : > { %7979 = vrcp.f32 %v4120_v14 }
 0xcd0   : > { %v4126_v51 = vpop.xlane.xlu1 %4125 }
 0xcd1   : > { %7981 = vrcp.f32 %v4126_v51 }
 0xcd2   : > { %v4290_v4 = vpop.permute.xlu0 %4289 }
 0xcd3   : > { %7345 = vmatprep.subr.bf16.mxu0 %v4290_v4 }
 0xcd4   : > { %7346 = vmatpush3.bf16.msra.mxu0 %v4290_v4  ;;  %v4292_v49 = vpop.permute.xlu1 %4291 }
 0xcd5   : > { %7347 = vmatprep.subr.bf16.mxu0 %v4292_v49 }
 0xcd7   : > { %v7976_v30 = vpop.eup %7975 }
 0xcd8   : > { %v7978_v46 = vpop.eup %7977  ;;  %7348 = vmatpush3.bf16.msra.mxu0 %v4292_v49  ;;  %v4351_v25 = vpop.permute.xlu1 %4350  ;;  %v4155_v47 = vmul.f32 %v7976_v30, %v10581_v62  ;;  %v11557_v62 = vmov 0   ;;  %v11569_v49 = vld [vmem:[#allocation70_spill] sm:$0xff] }
 0xcd9   : > { %v7980_v58 = vpop.eup %7979  ;;  %7353 = vmatprep.subr.bf16.mxu1 %v4351_v25  ;;  %v4157_v17 = vmul.f32 %v7978_v46, %v10577_v54  ;;  %v7609_v54 = vld [vmem:[%s9206_s26 + $0x10] sm:$0xff]   ;;  %v11571_v30 = vpack.c.bf16 %v11569_v49, %v11570_v3  ;;  %v4428_v46 = vpop.permute.xlu0 %4427  ;;  %v11592_v49 = vld [vmem:[#allocation63_spill] sm:$0xff]  ;;  %v11593_v3 = vld [vmem:[#allocation61_spill] sm:$0xff] }
 0xcda   : > { %7354 = vmatpush3.bf16.msra.mxu1 %v4351_v25  ;;  %v4156_v63 = vmul.f32 %v7980_v58, %v10587_v34  ;;  %v7607_v34 = vld [vmem:[%s9206_s26] sm:$0xff]   ;;  %v11572_v25 = vpack.c.bf16 %v10449_v35, %v10445_v16  ;;  %v11573_v58 = vpack.c.bf16 %v10453_v50, %v10447_v2 }
 0xcdb   : > { %v7982_v22 = vpop.eup %7981  ;;  %7350 = vmatmul.mubr.msk.bf16.vlgmr.msra.gmra.mrb[84].mxu0 %vm1602_vm0, %v4164_v21  ;;  %7361 = vmatprep.subr.bf16.mxu0 %v7607_v34 }
 0xcdc   : > { %v4158_v36 = vmul.f32 %v7982_v22, %v10583_v11  ;;  %v4353_v52 = vpop.permute.xlu1 %4352  ;;  %v4165_v31 = vpack.c.bf16 %v4156_v63, %v4155_v47  ;;  %7362 = vmatpush3.bf16.msra.mxu0 %v7607_v34  ;;  %v7610_v11 = vld [vmem:[%s9206_s26 + $0x18] sm:$0xff]   ;;  %v11574_v63 = vld [vmem:[#allocation51_spill] sm:$0xff] }
 0xcdd   : > { %7355 = vmatprep.subr.bf16.mxu1 %v4353_v52  ;;  %7363 = vmatprep.subr.bf16.mxu0 %v7608_v32  ;;  %v4452_v47 = vpop.permute.xlu0 %4451  ;;  %v11575_v22 = vld [vmem:[#allocation49_spill] sm:$0xff] }
 0xcde   : > { %7356 = vmatpush3.bf16.msra.mxu1 %v4353_v52  ;;  %7357 = vmatprep.mubr.msk.bf16.mxu1 %vm1602_vm0, %v4165_v31  ;;  %v4166_v61 = vpack.c.bf16 %v4158_v36, %v4157_v17  ;;  %v11576_v17 = vpack.c.bf16 %v11574_v63, %v11575_v22  ;;  %v11577_v52 = vld [vmem:[#allocation50_spill] sm:$0xff]  ;;  %v11578_v31 = vld [vmem:[#allocation48_spill] sm:$0xff] }
 0xcdf   : > { %v11579_v2 = vpack.c.bf16 %v11577_v52, %v11578_v31 }
 0xce0   : > { %7364 = vmatpush3.bf16.msra.mxu0 %v7608_v32  ;;  %v4430_v37 = vpop.permute.xlu1 %4429  ;;  %v4493_v36 = vsel %vm1602_vm0, %v11576_v17, %v4428_v46 }
 0xce1   : > { %7358 = vmatmul.mubr.msk.bf16.vlgmr.msra.gmra.mrb[84].mxu1 %vm1602_vm0, %v4166_v61  ;;  %7365 = vmatprep.subr.bf16.mxu0 %v7609_v54  ;;  %v4517_v35 = vsel %vm4515_vm1, %v4493_v36, %v4452_v47  ;;  %v4496_v50 = vsel %vm1602_vm0, %v11579_v2, %v4430_v37 }
 0xce2   : > { %5265 = vmatprep.mubr.bf16.mxu1 %v11557_v62 }
 0xce4   : > { %7366 = vmatpush3.bf16.msra.mxu0 %v7609_v54  ;;  %v4454_v21 = vpop.permute.xlu1 %4453 }
 0xce5   : > { %7367 = vmatprep.subr.bf16.mxu0 %v7610_v11  ;;  %v4519_v34 = vsel %vm4515_vm1, %v4496_v50, %v4454_v21 }
 0xce8   : > { %7368 = vmatpush3.bf16.msra.mxu0 %v7610_v11 }
 0xce9   : > { %7369 = vmatprep.subr.bf16.mxu0 %v7611_v45 }
 0xcec   : > { %7370 = vmatpush3.bf16.msra.mxu0 %v7611_v45 }
 0xced   : > { %7371 = vmatprep.subr.bf16.mxu0 %v7612_v24 }
 0xcf0   : > { %7372 = vmatpush3.bf16.msra.mxu0 %v7612_v24 }
 0xcf1   : > { %7373 = vmatprep.subr.bf16.mxu0 %v7613_v6 }
 0xcf4   : > { %7374 = vmatpush3.bf16.msra.mxu0 %v7613_v6 }
 0xcf5   : > { %7375 = vmatprep.subr.bf16.mxu0 %v7614_v5 }
 0xcf8   : > { %7376 = vmatpush3.bf16.msra.mxu0 %v7614_v5  ;;  %v11580_v5 = vld [vmem:[#allocation55_spill] sm:$0xff] }
 0xd4d   : > { %v7335_v9 = vpop.f32.mrb[80].mxu0 }
 0xd4e   : > { %v4213_v13 = vpop.f32.mrb[81].mxu0 }
 0xd4f   : > { %v7336_v20 = vpop.f32.mrb[82].mxu0 }
 0xd50   : > { %v4412_v44 = vpack.c.bf16 %v7336_v20, %v7335_v9  ;;  %v4216_v12 = vpop.f32.mrb[83].mxu0  ;;  %v11581_v9 = vld [vmem:[#allocation53_spill] sm:$0xff] }
 0xd51   : > { %v4411_v19 = vpack.c.bf16 %v4216_v12, %v4213_v13  ;;  %v11582_v13 = vpack.c.bf16 %v11580_v5, %v11581_v9  ;;  %v11583_v12 = vld [vmem:[#allocation54_spill] sm:$0xff]  ;;  %v11600_v5 = vld [vmem:[#allocation35_spill] sm:$0xff] }
 0xd52   : > { %4477 = vrot.lane.b32.xlu1 %v4412_v44, %s8641_s27 }
 0xd53   : > { %4475 = vrot.lane.b32.xlu0 %v4411_v19, %s8641_s27  ;;  %v11584_v19 = vld [vmem:[#allocation52_spill] sm:$0xff] }
 0xd56   : > { %4433 = vrot.lane.b32.xlu1 %v11558_v55, %s8643_s22  ;;  %v11585_v55 = vpack.c.bf16 %v11583_v12, %v11584_v19  ;;  %v11601_v12 = vld [vmem:[#allocation34_spill] sm:$0xff] }
 0xd57   : > { %4431 = vrot.lane.b32.xlu0 %v11559_v56, %s8643_s22 }
 0xd5a   : > { %4457 = vrot.lane.b32.xlu1 %v3702_v42, %s8642_s19  ;;  %v11565_v42 = vpack.c.bf16 %v10413_v27, %v10407_v41 }
 0xd5b   : > { %4455 = vrot.lane.b32.xlu0 %v3701_v48, %s8642_s19 }
 0xd7b   : > { %v7343_v23 = vpop.f32.mrb[80].mxu1 }
 0xd7c   : > { %v4274_v18 = vpop.f32.mrb[81].mxu1 }
 0xd7d   : > { %v7344_v33 = vpop.f32.mrb[82].mxu1 }
 0xd7e   : > { %v4414_v29 = vpack.c.bf16 %v7344_v33, %v7343_v23  ;;  %v4277_v28 = vpop.f32.mrb[83].mxu1 }
 0xd7f   : > { %v4413_v10 = vpack.c.bf16 %v4277_v28, %v4274_v18 }
 0xd80   : > { %4481 = vrot.lane.b32.xlu1 %v4414_v29, %s8641_s27 }
 0xd81   : > { %4479 = vrot.lane.b32.xlu0 %v4413_v10, %s8641_s27 }
 0xd84   : > { %4437 = vrot.lane.b32.xlu1 %v11561_v38, %s8643_s22 }
 0xd85   : > { %4435 = vrot.lane.b32.xlu0 %v11564_v39, %s8643_s22  ;;  %v11587_v39 = vld [vmem:[#allocation57_spill] sm:$0xff] }
 0xd88   : > { %4461 = vrot.lane.b32.xlu1 %v3704_v59, %s8642_s19  ;;  %v11567_v59 = vld [vmem:[#allocation67_spill] sm:$0xff] }
 0xd89   : > { %4459 = vrot.lane.b32.xlu0 %v11565_v42, %s8642_s19  ;;  %v11568_v0 = vpack.c.bf16 %v11566_v53, %v11567_v59  ;;  %v11588_v42 = vpack.c.bf16 %v11586_v15, %v11587_v39  ;;  %v7627_v15 = vld [vmem:[%s9211_s20 + $0x40] ss:$16 sps:$4 sm:$0xff]   ;;  %v7630_v39 = vld [vmem:[%s9211_s20 + $0x48] ss:$16 sps:$4 sm:$0xff]  }
 0xdae   : > { %v7351_v7 = vpop.f32.mrb[84].mxu0 }
 0xdaf   : > { %v4335_v48 = vpop.f32.mrb[85].mxu0 }
 0xdb0   : > { %v7352_v43 = vpop.f32.mrb[86].mxu0 }
 0xdb1   : > { %v4416_v8 = vpack.c.bf16 %v7352_v43, %v7351_v7  ;;  %v4338_v1 = vpop.f32.mrb[87].mxu0  ;;  %v11589_v43 = vld [vmem:[#allocation58_spill] sm:$0xff] }
 0xdb2   : > { %v4415_v14 = vpack.c.bf16 %v4338_v1, %v4335_v48 }
 0xdb3   : > { %4485 = vrot.lane.b32.xlu1 %v4416_v8, %s8641_s27  ;;  %v11590_v8 = vld [vmem:[#allocation56_spill] sm:$0xff] }
 0xdb4   : > { %4483 = vrot.lane.b32.xlu0 %v4415_v14, %s8641_s27  ;;  %v7359_v51 = vpop.f32.mrb[84].mxu1  ;;  %v11591_v1 = vpack.c.bf16 %v11589_v43, %v11590_v8  ;;  %v7636_v43 = vld [vmem:[%s9211_s20 + $0x68] ss:$16 sps:$4 sm:$0xff]   ;;  %v7641_v8 = vld [vmem:[%s9211_s20 + $0x84] ss:$16 sps:$4 sm:$0xff]  }
 0xdb5   : > { %v4396_v60 = vpop.f32.mrb[85].mxu1 }
 0xdb6   : > { %v7360_v4 = vpop.f32.mrb[86].mxu1 }
 0xdb7   : > { %v4418_v40 = vpack.c.bf16 %v7360_v4, %v7359_v51  ;;  %4441 = vrot.lane.b32.xlu1 %v11568_v0, %s8643_s22  ;;  %v4399_v41 = vpop.f32.mrb[87].mxu1 }
 0xdb8   : > { %v4417_v27 = vpack.c.bf16 %v4399_v41, %v4396_v60  ;;  %4439 = vrot.lane.b32.xlu0 %v11571_v30, %s8643_s22  ;;  %v11594_v30 = vpack.c.bf16 %v11592_v49, %v11593_v3  ;;  %v7659_v49 = vld [vmem:[%s9211_s20 + $0xe4] ss:$16 sps:$4 sm:$0xff]  }
 0xdbb   : > { %4465 = vrot.lane.b32.xlu1 %v11572_v25, %s8642_s19  ;;  %v11595_v25 = vld [vmem:[#allocation62_spill] sm:$0xff] }
 0xdbc   : > { %4463 = vrot.lane.b32.xlu0 %v11573_v58, %s8642_s19  ;;  %v11596_v58 = vld [vmem:[#allocation60_spill] sm:$0xff] }
 0xdbd   : > { %v11597_v21 = vpack.c.bf16 %v11595_v25, %v11596_v58  ;;  %v7657_v58 = vld [vmem:[%s9211_s20 + $0xe0] ss:$16 sps:$4 sm:$0xff]  }
 0xdbf   : > { %4489 = vrot.lane.b32.xlu1 %v4418_v40, %s8641_s27 }
 0xdc0   : > { %4487 = vrot.lane.b32.xlu0 %v4417_v27, %s8641_s27 }
 0xdc4   : > { %v4478_v16 = vpop.permute.xlu1 %4477 }
 0xdc5   : > { %v4476_v61 = vpop.permute.xlu0 %4475  ;;  %v4537_v54 = vsel %vm4532_vm2, %v4519_v34, %v4478_v16  ;;  %v11598_v34 = vld [vmem:[#allocation32_spill] sm:$0xff] }
 0xdc6   : > { %v4534_v32 = vsel %vm4532_vm2, %v4517_v35, %v4476_v61  ;;  %v10757_v35 = vld [vmem:[%s708_s2] ss:$0 sm:$0xff] }
 0xdc7   : > { %7377 = vmatprep.mubr.bf16.mxu0 %v4534_v32 }
 0xdc8   : > { %7378 = vmatmul.mubr.bf16.vlgmr.msra.gmra.mrb[88].mxu0 %v4537_v54  ;;  %v4434_v11 = vpop.permute.xlu1 %4433 }
 0xdc9   : > { %v4432_v45 = vpop.permute.xlu0 %4431  ;;  %v4502_v56 = vsel %vm1602_vm0, %v11585_v55, %v4434_v11 }
 0xdca   : > { %v4499_v20 = vsel %vm1602_vm0, %v11582_v13, %v4432_v45  ;;  %v11599_v45 = vld [vmem:[#allocation33_spill] sm:$0xff] }
 0xdcc   : > { %v4458_v24 = vpop.permute.xlu1 %4457 }
 0xdcd   : > { %v4456_v6 = vpop.permute.xlu0 %4455  ;;  %v4523_v33 = vsel %vm4515_vm1, %v4502_v56, %v4458_v24  ;;  %v7617_v56 = vld [vmem:[%s9211_s20 + $0x4] ss:$16 sps:$4 sm:$0xff]  }
 0xdce   : > { %v4521_v23 = vsel %vm4515_vm1, %v4499_v20, %v4456_v6  ;;  %5233 = vmatprep.subr.bf16.mxu1 %v7617_v56 }
 0xdf2   : > { %v4482_v44 = vpop.permute.xlu1 %4481 }
 0xdf3   : > { %v4480_v18 = vpop.permute.xlu0 %4479  ;;  %v4543_v28 = vsel %vm4532_vm2, %v4523_v33, %v4482_v44  ;;  %v7618_v33 = vld [vmem:[%s9211_s20 + $0x8] ss:$16 sps:$4 sm:$0xff]  }
 0xdf4   : > { %v4540_v29 = vsel %vm4532_vm2, %v4521_v23, %v4480_v18  ;;  %v7620_v23 = vld [vmem:[%s9211_s20 + $0xc] ss:$16 sps:$4 sm:$0xff]   ;;  %v7615_v18 = vld [vmem:[%s9211_s20] ss:$16 sps:$4 sm:$0xff]  }
 0xdf5   : > { %7381 = vmatprep.mubr.bf16.mxu0 %v4540_v29  ;;  %5346 = vmatprep.subr.bf16.mxu0 %v7620_v23  ;;  %v7623_v29 = vld [vmem:[%s9211_s20 + $0x24] ss:$16 sps:$4 sm:$0xff]  }
 0xdf6   : > { %7382 = vmatmul.mubr.bf16.gmra.mrb[92].mxu0 %v4543_v28  ;;  %v4438_v10 = vpop.permute.xlu1 %4437  ;;  %5234 = vmatpush1.bf16.msra.mxu1 %v7615_v18  ;;  %v7626_v28 = vld [vmem:[%s9211_s20 + $0x2c] ss:$16 sps:$4 sm:$0xff]   ;;  %v11608_v18 = vld [vmem:[#allocation41_spill] sm:$0xff] }
 0xdf7   : > { %v4436_v57 = vpop.permute.xlu0 %4435  ;;  %v4508_v14 = vsel %vm1602_vm0, %v11591_v1, %v4438_v10  ;;  %5347 = vmatpush1.bf16.msra.mxu0 %v7618_v33  ;;  %v7621_v10 = vld [vmem:[%s9211_s20 + $0x20] ss:$16 sps:$4 sm:$0xff]   ;;  %5235 = vmatprep.subr.bf16.mxu1 %v7623_v29  ;;  %v7644_v1 = vld [vmem:[%s9211_s20 + $0x8c] ss:$16 sps:$4 sm:$0xff]  }
 0xdf8   : > { %v4505_v7 = vsel %vm1602_vm0, %v11588_v42, %v4436_v57  ;;  %v7624_v57 = vld [vmem:[%s9211_s20 + $0x28] ss:$16 sps:$4 sm:$0xff]   ;;  %5348 = vmatprep.subr.bf16.mxu0 %v7626_v28  ;;  %v7635_v42 = vld [vmem:[%s9211_s20 + $0x64] ss:$16 sps:$4 sm:$0xff]  }
 0xdfa   : > { %v4462_v38 = vpop.permute.xlu1 %4461  ;;  %5236 = vmatpush1.bf16.msra.mxu1 %v7621_v10 }
 0xdfb   : > { %v4460_v26 = vpop.permute.xlu0 %4459  ;;  %v4527_v4 = vsel %vm4515_vm1, %v4508_v14, %v4462_v38  ;;  %5349 = vmatpush1.bf16.msra.mxu0 %v7624_v57  ;;  %v7629_v38 = vld [vmem:[%s9211_s20 + $0x44] ss:$16 sps:$4 sm:$0xff]   ;;  %v7639_v14 = vld [vmem:[%s9211_s20 + $0x80] ss:$16 sps:$4 sm:$0xff]  }
 0xdfc   : > { %v4525_v51 = vsel %vm4515_vm1, %v4505_v7, %v4460_v26  ;;  %v7632_v26 = vld [vmem:[%s9211_s20 + $0x4c] ss:$16 sps:$4 sm:$0xff]   ;;  %5237 = vmatprep.subr.bf16.mxu1 %v7629_v38 }
 0xdfd   : > { %5350 = vmatprep.subr.bf16.mxu0 %v7632_v26  ;;  %v7638_v7 = vld [vmem:[%s9211_s20 + $0x6c] ss:$16 sps:$4 sm:$0xff]  }
 0xdfe   : > { %5238 = vmatpush1.bf16.msra.mxu1 %v7627_v15  ;;  %v11610_v38 = vld [vmem:[#allocation42_spill] sm:$0xff] }
 0xdff   : > { %5351 = vmatpush1.bf16.msra.mxu0 %v7630_v39  ;;  %5239 = vmatprep.subr.bf16.mxu1 %v7635_v42  ;;  %v11612_v42 = vld [vmem:[#allocation43_spill] sm:$0xff] }
 0xe00   : > { %5352 = vmatprep.subr.bf16.mxu0 %v7638_v7 }
 0xe03   : > { %5353 = vmatpush1.bf16.msra.mxu0 %v7636_v43 }
 0xe04   : > { %5354 = vmatprep.subr.bf16.mxu0 %v7644_v1 }
 0xe25   : > { %v4486_v48 = vpop.permute.xlu1 %4485 }
 0xe26   : > { %v4484_v60 = vpop.permute.xlu0 %4483  ;;  %v4549_v53 = vsel %vm4532_vm2, %v4527_v4, %v4486_v48  ;;  %v7633_v48 = vld [vmem:[%s9211_s20 + $0x60] ss:$16 sps:$4 sm:$0xff]   ;;  %v7650_v4 = vld [vmem:[%s9211_s20 + $0xac] ss:$16 sps:$4 sm:$0xff]  }
 0xe27   : > { %v4546_v40 = vsel %vm4532_vm2, %v4525_v51, %v4484_v60  ;;  %5240 = vmatpush1.bf16.msra.mxu1 %v7633_v48  ;;  %v7642_v51 = vld [vmem:[%s9211_s20 + $0x88] ss:$16 sps:$4 sm:$0xff]   ;;  %v7647_v60 = vld [vmem:[%s9211_s20 + $0xa4] ss:$16 sps:$4 sm:$0xff]  }
 0xe28   : > { %7385 = vmatprep.mubr.bf16.mxu0 %v4546_v40  ;;  %5241 = vmatprep.subr.bf16.mxu1 %v7641_v8  ;;  %v7645_v40 = vld [vmem:[%s9211_s20 + $0xa0] ss:$16 sps:$4 sm:$0xff]  }
 0xe29   : > { %7386 = vmatmul.mubr.bf16.gmra.mrb[96].mxu0 %v4549_v53  ;;  %v4442_v59 = vpop.permute.xlu1 %4441  ;;  %v7648_v53 = vld [vmem:[%s9211_s20 + $0xa8] ss:$16 sps:$4 sm:$0xff]  }
 0xe2a   : > { %v4440_v0 = vpop.permute.xlu0 %4439  ;;  %v4514_v47 = vsel %vm1602_vm0, %v11597_v21, %v4442_v59  ;;  %5355 = vmatpush1.bf16.msra.mxu0 %v7642_v51  ;;  %v7651_v59 = vld [vmem:[%s9211_s20 + $0xc0] ss:$16 sps:$4 sm:$0xff]  }
 0xe2b   : > { %v4511_v37 = vsel %vm1602_vm0, %v11594_v30, %v4440_v0  ;;  %5242 = vmatpush1.bf16.msra.mxu1 %v7639_v14  ;;  %5356 = vmatprep.subr.bf16.mxu0 %v7650_v4  ;;  %v7653_v0 = vld [vmem:[%s9211_s20 + $0xc4] ss:$16 sps:$4 sm:$0xff]   ;;  %v7662_v30 = vld [vmem:[%s9211_s20 + $0xec] ss:$16 sps:$4 sm:$0xff]  }
 0xe2c   : > { %5243 = vmatprep.subr.bf16.mxu1 %v7647_v60  ;;  %v11614_v60 = vld [vmem:[#allocation44_spill] sm:$0xff] }
 0xe2d   : > { %v4466_v41 = vpop.permute.xlu1 %4465 }
 0xe2e   : > { %v4464_v27 = vpop.permute.xlu0 %4463  ;;  %v4531_v17 = vsel %vm4515_vm1, %v4514_v47, %v4466_v41  ;;  %5357 = vmatpush1.bf16.msra.mxu0 %v7648_v53  ;;  %v7654_v41 = vld [vmem:[%s9211_s20 + $0xc8] ss:$16 sps:$4 sm:$0xff]  }
 0xe2f   : > { %v4529_v63 = vsel %vm4515_vm1, %v4511_v37, %v4464_v27  ;;  %5244 = vmatpush1.bf16.msra.mxu1 %v7645_v40  ;;  %v7656_v27 = vld [vmem:[%s9211_s20 + $0xcc] ss:$16 sps:$4 sm:$0xff]   ;;  %v7660_v47 = vld [vmem:[%s9211_s20 + $0xe8] ss:$16 sps:$4 sm:$0xff]  }
 0xe30   : > { %5245 = vmatprep.subr.bf16.mxu1 %v7653_v0  ;;  %5358 = vmatprep.subr.bf16.mxu0 %v7656_v27  ;;  %v11616_v40 = vld [vmem:[#allocation45_spill] sm:$0xff] }
 0xe31   : > { %v4490_v46 = vpop.permute.xlu1 %4489 }
 0xe32   : > { %v4488_v22 = vpop.permute.xlu0 %4487  ;;  %v4555_v16 = vsel %vm4532_vm2, %v4531_v17, %v4490_v46  ;;  %5359 = vmatpush1.bf16.msra.mxu0 %v7654_v41 }
 0xe33   : > { %v4552_v36 = vsel %vm4532_vm2, %v4529_v63, %v4488_v22  ;;  %5246 = vmatpush1.bf16.msra.mxu1 %v7651_v59  ;;  %5360 = vmatprep.subr.bf16.mxu0 %v7662_v30  ;;  %v11602_v63 = vld [vmem:[#allocation36_spill] sm:$0xff]  ;;  %v11620_v30 = vld [vmem:[#allocation47_spill] sm:$0xff] }
 0xe34   : > { %7389 = vmatprep.mubr.bf16.mxu0 %v4552_v36  ;;  %5247 = vmatprep.subr.bf16.mxu1 %v7659_v49  ;;  %v11603_v36 = vld [vmem:[#allocation37_spill] sm:$0xff]  ;;  %v11618_v49 = vld [vmem:[#allocation46_spill] sm:$0xff] }
 0xe35   : > { %7390 = vmatmul.mubr.bf16.gmra.mrb[100].mxu0 %v4555_v16 }
 0xe36   : > { %5378 = vmatprep.mubr.bf16.mxu0 %v11557_v62  ;;  %5361 = vmatpush1.bf16.msra.mxu0 %v7660_v47 }
 0xe37   : > { %5248 = vmatpush1.bf16.msra.mxu1 %v7657_v58 }
 0xe9b   : > { %v7379_v52 = vpop.f32.mrb[88].mxu0 }
 0xe9c   : > { %v4662_v31 = vpop.f32.mrb[89].mxu0  ;;  %v4671_v13 = vadd.f32 %v7379_v52, %v10757_v35 }
 0xe9d   : > { %v4663_v2 = vadd.f32 %v10757_v35, %v4662_v31  ;;  %v7380_v50 = vpop.f32.mrb[90].mxu0 }
 0xe9e   : > { %v4665_v61 = vpop.f32.mrb[91].mxu0  ;;  %v4674_v11 = vadd.f32 %v7380_v50, %v10757_v35  ;;  %v10782_v19 = vadd.f32 %v4671_v13, %v11601_v12 }
 0xe9f   : > { %v10761_v32 = vadd.f32 %v4663_v2, %v11598_v34  ;;  %v4666_v54 = vadd.f32 %v10757_v35, %v4665_v61  ;;  %v11604_v61 = vld [vmem:[#allocation38_spill] sm:$0xff] }
 0xea0   : > { %v10773_v9 = vadd.f32 %v4674_v11, %v11600_v5  ;;  %v4793_v55 = vmul.f32 %v10782_v19, %v10782_v19 }
 0xea1   : > { %v10766_v24 = vadd.f32 %v4666_v54, %v11599_v45  ;;  %4743 = vadd.xlane.f32.xlu0 %v10761_v32  ;;  %v4791_v6 = vmul.f32 %v10761_v32, %v10761_v32  ;;  %v11605_v54 = vld [vmem:[#allocation39_spill] sm:$0xff] }
 0xea2   : > { %v4794_v44 = vmul.f32 %v10773_v9, %v10773_v9 }
 0xea3   : > { %4745 = vadd.xlane.f32.xlu1 %v10766_v24  ;;  %v4792_v20 = vmul.f32 %v10766_v24, %v10766_v24 }
 0xea5   : > { %4807 = vadd.xlane.f32.xlu0 %v4791_v6 }
 0xea7   : > { %4749 = vadd.xlane.f32.xlu1 %v10773_v9 }
 0xea9   : > { %4809 = vadd.xlane.f32.xlu0 %v4792_v20 }
 0xeab   : > { %4813 = vadd.xlane.f32.xlu1 %v4794_v44 }
 0xead   : > { %4747 = vadd.xlane.f32.xlu0 %v10782_v19 }
 0xeb1   : > { %4811 = vadd.xlane.f32.xlu0 %v4793_v55  ;;  %v11606_v55 = vld [vmem:[#allocation40_spill] sm:$0xff] }
 0xec9   : > { %v7383_v3 = vpop.f32.mrb[92].mxu0 }
 0xeca   : > { %v4678_v37 = vpop.f32.mrb[93].mxu0  ;;  %v4687_v52 = vadd.f32 %v7383_v3, %v10757_v35 }
 0xecb   : > { %v4679_v46 = vadd.f32 %v10757_v35, %v4678_v37  ;;  %v7384_v25 = vpop.f32.mrb[94].mxu0 }
 0xecc   : > { %v4681_v21 = vpop.f32.mrb[95].mxu0  ;;  %v4690_v2 = vadd.f32 %v7384_v25, %v10757_v35  ;;  %v10836_v34 = vadd.f32 %v4687_v52, %v11604_v61 }
 0xecd   : > { %v10821_v22 = vadd.f32 %v4679_v46, %v11602_v63  ;;  %v4682_v17 = vadd.f32 %v10757_v35, %v4681_v21 }
 0xece   : > { %v10839_v11 = vadd.f32 %v4690_v2, %v11605_v54  ;;  %v4797_v45 = vmul.f32 %v10836_v34, %v10836_v34 }
 0xecf   : > { %v10825_v16 = vadd.f32 %v4682_v17, %v11603_v36  ;;  %4751 = vadd.xlane.f32.xlu0 %v10821_v22  ;;  %v4795_v31 = vmul.f32 %v10821_v22, %v10821_v22 }
 0xed0   : > { %v4798_v6 = vmul.f32 %v10839_v11, %v10839_v11 }
 0xed1   : > { %4753 = vadd.xlane.f32.xlu1 %v10825_v16  ;;  %v4796_v50 = vmul.f32 %v10825_v16, %v10825_v16 }
 0xed3   : > { %4815 = vadd.xlane.f32.xlu0 %v4795_v31 }
 0xed5   : > { %4817 = vadd.xlane.f32.xlu1 %v4796_v50 }
 0xed7   : > { %4755 = vadd.xlane.f32.xlu0 %v10836_v34 }
 0xed9   : > { %4757 = vadd.xlane.f32.xlu1 %v10839_v11 }
 0xedb   : > { %4819 = vadd.xlane.f32.xlu0 %v4797_v45 }
 0xedd   : > { %4821 = vadd.xlane.f32.xlu1 %v4798_v6 }
 0xefc   : > { %v7387_v5 = vpop.f32.mrb[96].mxu0 }
 0xefd   : > { %v4694_v13 = vpop.f32.mrb[97].mxu0  ;;  %v4703_v29 = vadd.f32 %v7387_v5, %v10757_v35 }
 0xefe   : > { %v4695_v20 = vadd.f32 %v10757_v35, %v4694_v13  ;;  %v7388_v44 = vpop.f32.mrb[98].mxu0 }
 0xeff   : > { %v4697_v12 = vpop.f32.mrb[99].mxu0  ;;  %v4706_v10 = vadd.f32 %v7388_v44, %v10757_v35  ;;  %v10864_v26 = vadd.f32 %v4703_v29, %v11610_v38 }
 0xf00   : > { %v10849_v56 = vadd.f32 %v4695_v20, %v11606_v55  ;;  %v4698_v23 = vadd.f32 %v10757_v35, %v4697_v12 }
 0xf01   : > { %11611 = vst [vmem:[#allocation65_spill] sm:$0xff] %v10864_v26  ;;  %v10867_v7 = vadd.f32 %v4706_v10, %v11612_v42  ;;  %v4801_v1 = vmul.f32 %v10864_v26, %v10864_v26 }
 0xf02   : > { %11607 = vst [vmem:[#allocation64_spill] sm:$0xff] %v10849_v56  ;;  %v10853_v33 = vadd.f32 %v4698_v23, %v11608_v18  ;;  %4759 = vadd.xlane.f32.xlu0 %v10849_v56  ;;  %v4799_v28 = vmul.f32 %v10849_v56, %v10849_v56 }
 0xf03   : > { %11613 = vst [vmem:[#allocation69_spill] sm:$0xff] %v10867_v7  ;;  %v4802_v51 = vmul.f32 %v10867_v7, %v10867_v7 }
 0xf04   : > { %11609 = vst [vmem:[#allocation66_spill] sm:$0xff] %v10853_v33  ;;  %4761 = vadd.xlane.f32.xlu1 %v10853_v33  ;;  %v4800_v57 = vmul.f32 %v10853_v33, %v10853_v33 }
 0xf06   : > { %4823 = vadd.xlane.f32.xlu0 %v4799_v28 }
 0xf08   : > { %4825 = vadd.xlane.f32.xlu1 %v4800_v57  ;;  %v7391_v15 = vpop.f32.mrb[100].mxu0 }
 0xf09   : > { %v4710_v39 = vpop.f32.mrb[101].mxu0  ;;  %v4719_v59 = vadd.f32 %v7391_v15, %v10757_v35 }
 0xf0a   : > { %4763 = vadd.xlane.f32.xlu0 %v10864_v26  ;;  %v7392_v48 = vpop.f32.mrb[102].mxu0  ;;  %v4711_v8 = vadd.f32 %v10757_v35, %v4710_v39 }
 0xf0b   : > { %v4713_v43 = vpop.f32.mrb[103].mxu0  ;;  %v4722_v41 = vadd.f32 %v7392_v48, %v10757_v35  ;;  %v10892_v3 = vadd.f32 %v4719_v59, %v11618_v49  ;;  %v7664_v59 = vld [vmem:[%s9215_s13 + $0xc0] sm:$0xff]   ;;  %v10914_v49 = vld [vmem:[%s724_s25] ss:$0 sm:$0xff] }
 0xf0c   : > { %4765 = vadd.xlane.f32.xlu1 %v10867_v7  ;;  %v4714_v14 = vadd.f32 %v10757_v35, %v4713_v43  ;;  %v10878_v4 = vadd.f32 %v4711_v8, %v11614_v60  ;;  %7009 = vmatprep.subr.bf16.mxu0 %v7664_v59 }
 0xf0d   : > { %11619 = vst [vmem:[#allocation68_spill] sm:$0xff] %v10892_v3  ;;  %v10895_v37 = vadd.f32 %v4722_v41, %v11620_v30  ;;  %v4805_v46 = vmul.f32 %v10892_v3, %v10892_v3 }
 0xf0e   : > { %4827 = vadd.xlane.f32.xlu0 %v4801_v1  ;;  %11615 = vst [vmem:[#allocation67_spill] sm:$0xff] %v10878_v4  ;;  %v10881_v53 = vadd.f32 %v4714_v14, %v11616_v40  ;;  %v4803_v0 = vmul.f32 %v10878_v4, %v10878_v4  ;;  %v10906_v14 = vld [vmem:[%s716_s17] ss:$0 sm:$0xff]  ;;  %v7663_v40 = vld [vmem:[%s9215_s13 + $0x40] sm:$0xff]  }
 0xf0f   : > { %11621 = vst [vmem:[#allocation51_spill] sm:$0xff] %v10895_v37  ;;  %v4806_v35 = vmul.f32 %v10895_v37, %v10895_v37  ;;  %6945 = vmatprep.subr.bf16.mxu1 %v7663_v40 }
 0xf10   : > { %4829 = vadd.xlane.f32.xlu1 %v4802_v51  ;;  %11617 = vst [vmem:[#allocation70_spill] sm:$0xff] %v10881_v53  ;;  %v4804_v27 = vmul.f32 %v10881_v53, %v10881_v53 }
 0xf12   : > { %4767 = vadd.xlane.f32.xlu0 %v10878_v4 }
 0xf14   : > { %4769 = vadd.xlane.f32.xlu1 %v10881_v53 }
 0xf16   : > { %4831 = vadd.xlane.f32.xlu0 %v4803_v0 }
 0xf18   : > { %4833 = vadd.xlane.f32.xlu1 %v4804_v27 }
 0xf1a   : > { %4771 = vadd.xlane.f32.xlu0 %v10892_v3 }
 0xf1c   : > { %4773 = vadd.xlane.f32.xlu1 %v10895_v37 }
 0xf1e   : > { %4835 = vadd.xlane.f32.xlu0 %v4805_v46 }
 0xf20   : > { %4837 = vadd.xlane.f32.xlu1 %v4806_v35 }
 0xf2e   : > { %v4744_v25 = vpop.xlane.xlu0 %4743 }
 0xf2f   : > { %v4775_v58 = vmul.f32 0.0078125, %v4744_v25 }
 0xf30   : > { %v4746_v21 = vpop.xlane.xlu1 %4745 }
 0xf31   : > { %v4855_v63 = vmul.f32 %v4775_v58, %v4775_v58  ;;  %v4776_v17 = vmul.f32 0.0078125, %v4746_v21  ;;  %v4903_v48 = vsub.f32 %v10761_v32, %v4775_v58 }
 0xf32   : > { %v4808_v47 = vpop.xlane.xlu0 %4807 }
 0xf33   : > { %v4839_v36 = vmul.f32 0.0078125, %v4808_v47  ;;  %v4856_v61 = vmul.f32 %v4776_v17, %v4776_v17  ;;  %v4904_v51 = vsub.f32 %v10766_v24, %v4776_v17  ;;  %v7666_v17 = vld [vmem:[%s9215_s13 + $0x80] sm:$0xff]  }
 0xf34   : > { %v4750_v52 = vpop.xlane.xlu1 %4749 }
 0xf35   : > { %v4871_v31 = vsub.f32 %v4839_v36, %v4855_v63  ;;  %v4778_v2 = vmul.f32 0.0078125, %v4750_v52  ;;  %v7665_v63 = vld [vmem:[%s9215_s13] sm:$0xff]   ;;  %v7667_v52 = vld [vmem:[%s9215_s13 + $0x48] sm:$0xff]  }
 0xf36   : > { %v4810_v50 = vpop.xlane.xlu0 %4809 }
 0xf37   : > { %v4887_v54 = vmax.f32 %v4871_v31, 0.0  ;;  %v4840_v45 = vmul.f32 0.0078125, %v4810_v50  ;;  %v4858_v13 = vmul.f32 %v4778_v2, %v4778_v2  ;;  %v4906_v30 = vsub.f32 %v10773_v9, %v4778_v2  ;;  %v7668_v31 = vld [vmem:[%s9215_s13 + $0xc8] sm:$0xff]  }
 0xf38   : > { %v4814_v6 = vpop.xlane.xlu1 %4813 }
 0xf39   : > { %v4919_v5 = vadd.f32 1e-05, %v4887_v54  ;;  %v4872_v20 = vsub.f32 %v4840_v45, %v4856_v61  ;;  %v4842_v44 = vmul.f32 0.0078125, %v4814_v6  ;;  %v7669_v54 = vld [vmem:[%s9215_s13 + $0x8] sm:$0xff]  }
 0xf3a   : > { %v4748_v12 = vpop.xlane.xlu0 %4747  ;;  %v7670_v45 = vld [vmem:[%s9215_s13 + $0x88] sm:$0xff]  }
 0xf3b   : > { %7983 = vrsqrt.f32 %v4919_v5  ;;  %v4888_v55 = vmax.f32 %v4872_v20, 0.0  ;;  %v4874_v23 = vsub.f32 %v4842_v44, %v4858_v13  ;;  %v4777_v18 = vmul.f32 0.0078125, %v4748_v12 }
 0xf3d   : > { %v4920_v29 = vadd.f32 1e-05, %v4888_v55  ;;  %v4890_v28 = vmax.f32 %v4874_v23, 0.0  ;;  %v4857_v38 = vmul.f32 %v4777_v18, %v4777_v18  ;;  %v4905_v21 = vsub.f32 %v10782_v19, %v4777_v18 }
 0xf3e   : > { %v4812_v10 = vpop.xlane.xlu0 %4811 }
 0xf3f   : > { %7985 = vrsqrt.f32 %v4920_v29  ;;  %v4922_v57 = vadd.f32 1e-05, %v4890_v28  ;;  %v4841_v15 = vmul.f32 0.0078125, %v4812_v10 }
 0xf41   : > { %7987 = vrsqrt.f32 %v4922_v57  ;;  %v4873_v39 = vsub.f32 %v4841_v15, %v4857_v38 }
 0xf43   : > { %v4889_v42 = vmax.f32 %v4873_v39, 0.0 }
 0xf45   : > { %v7984_v43 = vpop.eup %7983  ;;  %v4921_v8 = vadd.f32 1e-05, %v4889_v42 }
 0xf46   : > { %v4951_v1 = vmul.f32 %v7984_v43, %v4903_v48 }
 0xf47   : > { %7989 = vrsqrt.f32 %v4921_v8 }
 0xf48   : > { %v4973_v41 = vmul.f32 %v10906_v14, %v4951_v1 }
 0xf49   : > { %v7986_v60 = vpop.eup %7985 }
 0xf4a   : > { %v4952_v0 = vmul.f32 %v7986_v60, %v4904_v51  ;;  %v4995_v35 = vadd.f32 %v10914_v49, %v4973_v41 }
 0xf4b   : > { %v7988_v27 = vpop.eup %7987 }
 0xf4c   : > { %v4974_v46 = vmul.f32 %v10906_v14, %v4952_v0  ;;  %v4954_v58 = vmul.f32 %v7988_v27, %v4906_v30 }
 0xf4e   : > { %v4996_v25 = vadd.f32 %v10914_v49, %v4974_v46  ;;  %v4976_v50 = vmul.f32 %v10906_v14, %v4954_v58 }
 0xf50   : > { %v5011_v47 = vpack.c.bf16 %v4996_v25, %v4995_v35  ;;  %v4998_v5 = vadd.f32 %v10914_v49, %v4976_v50 }
 0xf51   : > { %v7990_v36 = vpop.eup %7989 }
 0xf52   : > { %5266 = vmatmul.mubr.bf16.vlgmr.msra.gmra.mrb[88].mxu1 %v5011_v47  ;;  %5379 = vmatmul.mubr.bf16.vlgmr.msra.gmra.mrb[104].mxu0 %v5011_v47  ;;  %v4953_v2 = vmul.f32 %v7990_v36, %v4905_v21 }
 0xf53   : > { %5275 = vmatprep.mubr.bf16.mxu1 %v11557_v62  ;;  %5388 = vmatprep.mubr.bf16.mxu0 %v11557_v62 }
 0xf54   : > { %v4975_v61 = vmul.f32 %v10906_v14, %v4953_v2  ;;  %6946 = vmatpush3.bf16.msra.mxu1 %v7665_v63  ;;  %7010 = vmatpush3.bf16.msra.mxu0 %v7666_v17 }
 0xf55   : > { %6947 = vmatprep.subr.bf16.mxu1 %v7667_v52  ;;  %7011 = vmatprep.subr.bf16.mxu0 %v7668_v31 }
 0xf56   : > { %v4997_v6 = vadd.f32 %v10914_v49, %v4975_v61 }
 0xf58   : > { %v5012_v13 = vpack.c.bf16 %v4998_v5, %v4997_v6  ;;  %6948 = vmatpush3.bf16.msra.mxu1 %v7669_v54  ;;  %7012 = vmatpush3.bf16.msra.mxu0 %v7670_v45 }
 0xf5a   : > { %5276 = vmatmul.mubr.bf16.gmra.mrb[92].mxu1 %v5012_v13  ;;  %5389 = vmatmul.mubr.bf16.gmra.mrb[108].mxu0 %v5012_v13 }
 0xf5b   : > { %5285 = vmatprep.mubr.bf16.mxu1 %v11557_v62  ;;  %5398 = vmatprep.mubr.bf16.mxu0 %v11557_v62 }
 0xf5c   : > { %v4752_v20 = vpop.xlane.xlu0 %4751 }
 0xf5d   : > { %v4779_v44 = vmul.f32 0.0078125, %v4752_v20 }
 0xf5e   : > { %v4754_v12 = vpop.xlane.xlu1 %4753 }
 0xf5f   : > { %v4780_v55 = vmul.f32 0.0078125, %v4754_v12  ;;  %v4859_v18 = vmul.f32 %v4779_v44, %v4779_v44  ;;  %v4907_v63 = vsub.f32 %v10821_v22, %v4779_v44 }
 0xf60   : > { %v4816_v23 = vpop.xlane.xlu0 %4815 }
 0xf61   : > { %v4843_v29 = vmul.f32 0.0078125, %v4816_v23  ;;  %v4860_v10 = vmul.f32 %v4780_v55, %v4780_v55  ;;  %v4908_v36 = vsub.f32 %v10825_v16, %v4780_v55 }
 0xf62   : > { %v4818_v28 = vpop.xlane.xlu1 %4817 }
 0xf63   : > { %v4875_v57 = vsub.f32 %v4843_v29, %v4859_v18  ;;  %v4844_v38 = vmul.f32 0.0078125, %v4818_v28 }
 0xf64   : > { %v4756_v15 = vpop.xlane.xlu0 %4755 }
 0xf65   : > { %v4891_v39 = vmax.f32 %v4875_v57, 0.0  ;;  %v4876_v42 = vsub.f32 %v4844_v38, %v4860_v10  ;;  %v4781_v48 = vmul.f32 0.0078125, %v4756_v15 }
 0xf66   : > { %v4758_v43 = vpop.xlane.xlu1 %4757 }
 0xf67   : > { %v4923_v8 = vadd.f32 1e-05, %v4891_v39  ;;  %v4892_v1 = vmax.f32 %v4876_v42, 0.0  ;;  %v4782_v51 = vmul.f32 0.0078125, %v4758_v43  ;;  %v4861_v59 = vmul.f32 %v4781_v48, %v4781_v48 }
 0xf68   : > { %v4820_v60 = vpop.xlane.xlu0 %4819  ;;  %v4909_v54 = vsub.f32 %v10836_v34, %v4781_v48 }
 0xf69   : > { %7991 = vrsqrt.f32 %v4923_v8  ;;  %v4924_v40 = vadd.f32 1e-05, %v4892_v1  ;;  %v4845_v0 = vmul.f32 0.0078125, %v4820_v60  ;;  %v4862_v27 = vmul.f32 %v4782_v51, %v4782_v51 }
 0xf6a   : > { %v4822_v41 = vpop.xlane.xlu1 %4821  ;;  %v4910_v13 = vsub.f32 %v10839_v11, %v4782_v51 }
 0xf6b   : > { %7993 = vrsqrt.f32 %v4924_v40  ;;  %v4877_v30 = vsub.f32 %v4845_v0, %v4861_v59  ;;  %v4846_v46 = vmul.f32 0.0078125, %v4822_v41 }
 0xf6d   : > { %v4893_v35 = vmax.f32 %v4877_v30, 0.0  ;;  %v4878_v25 = vsub.f32 %v4846_v46, %v4862_v27 }
 0xf6f   : > { %v4925_v58 = vadd.f32 1e-05, %v4893_v35  ;;  %v4894_v21 = vmax.f32 %v4878_v25, 0.0 }
 0xf71   : > { %7995 = vrsqrt.f32 %v4925_v58  ;;  %v4926_v47 = vadd.f32 1e-05, %v4894_v21 }
 0xf73   : > { %v7992_v17 = vpop.eup %7991  ;;  %7997 = vrsqrt.f32 %v4926_v47 }
 0xf74   : > { %v4955_v52 = vmul.f32 %v7992_v17, %v4907_v63 }
 0xf75   : > { %v7994_v31 = vpop.eup %7993 }
 0xf76   : > { %v4956_v2 = vmul.f32 %v7994_v31, %v4908_v36  ;;  %v4977_v50 = vmul.f32 %v10906_v14, %v4955_v52 }
 0xf78   : > { %v4978_v61 = vmul.f32 %v10906_v14, %v4956_v2  ;;  %v4999_v45 = vadd.f32 %v10914_v49, %v4977_v50 }
 0xf7a   : > { %v5000_v6 = vadd.f32 %v10914_v49, %v4978_v61 }
 0xf7b   : > { %v7996_v5 = vpop.eup %7995 }
 0xf7c   : > { %v5013_v20 = vpack.c.bf16 %v5000_v6, %v4999_v45  ;;  %v4957_v44 = vmul.f32 %v7996_v5, %v4909_v54 }
 0xf7d   : > { %v7998_v12 = vpop.eup %7997 }
 0xf7e   : > { %5286 = vmatmul.mubr.bf16.gmra.mrb[96].mxu1 %v5013_v20  ;;  %5399 = vmatmul.mubr.bf16.gmra.mrb[112].mxu0 %v5013_v20  ;;  %v4958_v55 = vmul.f32 %v7998_v12, %v4910_v13  ;;  %v4979_v23 = vmul.f32 %v10906_v14, %v4957_v44 }
 0xf7f   : > { %5295 = vmatprep.mubr.bf16.mxu1 %v11557_v62  ;;  %5408 = vmatprep.mubr.bf16.mxu0 %v11557_v62 }
 0xf80   : > { %v4980_v18 = vmul.f32 %v10906_v14, %v4958_v55  ;;  %v5001_v29 = vadd.f32 %v10914_v49, %v4979_v23 }
 0xf82   : > { %v5002_v28 = vadd.f32 %v10914_v49, %v4980_v18 }
 0xf84   : > { %v5014_v10 = vpack.c.bf16 %v5002_v28, %v5001_v29 }
 0xf86   : > { %5296 = vmatmul.mubr.bf16.gmra.mrb[100].mxu1 %v5014_v10  ;;  %5409 = vmatmul.mubr.bf16.gmra.mrb[116].mxu0 %v5014_v10 }
 0xf87   : > { %5305 = vmatprep.mubr.bf16.mxu1 %v11557_v62  ;;  %5418 = vmatprep.mubr.bf16.mxu0 %v11557_v62 }
 0xf8f   : > { %v4760_v57 = vpop.xlane.xlu0 %4759 }
 0xf90   : > { %v4783_v38 = vmul.f32 0.0078125, %v4760_v57 }
 0xf91   : > { %v4762_v15 = vpop.xlane.xlu1 %4761 }
 0xf92   : > { %v4784_v39 = vmul.f32 0.0078125, %v4762_v15  ;;  %v4863_v48 = vmul.f32 %v4783_v38, %v4783_v38  ;;  %v4911_v55 = vsub.f32 %v10849_v56, %v4783_v38  ;;  %v7671_v38 = vld [vmem:[%s9215_s13 + $0x50] sm:$0xff]  }
 0xf93   : > { %v4824_v42 = vpop.xlane.xlu0 %4823  ;;  %6949 = vmatprep.subr.bf16.mxu1 %v7671_v38  ;;  %v7682_v38 = vld [vmem:[%s9215_s13 + $0xa0] sm:$0xff]  }
 0xf94   : > { %v4847_v43 = vmul.f32 0.0078125, %v4824_v42  ;;  %v4864_v1 = vmul.f32 %v4784_v39, %v4784_v39  ;;  %v4912_v57 = vsub.f32 %v10853_v33, %v4784_v39  ;;  %v7673_v39 = vld [vmem:[%s9215_s13 + $0x10] sm:$0xff]  }
 0xf95   : > { %v4826_v8 = vpop.xlane.xlu1 %4825  ;;  %6950 = vmatpush3.bf16.msra.mxu1 %v7673_v39 }
 0xf96   : > { %v4879_v51 = vsub.f32 %v4847_v43, %v4863_v48  ;;  %v4848_v60 = vmul.f32 0.0078125, %v4826_v8 }
 0xf97   : > { %v4764_v40 = vpop.xlane.xlu0 %4763 }
 0xf98   : > { %v4895_v59 = vmax.f32 %v4879_v51, 0.0  ;;  %v4880_v0 = vsub.f32 %v4848_v60, %v4864_v1  ;;  %v10951_v41 = vmul.f32 0.0078125, %v4764_v40  ;;  %v7672_v51 = vld [vmem:[%s9215_s13 + $0xd0] sm:$0xff]  }
 0xf99   : > { %v4766_v27 = vpop.xlane.xlu1 %4765  ;;  %7013 = vmatprep.subr.bf16.mxu0 %v7672_v51 }
 0xf9a   : > { %v4927_v30 = vadd.f32 1e-05, %v4895_v59  ;;  %v4896_v46 = vmax.f32 %v4880_v0, 0.0  ;;  %v10953_v35 = vmul.f32 0.0078125, %v4766_v27  ;;  %v4865_v21 = vmul.f32 %v10951_v41, %v10951_v41 }
 0xf9b   : > { %v4828_v25 = vpop.xlane.xlu0 %4827 }
 0xf9c   : > { %7999 = vrsqrt.f32 %v4927_v30  ;;  %v4928_v58 = vadd.f32 1e-05, %v4896_v46  ;;  %v4849_v47 = vmul.f32 0.0078125, %v4828_v25  ;;  %v4866_v17 = vmul.f32 %v10953_v35, %v10953_v35  ;;  %v7674_v30 = vld [vmem:[%s9215_s13 + $0x90] sm:$0xff]  }
 0xf9d   : > { %v4830_v63 = vpop.xlane.xlu1 %4829  ;;  %7014 = vmatpush3.bf16.msra.mxu0 %v7674_v30  ;;  %v7683_v30 = vld [vmem:[%s9215_s13 + $0x68] sm:$0xff]  }
 0xf9e   : > { %8001 = vrsqrt.f32 %v4928_v58  ;;  %v4881_v36 = vsub.f32 %v4849_v47, %v4865_v21  ;;  %v4850_v52 = vmul.f32 0.0078125, %v4830_v63 }
 0xf9f   : > { %v4768_v31 = vpop.xlane.xlu0 %4767 }
 0xfa0   : > { %v4897_v2 = vmax.f32 %v4881_v36, 0.0  ;;  %v4882_v50 = vsub.f32 %v4850_v52, %v4866_v17  ;;  %v10959_v61 = vmul.f32 0.0078125, %v4768_v31  ;;  %v4913_v17 = vsub.f32 %v10864_v26, %v10951_v41 }
 0xfa1   : > { %v4770_v54 = vpop.xlane.xlu1 %4769  ;;  %v4914_v41 = vsub.f32 %v10867_v7, %v10953_v35 }
 0xfa2   : > { %v4929_v45 = vadd.f32 1e-05, %v4897_v2  ;;  %v4898_v6 = vmax.f32 %v4882_v50, 0.0  ;;  %v10961_v5 = vmul.f32 0.0078125, %v4770_v54  ;;  %v4867_v44 = vmul.f32 %v10959_v61, %v10959_v61  ;;  %v7675_v2 = vld [vmem:[%s9215_s13 + $0x58] sm:$0xff]  }
 0xfa3   : > { %v4832_v13 = vpop.xlane.xlu0 %4831  ;;  %v7676_v50 = vld [vmem:[%s9215_s13 + $0xd8] sm:$0xff]   ;;  %6951 = vmatprep.subr.bf16.mxu1 %v7675_v2  ;;  %v4915_v51 = vsub.f32 %v10878_v4, %v10959_v61  ;;  %v7685_v61 = vld [vmem:[%s9215_s13 + $0x28] sm:$0xff]  }
 0xfa4   : > { %8003 = vrsqrt.f32 %v4929_v45  ;;  %v4930_v20 = vadd.f32 1e-05, %v4898_v6  ;;  %v4851_v12 = vmul.f32 0.0078125, %v4832_v13  ;;  %v4868_v29 = vmul.f32 %v10961_v5, %v10961_v5  ;;  %7015 = vmatprep.subr.bf16.mxu0 %v7676_v50 }
 0xfa5   : > { %v4834_v23 = vpop.xlane.xlu1 %4833 }
 0xfa6   : > { %v8000_v18 = vpop.eup %7999  ;;  %8005 = vrsqrt.f32 %v4930_v20  ;;  %v4883_v28 = vsub.f32 %v4851_v12, %v4867_v44  ;;  %v4852_v10 = vmul.f32 0.0078125, %v4834_v23  ;;  %v7677_v20 = vld [vmem:[%s9215_s13 + $0x18] sm:$0xff]  }
 0xfa7   : > { %v4772_v15 = vpop.xlane.xlu0 %4771  ;;  %v4959_v42 = vmul.f32 %v8000_v18, %v4911_v55  ;;  %v7678_v44 = vld [vmem:[%s9215_s13 + $0x98] sm:$0xff]   ;;  %6952 = vmatpush3.bf16.msra.mxu1 %v7677_v20 }
 0xfa8   : > { %v8002_v48 = vpop.eup %8001  ;;  %v4899_v43 = vmax.f32 %v4883_v28, 0.0  ;;  %v4884_v8 = vsub.f32 %v4852_v10, %v4868_v29  ;;  %v10969_v1 = vmul.f32 0.0078125, %v4772_v15  ;;  %7016 = vmatpush3.bf16.msra.mxu0 %v7678_v44  ;;  %v7680_v15 = vld [vmem:[%s9215_s13 + $0xe0] sm:$0xff]   ;;  %v7691_v44 = vld [vmem:[%s9215_s13 + $0x78] sm:$0xff]  }
 0xfa9   : > { %v4774_v60 = vpop.xlane.xlu1 %4773  ;;  %v4960_v40 = vmul.f32 %v8002_v48, %v4912_v57  ;;  %v4981_v59 = vmul.f32 %v10906_v14, %v4959_v42  ;;  %v7679_v57 = vld [vmem:[%s9215_s13 + $0x60] sm:$0xff]   ;;  %7017 = vmatprep.subr.bf16.mxu0 %v7680_v15 }
 0xfaa   : > { %v4931_v0 = vadd.f32 1e-05, %v4899_v43  ;;  %v4900_v27 = vmax.f32 %v4884_v8, 0.0  ;;  %v10976_v46 = vmul.f32 0.0078125, %v4774_v60  ;;  %v4869_v47 = vmul.f32 %v10969_v1, %v10969_v1  ;;  %6953 = vmatprep.subr.bf16.mxu1 %v7679_v57  ;;  %v7681_v8 = vld [vmem:[%s9215_s13 + $0x20] sm:$0xff]  }
 0xfab   : > { %v4836_v25 = vpop.xlane.xlu0 %4835  ;;  %v4982_v58 = vmul.f32 %v10906_v14, %v4960_v40  ;;  %v5003_v52 = vadd.f32 %v10914_v49, %v4981_v59  ;;  %6954 = vmatpush3.bf16.msra.mxu1 %v7681_v8  ;;  %v4917_v2 = vsub.f32 %v10892_v3, %v10969_v1  ;;  %v5053_v57 = vlaneseq }
 0xfac   : > { %8007 = vrsqrt.f32 %v4931_v0  ;;  %v4932_v21 = vadd.f32 1e-05, %v4900_v27  ;;  %v4853_v63 = vmul.f32 0.0078125, %v4836_v25  ;;  %v4870_v45 = vmul.f32 %v10976_v46, %v10976_v46  ;;  %7018 = vmatpush3.bf16.msra.mxu0 %v7682_v38  ;;  %v7684_v25 = vld [vmem:[%s9215_s13 + $0xe8] sm:$0xff]   ;;  %6955 = vmatprep.subr.bf16.mxu1 %v7683_v30 }
 0xfad   : > { %v4838_v36 = vpop.xlane.xlu1 %4837  ;;  %v5004_v31 = vadd.f32 %v10914_v49, %v4982_v58  ;;  %v4916_v0 = vsub.f32 %v10881_v53, %v10961_v5  ;;  %7019 = vmatprep.subr.bf16.mxu0 %v7684_v25  ;;  %v5054_v15 = vshrl.u32 %v5053_v57, 7 }
 0xfae   : > { %v8004_v54 = vpop.eup %8003  ;;  %8009 = vrsqrt.f32 %v4932_v21  ;;  %v4885_v6 = vsub.f32 %v4853_v63, %v4869_v47  ;;  %v4854_v13 = vmul.f32 0.0078125, %v4838_v36  ;;  %v7686_v21 = vld [vmem:[%s9215_s13 + $0xa8] sm:$0xff]   ;;  %v7688_v36 = vld [vmem:[%s9215_s13 + $0xf0] sm:$0xff]  }
 0xfaf   : > { %v5015_v12 = vpack.c.bf16 %v5004_v31, %v5003_v52  ;;  %v4961_v55 = vmul.f32 %v8004_v54, %v4913_v17  ;;  %v7687_v17 = vld [vmem:[%s9215_s13 + $0x70] sm:$0xff]   ;;  %6956 = vmatpush3.bf16.msra.mxu1 %v7685_v61 }
 0xfb0   : > { %v8006_v23 = vpop.eup %8005  ;;  %v4901_v18 = vmax.f32 %v4885_v6, 0.0  ;;  %v4886_v29 = vsub.f32 %v4854_v13, %v4870_v45  ;;  %7020 = vmatpush3.bf16.msra.mxu0 %v7686_v21  ;;  %v7689_v52 = vld [vmem:[%s9215_s13 + $0x30] sm:$0xff]   ;;  %6957 = vmatprep.subr.bf16.mxu1 %v7687_v17  ;;  %v4918_v6 = vsub.f32 %v10895_v37, %v10976_v46 }
 0xfb1   : > { %5306 = vmatmul.mubr.bf16.gmra.mrb[104].mxu1 %v5015_v12  ;;  %5419 = vmatmul.mubr.bf16.gmra.mrb[120].mxu0 %v5015_v12  ;;  %v4962_v28 = vmul.f32 %v8006_v23, %v4914_v41  ;;  %v4983_v10 = vmul.f32 %v10906_v14, %v4961_v55  ;;  %v7690_v31 = vld [vmem:[%s9215_s13 + $0xb0] sm:$0xff]   ;;  %v7692_v41 = vld [vmem:[%s9215_s13 + $0xf8] sm:$0xff]  }
 0xfb2   : > { %v4933_v42 = vadd.f32 1e-05, %v4901_v18  ;;  %v4902_v35 = vmax.f32 %v4886_v29, 0.0  ;;  %5315 = vmatprep.mubr.bf16.mxu1 %v11557_v62  ;;  %5428 = vmatprep.mubr.bf16.mxu0 %v11557_v62  ;;  %v7693_v55 = vld [vmem:[%s9215_s13 + $0x38] sm:$0xff]  }
 0xfb3   : > { %v4984_v48 = vmul.f32 %v10906_v14, %v4962_v28  ;;  %v5005_v60 = vadd.f32 %v10914_v49, %v4983_v10  ;;  %7021 = vmatprep.subr.bf16.mxu0 %v7688_v36  ;;  %6958 = vmatpush3.bf16.msra.mxu1 %v7689_v52  ;;  %v7694_v23 = vld [vmem:[%s9215_s13 + $0xb8] sm:$0xff]  }
 0xfb4   : > { %8011 = vrsqrt.f32 %v4933_v42  ;;  %v4934_v43 = vadd.f32 1e-05, %v4902_v35  ;;  %7022 = vmatpush3.bf16.msra.mxu0 %v7690_v31  ;;  %6959 = vmatprep.subr.bf16.mxu1 %v7691_v44  ;;  %v5055_v42 = vsub.s32 0, %v5054_v15  ;;  %v5063_v35 = vsub.s32 2, %v5054_v15 }
 0xfb5   : > { %v5006_v40 = vadd.f32 %v10914_v49, %v4984_v48  ;;  %7023 = vmatprep.subr.bf16.mxu0 %v7692_v41  ;;  %v5051_v48 = vld [vmem:[%s9213_s4] sm:$0xf] }
 0xfb6   : > { %v8008_v59 = vpop.eup %8007  ;;  %8013 = vrsqrt.f32 %v4934_v43  ;;  %v5059_v43 = vsub.s32 1, %v5054_v15  ;;  %v11036_v8 = vrot.slane %v5051_v48, %v5055_v42 }
 0xfb7   : > { %v5016_v27 = vpack.c.bf16 %v5006_v40, %v5005_v60  ;;  %v4963_v39 = vmul.f32 %v8008_v59, %v4915_v51  ;;  %6960 = vmatpush3.bf16.msra.mxu1 %v7693_v55 }
 0xfb8   : > { %v8010_v58 = vpop.eup %8009  ;;  %7024 = vmatpush3.bf16.msra.mxu0 %v7694_v23  ;;  %v11040_v38 = vrot.slane %v5051_v48, %v5059_v43 }
 0xfb9   : > { %5316 = vmatmul.mubr.bf16.gmra.mrb[108].mxu1 %v5016_v27  ;;  %5429 = vmatmul.mubr.bf16.gmra.mrb[124].mxu0 %v5016_v27  ;;  %v4964_v47 = vmul.f32 %v8010_v58, %v4916_v0  ;;  %v4985_v63 = vmul.f32 %v10906_v14, %v4963_v39 }
 0xfba   : > { %5325 = vmatprep.mubr.bf16.mxu1 %v11557_v62  ;;  %5438 = vmatprep.mubr.bf16.mxu0 %v11557_v62 }
 0xfbb   : > { %v4986_v5 = vmul.f32 %v10906_v14, %v4964_v47  ;;  %v5007_v50 = vadd.f32 %v10914_v49, %v4985_v63 }
 0xfbd   : > { %v5008_v54 = vadd.f32 %v10914_v49, %v4986_v5 }
 0xfbe   : > { %v8012_v45 = vpop.eup %8011 }
 0xfbf   : > { %v5017_v13 = vpack.c.bf16 %v5008_v54, %v5007_v50  ;;  %v4965_v20 = vmul.f32 %v8012_v45, %v4917_v2 }
 0xfc0   : > { %v8014_v12 = vpop.eup %8013 }
 0xfc1   : > { %5326 = vmatmul.mubr.bf16.gmra.mrb[112].mxu1 %v5017_v13  ;;  %5439 = vmatmul.mubr.bf16.gmra.mrb[128].mxu0 %v5017_v13  ;;  %v4966_v1 = vmul.f32 %v8014_v12, %v4918_v6  ;;  %v4987_v18 = vmul.f32 %v10906_v14, %v4965_v20 }
 0xfc2   : > { %5335 = vmatprep.mubr.bf16.mxu1 %v11557_v62  ;;  %5448 = vmatprep.mubr.bf16.mxu0 %v11557_v62  ;;  %v5067_v62 = vsub.s32 3, %v5054_v15 }
 0xfc3   : > { %v4988_v46 = vmul.f32 %v10906_v14, %v4966_v1  ;;  %v5009_v29 = vadd.f32 %v10914_v49, %v4987_v18  ;;  %v11038_v14 = vrot.slane %v5051_v48, %v5063_v35 }
 0xfc4   : > { %v11042_v51 = vrot.slane %v5051_v48, %v5067_v62 }
 0xfc5   : > { %v5010_v28 = vadd.f32 %v10914_v49, %v4988_v46 }
 0xfc7   : > { %v5018_v10 = vpack.c.bf16 %v5010_v28, %v5009_v29 }
 0xfc9   : > { %5336 = vmatmul.mubr.bf16.gmra.mrb[116].mxu1 %v5018_v10  ;;  %5449 = vmatmul.mubr.bf16.gmra.mrb[132].mxu0 %v5018_v10 }
0x1025   : > { %v5267_v60 = vpop.f32.mrb[88].mxu1  ;;  %v5380_v49 = vpop.f32.mrb[104].mxu0 }
0x1026   : > { %v5268_v40 = vadd.f32 %v5267_v60, %v11036_v8  ;;  %v5381_v59 = vadd.f32 %v5380_v49, %v11038_v14  ;;  %v5269_v0 = vpop.f32.mrb[89].mxu1  ;;  %v5382_v27 = vpop.f32.mrb[105].mxu0 }
0x1027   : > { %v5270_v39 = vadd.f32 %v5269_v0, %v11040_v38  ;;  %v5383_v30 = vadd.f32 %v5382_v27, %v11042_v51  ;;  %v5271_v25 = vpop.f32.mrb[90].mxu1  ;;  %v5384_v58 = vpop.f32.mrb[106].mxu0 }
0x1028   : > { %v5523_v61 = vmul.f32 0.70710677, %v5268_v40  ;;  %v5525_v21 = vmul.f32 0.70710677, %v5381_v59  ;;  %v5272_v5 = vadd.f32 %v5271_v25, %v11036_v8  ;;  %v11050_v17 = vadd.f32 %v5384_v58, %v11038_v14  ;;  %v5273_v36 = vpop.f32.mrb[91].mxu1  ;;  %v5386_v52 = vpop.f32.mrb[107].mxu0 }
0x1029   : > { %v5524_v47 = vmul.f32 0.70710677, %v5270_v39  ;;  %v5526_v63 = vmul.f32 0.70710677, %v5383_v30  ;;  %v5274_v31 = vadd.f32 %v5273_v36, %v11040_v38  ;;  %v11054_v2 = vadd.f32 %v5386_v52, %v11042_v51 }
0x102a   : > { %8015 = verf.f32 %v5523_v61  ;;  %v5527_v50 = vmul.f32 0.70710677, %v5272_v5  ;;  %v5529_v54 = vmul.f32 0.70710677, %v11050_v17  ;;  %v5459_v25 = vmul.f32 0.5, %v5268_v40 }
0x102b   : > { %8017 = verf.f32 %v5525_v21  ;;  %v5528_v45 = vmul.f32 0.70710677, %v5274_v31  ;;  %v5530_v13 = vmul.f32 0.70710677, %v11054_v2  ;;  %v5461_v58 = vmul.f32 0.5, %v5381_v59 }
0x102c   : > { %8019 = verf.f32 %v5524_v47 }
0x102d   : > { %8021 = verf.f32 %v5526_v63  ;;  %v5277_v6 = vpop.f32.mrb[92].mxu1  ;;  %v5390_v44 = vpop.f32.mrb[108].mxu0  ;;  %v5460_v63 = vmul.f32 0.5, %v5270_v39  ;;  %v5464_v39 = vmul.f32 0.5, %v5274_v31 }
0x102e   : > { %8023 = verf.f32 %v5527_v50  ;;  %v11059_v20 = vadd.f32 %v5277_v6, %v11036_v8  ;;  %v5279_v41 = vpop.f32.mrb[93].mxu1  ;;  %v11062_v12 = vadd.f32 %v5390_v44, %v11038_v14  ;;  %v5392_v23 = vpop.f32.mrb[109].mxu0 }
0x102f   : > { %8025 = verf.f32 %v5529_v54  ;;  %v11065_v55 = vadd.f32 %v5279_v41, %v11040_v38  ;;  %v5281_v1 = vpop.f32.mrb[94].mxu1  ;;  %v11069_v46 = vadd.f32 %v5392_v23, %v11042_v51  ;;  %v5394_v29 = vpop.f32.mrb[110].mxu0  ;;  %v5462_v54 = vmul.f32 0.5, %v5383_v30 }
0x1030   : > { %8027 = verf.f32 %v5528_v45  ;;  %v5531_v18 = vmul.f32 0.70710677, %v11059_v20  ;;  %v5283_v28 = vpop.f32.mrb[95].mxu1  ;;  %v5533_v10 = vmul.f32 0.70710677, %v11062_v12  ;;  %v5396_v57 = vpop.f32.mrb[111].mxu0  ;;  %v5282_v35 = vadd.f32 %v5281_v1, %v11036_v8 }
0x1031   : > { %8029 = verf.f32 %v5530_v13  ;;  %v5532_v15 = vmul.f32 0.70710677, %v11065_v55  ;;  %v5534_v42 = vmul.f32 0.70710677, %v11069_v46  ;;  %v11076_v48 = vadd.f32 %v5394_v29, %v11038_v14 }
0x1032   : > { %8031 = verf.f32 %v5531_v18  ;;  %v11079_v43 = vadd.f32 %v5283_v28, %v11040_v38  ;;  %v5535_v49 = vmul.f32 0.70710677, %v5282_v35  ;;  %v11082_v0 = vadd.f32 %v5396_v57, %v11042_v51 }
0x1033   : > { %8033 = verf.f32 %v5533_v10  ;;  %v5537_v61 = vmul.f32 0.70710677, %v11076_v48  ;;  %v5463_v45 = vmul.f32 0.5, %v5272_v5  ;;  %v5465_v23 = vmul.f32 0.5, %v11050_v17 }
0x1034   : > { %v8016_v62 = vpop.eup %8015  ;;  %8035 = verf.f32 %v5532_v15  ;;  %v5536_v36 = vmul.f32 0.70710677, %v11079_v43  ;;  %v5538_v40 = vmul.f32 0.70710677, %v11082_v0  ;;  %v5466_v57 = vmul.f32 0.5, %v11054_v2 }
0x1035   : > { %v8018_v60 = vpop.eup %8017  ;;  %8037 = verf.f32 %v5534_v42  ;;  %v5651_v47 = vadd.f32 1.0, %v8016_v62 }
0x1036   : > { %v8020_v27 = vpop.eup %8019  ;;  %8039 = verf.f32 %v5535_v49  ;;  %v5653_v50 = vadd.f32 1.0, %v8018_v60 }
0x1037   : > { %v8022_v21 = vpop.eup %8021  ;;  %8041 = verf.f32 %v5537_v61  ;;  %v5652_v13 = vadd.f32 1.0, %v8020_v27  ;;  %v5715_v29 = vmul.f32 %v5651_v47, %v5459_v25 }
0x1038   : > { %v8024_v52 = vpop.eup %8023  ;;  %8043 = verf.f32 %v5536_v36  ;;  %v5654_v41 = vadd.f32 1.0, %v8022_v21  ;;  %v5717_v30 = vmul.f32 %v5653_v50, %v5461_v58  ;;  %v5467_v58 = vmul.f32 0.5, %v11059_v20 }
0x1039   : > { %v8026_v6 = vpop.eup %8025  ;;  %v5655_v44 = vadd.f32 1.0, %v8024_v52  ;;  %8045 = verf.f32 %v5538_v40  ;;  %v5716_v62 = vmul.f32 %v5652_v13, %v5460_v63  ;;  %v5471_v13 = vmul.f32 0.5, %v5282_v35 }
0x103a   : > { %v8028_v59 = vpop.eup %8027  ;;  %v5657_v1 = vadd.f32 1.0, %v8026_v6  ;;  %v5718_v61 = vmul.f32 %v5654_v41, %v5462_v54  ;;  %v5469_v6 = vmul.f32 0.5, %v11062_v12  ;;  %v5468_v40 = vmul.f32 0.5, %v11065_v55 }
0x103b   : > { %v8030_v18 = vpop.eup %8029  ;;  %v5719_v28 = vmul.f32 %v5655_v44, %v5463_v45  ;;  %v5656_v10 = vadd.f32 1.0, %v8028_v59  ;;  %v5473_v59 = vmul.f32 0.5, %v11076_v48  ;;  %v5470_v35 = vmul.f32 0.5, %v11069_v46 }
0x103c   : > { %v5721_v5 = vmul.f32 %v5657_v1, %v5465_v23  ;;  %v5658_v15 = vadd.f32 1.0, %v8030_v18  ;;  %v8032_v42 = vpop.eup %8031  ;;  %v5472_v23 = vmul.f32 0.5, %v11079_v43 }
0x103d   : > { %v5779_v60 = vpack.c.bf16 %v5719_v28, %v5715_v29  ;;  %v5720_v49 = vmul.f32 %v5656_v10, %v5464_v39  ;;  %v8034_v27 = vpop.eup %8033  ;;  %v5659_v25 = vadd.f32 1.0, %v8032_v42  ;;  %v5474_v10 = vmul.f32 0.5, %v11082_v0 }
0x103e   : > { %v5781_v21 = vpack.c.bf16 %v5721_v5, %v5717_v30  ;;  %v5722_v17 = vmul.f32 %v5658_v15, %v5466_v57  ;;  %v8036_v36 = vpop.eup %8035  ;;  %v5661_v50 = vadd.f32 1.0, %v8034_v27 }
0x103f   : > { %v5780_v31 = vpack.c.bf16 %v5720_v49, %v5716_v62  ;;  %v8038_v52 = vpop.eup %8037  ;;  %v5660_v63 = vadd.f32 1.0, %v8036_v36  ;;  %v5723_v20 = vmul.f32 %v5659_v25, %v5467_v58 }
0x1040   : > { %v5782_v47 = vpack.c.bf16 %v5722_v17, %v5718_v61  ;;  %v8040_v45 = vpop.eup %8039  ;;  %v5662_v1 = vadd.f32 1.0, %v8038_v52  ;;  %v5725_v12 = vmul.f32 %v5661_v50, %v5469_v6 }
0x1041   : > { %6106 = vmatprep.mubr.bf16.mxu1 %v5780_v31  ;;  %v8042_v2 = vpop.eup %8041  ;;  %v5663_v44 = vadd.f32 1.0, %v8040_v45  ;;  %v5724_v30 = vmul.f32 %v5660_v63, %v5468_v40 }
0x1042   : > { %6203 = vmatprep.mubr.bf16.mxu0 %v5782_v47  ;;  %6107 = vmatmul.mubr.bf16.vlgmr.msra.gmra.mrb[120].mxu1 %v5779_v60  ;;  %v8044_v54 = vpop.eup %8043  ;;  %v5665_v41 = vadd.f32 1.0, %v8042_v2  ;;  %v5726_v15 = vmul.f32 %v5662_v1, %v5470_v35 }
0x1043   : > { %6204 = vmatmul.mubr.bf16.vlgmr.msra.gmra.mrb[136].mxu0 %v5781_v21  ;;  %v5727_v39 = vmul.f32 %v5663_v44, %v5471_v13  ;;  %v5664_v18 = vadd.f32 1.0, %v8044_v54  ;;  %v8046_v29 = vpop.eup %8045 }
0x1044   : > { %v5729_v28 = vmul.f32 %v5665_v41, %v5473_v59  ;;  %v5666_v55 = vadd.f32 1.0, %v8046_v29 }
0x1045   : > { %v5728_v5 = vmul.f32 %v5664_v18, %v5472_v23  ;;  %v5783_v57 = vpack.c.bf16 %v5727_v39, %v5723_v20 }
0x1046   : > { %v5785_v48 = vpack.c.bf16 %v5729_v28, %v5725_v12  ;;  %v5730_v42 = vmul.f32 %v5666_v55, %v5474_v10 }
0x1047   : > { %v5784_v43 = vpack.c.bf16 %v5728_v5, %v5724_v30 }
0x1048   : > { %v5786_v62 = vpack.c.bf16 %v5730_v42, %v5726_v15 }
0x1049   : > { %6114 = vmatprep.mubr.bf16.mxu1 %v5784_v43 }
0x104a   : > { %6115 = vmatmul.mubr.bf16.gmra.mrb[124].mxu1 %v5783_v57  ;;  %6211 = vmatprep.mubr.bf16.mxu0 %v5786_v62 }
0x104b   : > { %6212 = vmatmul.mubr.bf16.gmra.mrb[140].mxu0 %v5785_v48 }
0x1051   : > { %v5287_v60 = vpop.f32.mrb[96].mxu1  ;;  %v5400_v49 = vpop.f32.mrb[112].mxu0 }
0x1052   : > { %v5288_v46 = vadd.f32 %v5287_v60, %v11036_v8  ;;  %v5401_v27 = vadd.f32 %v5400_v49, %v11038_v14  ;;  %v5289_v0 = vpop.f32.mrb[97].mxu1  ;;  %v5402_v61 = vpop.f32.mrb[113].mxu0 }
0x1053   : > { %v5290_v21 = vadd.f32 %v5289_v0, %v11040_v38  ;;  %v5403_v17 = vadd.f32 %v5402_v61, %v11042_v51  ;;  %v5291_v36 = vpop.f32.mrb[98].mxu1  ;;  %v5404_v31 = vpop.f32.mrb[114].mxu0 }
0x1054   : > { %v5539_v52 = vmul.f32 0.70710677, %v5288_v46  ;;  %v5541_v25 = vmul.f32 0.70710677, %v5401_v27  ;;  %v5292_v58 = vadd.f32 %v5291_v36, %v11036_v8  ;;  %v11102_v50 = vadd.f32 %v5404_v31, %v11038_v14  ;;  %v5293_v2 = vpop.f32.mrb[99].mxu1  ;;  %v5406_v6 = vpop.f32.mrb[115].mxu0 }
0x1055   : > { %v5540_v47 = vmul.f32 0.70710677, %v5290_v21  ;;  %v5542_v45 = vmul.f32 0.70710677, %v5403_v17  ;;  %v5294_v63 = vadd.f32 %v5293_v2, %v11040_v38  ;;  %v11106_v13 = vadd.f32 %v5406_v6, %v11042_v51 }
0x1056   : > { %8047 = verf.f32 %v5539_v52  ;;  %v5543_v44 = vmul.f32 0.70710677, %v5292_v58  ;;  %v5545_v54 = vmul.f32 0.70710677, %v11102_v50  ;;  %v5475_v36 = vmul.f32 0.5, %v5288_v46 }
0x1057   : > { %8049 = verf.f32 %v5541_v25  ;;  %v5544_v40 = vmul.f32 0.70710677, %v5294_v63  ;;  %v5546_v41 = vmul.f32 0.70710677, %v11106_v13  ;;  %v5477_v31 = vmul.f32 0.5, %v5401_v27 }
0x1058   : > { %8051 = verf.f32 %v5540_v47 }
0x1059   : > { %8053 = verf.f32 %v5542_v45  ;;  %v5297_v59 = vpop.f32.mrb[100].mxu1  ;;  %v5410_v20 = vpop.f32.mrb[116].mxu0  ;;  %v5476_v45 = vmul.f32 0.5, %v5290_v21  ;;  %v5480_v21 = vmul.f32 0.5, %v5294_v63 }
0x105a   : > { %8055 = verf.f32 %v5543_v44  ;;  %v11111_v23 = vadd.f32 %v5297_v59, %v11036_v8  ;;  %v5299_v1 = vpop.f32.mrb[101].mxu1  ;;  %v11114_v39 = vadd.f32 %v5410_v20, %v11038_v14  ;;  %v5412_v29 = vpop.f32.mrb[117].mxu0 }
0x105b   : > { %8057 = verf.f32 %v5545_v54  ;;  %v11117_v18 = vadd.f32 %v5299_v1, %v11040_v38  ;;  %v5301_v12 = vpop.f32.mrb[102].mxu1  ;;  %v11121_v28 = vadd.f32 %v5412_v29, %v11042_v51  ;;  %v5414_v10 = vpop.f32.mrb[118].mxu0  ;;  %v5478_v54 = vmul.f32 0.5, %v5403_v17 }
0x105c   : > { %8059 = verf.f32 %v5544_v40  ;;  %v5547_v35 = vmul.f32 0.70710677, %v11111_v23  ;;  %v5303_v30 = vpop.f32.mrb[103].mxu1  ;;  %v5549_v5 = vmul.f32 0.70710677, %v11114_v39  ;;  %v5416_v55 = vpop.f32.mrb[119].mxu0  ;;  %v5302_v15 = vadd.f32 %v5301_v12, %v11036_v8 }
0x105d   : > { %8061 = verf.f32 %v5546_v41  ;;  %v5548_v57 = vmul.f32 0.70710677, %v11117_v18  ;;  %v5550_v48 = vmul.f32 0.70710677, %v11121_v28  ;;  %v11128_v42 = vadd.f32 %v5414_v10, %v11038_v14 }
0x105e   : > { %8063 = verf.f32 %v5547_v35  ;;  %v11131_v43 = vadd.f32 %v5303_v30, %v11040_v38  ;;  %v5551_v49 = vmul.f32 0.70710677, %v5302_v15  ;;  %v11134_v0 = vadd.f32 %v5416_v55, %v11042_v51 }
0x105f   : > { %8065 = verf.f32 %v5549_v5  ;;  %v5553_v52 = vmul.f32 0.70710677, %v11128_v42  ;;  %v5479_v40 = vmul.f32 0.5, %v5292_v58  ;;  %v5481_v29 = vmul.f32 0.5, %v11102_v50 }
0x1060   : > { %v8048_v62 = vpop.eup %8047  ;;  %8067 = verf.f32 %v5548_v57  ;;  %v5552_v2 = vmul.f32 0.70710677, %v11131_v43  ;;  %v5554_v46 = vmul.f32 0.70710677, %v11134_v0  ;;  %v5482_v55 = vmul.f32 0.5, %v11106_v13 }
0x1061   : > { %v8050_v60 = vpop.eup %8049  ;;  %8069 = verf.f32 %v5550_v48  ;;  %v5667_v47 = vadd.f32 1.0, %v8048_v62 }
0x1062   : > { %v8052_v61 = vpop.eup %8051  ;;  %8071 = verf.f32 %v5551_v49  ;;  %v5669_v44 = vadd.f32 1.0, %v8050_v60 }
0x1063   : > { %v8054_v25 = vpop.eup %8053  ;;  %8073 = verf.f32 %v5553_v52  ;;  %v5668_v41 = vadd.f32 1.0, %v8052_v61  ;;  %v5731_v10 = vmul.f32 %v5667_v47, %v5475_v36 }
0x1064   : > { %v8056_v6 = vpop.eup %8055  ;;  %8075 = verf.f32 %v5552_v2  ;;  %v5670_v1 = vadd.f32 1.0, %v8054_v25  ;;  %v5733_v17 = vmul.f32 %v5669_v44, %v5477_v31  ;;  %v5483_v31 = vmul.f32 0.5, %v11111_v23 }
0x1065   : > { %v8058_v59 = vpop.eup %8057  ;;  %v5671_v20 = vadd.f32 1.0, %v8056_v6  ;;  %8077 = verf.f32 %v5554_v46  ;;  %v5732_v62 = vmul.f32 %v5668_v41, %v5476_v45  ;;  %v5487_v41 = vmul.f32 0.5, %v5302_v15 }
0x1066   : > { %v8060_v27 = vpop.eup %8059  ;;  %v5673_v12 = vadd.f32 1.0, %v8058_v59  ;;  %v5734_v52 = vmul.f32 %v5670_v1, %v5478_v54  ;;  %v5485_v59 = vmul.f32 0.5, %v11114_v39  ;;  %v5484_v46 = vmul.f32 0.5, %v11117_v18 }
0x1067   : > { %v8062_v35 = vpop.eup %8061  ;;  %v5735_v30 = vmul.f32 %v5671_v20, %v5479_v40  ;;  %v5672_v5 = vadd.f32 1.0, %v8060_v27  ;;  %v5489_v27 = vmul.f32 0.5, %v11128_v42  ;;  %v5486_v15 = vmul.f32 0.5, %v11121_v28 }
0x1068   : > { %v5737_v58 = vmul.f32 %v5673_v12, %v5481_v29  ;;  %v5674_v57 = vadd.f32 1.0, %v8062_v35  ;;  %v8064_v48 = vpop.eup %8063  ;;  %v5488_v29 = vmul.f32 0.5, %v11131_v43 }
0x1069   : > { %v5736_v60 = vmul.f32 %v5672_v5, %v5480_v21  ;;  %v5787_v49 = vpack.c.bf16 %v5735_v30, %v5731_v10  ;;  %v8066_v61 = vpop.eup %8065  ;;  %v5675_v36 = vadd.f32 1.0, %v8064_v48  ;;  %v5490_v5 = vmul.f32 0.5, %v11134_v0 }
0x106a   : > { %v5738_v25 = vmul.f32 %v5674_v57, %v5482_v55  ;;  %v5789_v50 = vpack.c.bf16 %v5737_v58, %v5733_v17  ;;  %v8068_v2 = vpop.eup %8067  ;;  %v5677_v44 = vadd.f32 1.0, %v8066_v61 }
0x106b   : > { %v5788_v63 = vpack.c.bf16 %v5736_v60, %v5732_v62  ;;  %v8070_v6 = vpop.eup %8069  ;;  %v5676_v45 = vadd.f32 1.0, %v8068_v2  ;;  %v5739_v23 = vmul.f32 %v5675_v36, %v5483_v31 }
0x106c   : > { %v5790_v47 = vpack.c.bf16 %v5738_v25, %v5734_v52  ;;  %v8072_v40 = vpop.eup %8071  ;;  %v5678_v12 = vadd.f32 1.0, %v8070_v6  ;;  %v5741_v39 = vmul.f32 %v5677_v44, %v5485_v59 }
0x106d   : > { %6122 = vmatprep.mubr.bf16.mxu1 %v5788_v63  ;;  %v8074_v13 = vpop.eup %8073  ;;  %v5679_v20 = vadd.f32 1.0, %v8072_v40  ;;  %v5740_v17 = vmul.f32 %v5676_v45, %v5484_v46 }
0x106e   : > { %6219 = vmatprep.mubr.bf16.mxu0 %v5790_v47  ;;  %6123 = vmatmul.mubr.bf16.gmra.mrb[128].mxu1 %v5787_v49  ;;  %v8076_v54 = vpop.eup %8075  ;;  %v5681_v1 = vadd.f32 1.0, %v8074_v13  ;;  %v5742_v57 = vmul.f32 %v5678_v12, %v5486_v15 }
0x106f   : > { %6220 = vmatmul.mubr.bf16.gmra.mrb[144].mxu0 %v5789_v50  ;;  %v5743_v21 = vmul.f32 %v5679_v20, %v5487_v41  ;;  %v5680_v35 = vadd.f32 1.0, %v8076_v54  ;;  %v8078_v10 = vpop.eup %8077 }
0x1070   : > { %v5745_v30 = vmul.f32 %v5681_v1, %v5489_v27  ;;  %v5682_v18 = vadd.f32 1.0, %v8078_v10 }
0x1071   : > { %v5744_v58 = vmul.f32 %v5680_v35, %v5488_v29  ;;  %v5791_v55 = vpack.c.bf16 %v5743_v21, %v5739_v23 }
0x1072   : > { %v5793_v42 = vpack.c.bf16 %v5745_v30, %v5741_v39  ;;  %v5746_v48 = vmul.f32 %v5682_v18, %v5490_v5 }
0x1073   : > { %v5792_v43 = vpack.c.bf16 %v5744_v58, %v5740_v17 }
0x1074   : > { %v5794_v62 = vpack.c.bf16 %v5746_v48, %v5742_v57 }
0x1075   : > { %6130 = vmatprep.mubr.bf16.mxu1 %v5792_v43 }
0x1076   : > { %6131 = vmatmul.mubr.bf16.gmra.mrb[132].mxu1 %v5791_v55  ;;  %6227 = vmatprep.mubr.bf16.mxu0 %v5794_v62 }
0x1077   : > { %6228 = vmatmul.mubr.bf16.gmra.mrb[148].mxu0 %v5793_v42 }
0x1084   : > { %v5307_v60 = vpop.f32.mrb[104].mxu1  ;;  %v5420_v49 = vpop.f32.mrb[120].mxu0 }
0x1085   : > { %v5308_v28 = vadd.f32 %v5307_v60, %v11036_v8  ;;  %v5421_v61 = vadd.f32 %v5420_v49, %v11038_v14  ;;  %v5309_v0 = vpop.f32.mrb[105].mxu1  ;;  %v5422_v52 = vpop.f32.mrb[121].mxu0 }
0x1086   : > { %v5310_v25 = vadd.f32 %v5309_v0, %v11040_v38  ;;  %v5423_v50 = vadd.f32 %v5422_v52, %v11042_v51  ;;  %v5311_v2 = vpop.f32.mrb[106].mxu1  ;;  %v5424_v63 = vpop.f32.mrb[122].mxu0 }
0x1087   : > { %v5555_v6 = vmul.f32 0.70710677, %v5308_v28  ;;  %v5557_v36 = vmul.f32 0.70710677, %v5421_v61  ;;  %v5312_v31 = vadd.f32 %v5311_v2, %v11036_v8  ;;  %v5425_v44 = vadd.f32 %v5424_v63, %v11038_v14  ;;  %v5313_v13 = vpop.f32.mrb[107].mxu1  ;;  %v5426_v59 = vpop.f32.mrb[123].mxu0 }
0x1088   : > { %v5556_v47 = vmul.f32 0.70710677, %v5310_v25  ;;  %v5558_v40 = vmul.f32 0.70710677, %v5423_v50  ;;  %v5314_v45 = vadd.f32 %v5313_v13, %v11040_v38  ;;  %v5427_v41 = vadd.f32 %v5426_v59, %v11042_v51 }
0x1089   : > { %8079 = verf.f32 %v5555_v6  ;;  %v5559_v20 = vmul.f32 0.70710677, %v5312_v31  ;;  %v5561_v54 = vmul.f32 0.70710677, %v5425_v44  ;;  %v5491_v55 = vmul.f32 0.5, %v5308_v28 }
0x108a   : > { %8081 = verf.f32 %v5557_v36  ;;  %v5560_v46 = vmul.f32 0.70710677, %v5314_v45  ;;  %v5562_v1 = vmul.f32 0.70710677, %v5427_v41  ;;  %v5493_v49 = vmul.f32 0.5, %v5421_v61 }
0x108b   : > { %8083 = verf.f32 %v5556_v47  ;;  %v5492_v0 = vmul.f32 0.5, %v5310_v25  ;;  %v5494_v52 = vmul.f32 0.5, %v5423_v50  ;;  %v5495_v63 = vmul.f32 0.5, %v5312_v31 }
0x108c   : > { %8085 = verf.f32 %v5558_v40  ;;  %v5317_v27 = vpop.f32.mrb[108].mxu1  ;;  %v5430_v23 = vpop.f32.mrb[124].mxu0  ;;  %v11163_v6 = vmul.f32 0.5, %v5425_v44  ;;  %v11166_v59 = vmul.f32 0.5, %v5314_v45 }
0x108d   : > { %8087 = verf.f32 %v5559_v20  ;;  %v5318_v29 = vadd.f32 %v5317_v27, %v11036_v8  ;;  %v5319_v12 = vpop.f32.mrb[109].mxu1  ;;  %v5431_v21 = vadd.f32 %v5430_v23, %v11038_v14  ;;  %v5432_v10 = vpop.f32.mrb[125].mxu0  ;;  %v11168_v20 = vmul.f32 0.5, %v5427_v41 }
0x108e   : > { %8089 = verf.f32 %v5561_v54  ;;  %v5320_v35 = vadd.f32 %v5319_v12, %v11040_v38  ;;  %v5321_v39 = vpop.f32.mrb[110].mxu1  ;;  %v5433_v30 = vadd.f32 %v5432_v10, %v11042_v51  ;;  %v5434_v5 = vpop.f32.mrb[126].mxu0 }
0x108f   : > { %8091 = verf.f32 %v5560_v46  ;;  %v5563_v15 = vmul.f32 0.70710677, %v5318_v29  ;;  %v5323_v17 = vpop.f32.mrb[111].mxu1  ;;  %v5565_v58 = vmul.f32 0.70710677, %v5431_v21  ;;  %v5436_v18 = vpop.f32.mrb[127].mxu0  ;;  %v5322_v48 = vadd.f32 %v5321_v39, %v11036_v8 }
0x1090   : > { %8093 = verf.f32 %v5562_v1  ;;  %v5564_v42 = vmul.f32 0.70710677, %v5320_v35  ;;  %v5566_v57 = vmul.f32 0.70710677, %v5433_v30  ;;  %v5435_v43 = vadd.f32 %v5434_v5, %v11038_v14 }
0x1091   : > { %8095 = verf.f32 %v5563_v15  ;;  %v5324_v62 = vadd.f32 %v5323_v17, %v11040_v38  ;;  %v5567_v28 = vmul.f32 0.70710677, %v5322_v48  ;;  %v5437_v36 = vadd.f32 %v5436_v18, %v11042_v51 }
0x1092   : > { %8097 = verf.f32 %v5565_v58  ;;  %v5569_v54 = vmul.f32 0.70710677, %v5435_v43  ;;  %v11170_v50 = vmul.f32 0.5, %v5318_v29  ;;  %v11172_v46 = vmul.f32 0.5, %v5431_v21 }
0x1093   : > { %v8080_v60 = vpop.eup %8079  ;;  %8099 = verf.f32 %v5564_v42  ;;  %v5568_v31 = vmul.f32 0.70710677, %v5324_v62  ;;  %v11174_v12 = vmul.f32 0.5, %v5320_v35  ;;  %v11176_v45 = vmul.f32 0.5, %v5433_v30 }
0x1094   : > { %v8082_v2 = vpop.eup %8081  ;;  %v5327_v47 = vpop.f32.mrb[112].mxu1  ;;  %8101 = verf.f32 %v5566_v57  ;;  %v5683_v23 = vadd.f32 1.0, %v8080_v60  ;;  %v5570_v29 = vmul.f32 0.70710677, %v5437_v36  ;;  %v11182_v30 = vmul.f32 0.5, %v5322_v48 }
0x1095   : > { %v5440_v40 = vpop.f32.mrb[128].mxu0  ;;  %v8084_v13 = vpop.eup %8083  ;;  %8103 = verf.f32 %v5567_v28  ;;  %v5685_v15 = vadd.f32 1.0, %v8082_v2  ;;  %v5328_v42 = vadd.f32 %v5327_v47, %v11036_v8  ;;  %v11184_v60 = vmul.f32 0.5, %v5435_v43 }
0x1096   : > { %v5329_v61 = vpop.f32.mrb[113].mxu1  ;;  %v8086_v25 = vpop.eup %8085  ;;  %8105 = verf.f32 %v5569_v54  ;;  %v5684_v5 = vadd.f32 1.0, %v8084_v13  ;;  %v5441_v35 = vadd.f32 %v5440_v40, %v11038_v14  ;;  %v11187_v13 = vmul.f32 %v5683_v23, %v5491_v55 }
0x1097   : > { %v5442_v44 = vpop.f32.mrb[129].mxu0  ;;  %v5331_v27 = vpop.f32.mrb[114].mxu1  ;;  %8107 = verf.f32 %v5568_v31  ;;  %v5686_v58 = vadd.f32 1.0, %v8086_v25  ;;  %v5330_v2 = vadd.f32 %v5329_v61, %v11040_v38  ;;  %v11189_v31 = vmul.f32 0.5, %v5324_v62 }
0x1098   : > { %v8088_v1 = vpop.eup %8087  ;;  %v5444_v41 = vpop.f32.mrb[130].mxu0  ;;  %8109 = verf.f32 %v5570_v29  ;;  %v5571_v25 = vmul.f32 0.70710677, %v5328_v42  ;;  %v11191_v37 = vmul.f32 %v5685_v15, %v5493_v49  ;;  %v11193_v47 = vmul.f32 %v5684_v5, %v5492_v0 }
0x1099   : > { %v5333_v10 = vpop.f32.mrb[115].mxu1  ;;  %v8090_v39 = vpop.eup %8089  ;;  %v5687_v18 = vadd.f32 1.0, %v8088_v1  ;;  %v11195_v40 = vmul.f32 0.5, %v5437_v36  ;;  %v5573_v48 = vmul.f32 0.70710677, %v5441_v35  ;;  %v11197_v53 = vmul.f32 %v5686_v58, %v5494_v52 }
0x109a   : > { %v11178_v21 = vpop.f32.mrb[131].mxu0  ;;  %v8092_v17 = vpop.eup %8091  ;;  %v5689_v54 = vadd.f32 1.0, %v8090_v39  ;;  %8111 = verf.f32 %v5571_v25  ;;  %v5572_v49 = vmul.f32 0.70710677, %v5330_v2  ;;  %v5445_v25 = vadd.f32 %v5444_v41, %v11038_v14 }
0x109b   : > { %v8094_v57 = vpop.eup %8093  ;;  %v11199_v61 = vmul.f32 %v5687_v18, %v5495_v63  ;;  %v5688_v55 = vadd.f32 1.0, %v8092_v17  ;;  %8113 = verf.f32 %v5573_v48  ;;  %v5443_v63 = vadd.f32 %v5442_v44, %v11042_v51 }
0x109c   : > { %v8096_v28 = vpop.eup %8095  ;;  %v5337_v43 = vpop.f32.mrb[116].mxu1  ;;  %v5690_v39 = vadd.f32 1.0, %v8094_v57  ;;  %v11206_v5 = vmul.f32 %v5689_v54, %v11163_v6  ;;  %v5332_v17 = vadd.f32 %v5331_v27, %v11036_v8  ;;  %8115 = verf.f32 %v5572_v49 }
0x109d   : > { %v8098_v1 = vpop.eup %8097  ;;  %v5450_v3 = vpop.f32.mrb[132].mxu0  ;;  %v5691_v4 = vadd.f32 1.0, %v8096_v28  ;;  %v5334_v48 = vadd.f32 %v5333_v10, %v11040_v38  ;;  %v5752_v6 = vmul.f32 %v5688_v55, %v11166_v59  ;;  %v5507_v54 = vmul.f32 0.5, %v5328_v42 }
0x109e   : > { %v8100_v29 = vpop.eup %8099  ;;  %v5339_v62 = vpop.f32.mrb[117].mxu1  ;;  %v5693_v52 = vadd.f32 1.0, %v8098_v1  ;;  %v11217_v1 = vmul.f32 0.5, %v5441_v35  ;;  %v5574_v44 = vmul.f32 0.70710677, %v5443_v63  ;;  %v5754_v27 = vmul.f32 %v5690_v39, %v11168_v20 }
0x109f   : > { %v5452_v23 = vpop.f32.mrb[133].mxu0  ;;  %v11201_v0 = vpop.f32.mrb[118].mxu1  ;;  %v5692_v28 = vadd.f32 1.0, %v8100_v29  ;;  %v11221_v33 = vmul.f32 %v5691_v4, %v11170_v50  ;;  %v11223_v56 = vmul.f32 0.5, %v5330_v2  ;;  %v5575_v29 = vmul.f32 0.70710677, %v5332_v17 }
0x10a0   : > { %v11203_v36 = vpop.f32.mrb[134].mxu0  ;;  %v8102_v15 = vpop.eup %8101  ;;  %v11226_v41 = vmul.f32 %v5693_v52, %v11172_v46  ;;  %8117 = verf.f32 %v5574_v44  ;;  %v5577_v49 = vmul.f32 0.70710677, %v5445_v25  ;;  %v5576_v55 = vmul.f32 0.70710677, %v5334_v48 }
0x10a1   : > { %v11210_v58 = vpop.f32.mrb[119].mxu1  ;;  %v11212_v18 = vpop.f32.mrb[135].mxu0  ;;  %v5694_v10 = vadd.f32 1.0, %v8102_v15  ;;  %v11229_v42 = vmul.f32 %v5692_v28, %v11174_v12  ;;  %8119 = verf.f32 %v5575_v29  ;;  %v5447_v4 = vadd.f32 %v11178_v21, %v11042_v51 }
0x10a2   : > { %v8104_v57 = vpop.eup %8103  ;;  %8121 = verf.f32 %v5577_v49  ;;  %v11234_v50 = vadd.f32 %v5337_v43, %v11036_v8  ;;  %v11237_v46 = vadd.f32 %v5450_v3, %v11038_v14  ;;  %v11240_v2 = vadd.f32 %v5339_v62, %v11040_v38 }
0x10a3   : > { %v8106_v7 = vpop.eup %8105  ;;  %v5695_v35 = vadd.f32 1.0, %v8104_v57  ;;  %8123 = verf.f32 %v5576_v55  ;;  %v11243_v15 = vmul.f32 %v5694_v10, %v11176_v45  ;;  %v11246_v52 = vadd.f32 %v5452_v23, %v11042_v51 }
0x10a4   : > { %v8108_v26 = vpop.eup %8107  ;;  %v5697_v20 = vadd.f32 1.0, %v8106_v7  ;;  %v11248_v57 = vmul.f32 0.5, %v5443_v63  ;;  %v5511_v43 = vmul.f32 0.5, %v5332_v17  ;;  %v5513_v28 = vmul.f32 0.5, %v5445_v25 }
0x10a5   : > { %v8110_v59 = vpop.eup %8109  ;;  %v5696_v39 = vadd.f32 1.0, %v8108_v26  ;;  %v5578_v26 = vmul.f32 0.70710677, %v5447_v4  ;;  %v5579_v3 = vmul.f32 0.70710677, %v11234_v50  ;;  %v11252_v44 = vmul.f32 %v5695_v35, %v11182_v30 }
0x10a6   : > { %v8112_v12 = vpop.eup %8111  ;;  %v5698_v7 = vadd.f32 1.0, %v8110_v59  ;;  %v11255_v62 = vmul.f32 %v5697_v20, %v11184_v60  ;;  %v5581_v45 = vmul.f32 0.70710677, %v11237_v46  ;;  %v5512_v49 = vmul.f32 0.5, %v5334_v48 }
0x10a7   : > { %v8114_v21 = vpop.eup %8113  ;;  %8125 = verf.f32 %v5578_v26  ;;  %v5760_v23 = vmul.f32 %v5696_v39, %v11189_v31  ;;  %v5699_v10 = vadd.f32 1.0, %v8112_v12  ;;  %v5580_v63 = vmul.f32 0.70710677, %v11240_v2 }
0x10a8   : > { %v8116_v29 = vpop.eup %8115  ;;  %v5762_v17 = vmul.f32 %v5698_v7, %v11195_v40  ;;  %v5701_v25 = vadd.f32 1.0, %v8114_v21  ;;  %v5514_v59 = vmul.f32 0.5, %v5447_v4  ;;  %v5582_v30 = vmul.f32 0.70710677, %v11246_v52 }
0x10a9   : > { %8127 = verf.f32 %v5579_v3  ;;  %v5796_v60 = vpack.c.bf16 %v5752_v6, %v11193_v47  ;;  %v5798_v35 = vpack.c.bf16 %v5754_v27, %v11197_v53  ;;  %v5342_v55 = vadd.f32 %v11201_v0, %v11036_v8 }
0x10aa   : > { %v8118_v20 = vpop.eup %8117  ;;  %v5700_v31 = vadd.f32 1.0, %v8116_v29  ;;  %8129 = verf.f32 %v5581_v45  ;;  %v5455_v48 = vadd.f32 %v11203_v36, %v11038_v14  ;;  %v5795_v40 = vpack.c.bf16 %v11199_v61, %v11187_v13 }
0x10ab   : > { %v8120_v39 = vpop.eup %8119  ;;  %v11270_v4 = vmul.f32 %v5699_v10, %v5507_v54  ;;  %8131 = verf.f32 %v5580_v63  ;;  %6138 = vmatprep.mubr.bf16.mxu1 %v5796_v60  ;;  %6235 = vmatprep.mubr.bf16.mxu0 %v5798_v35  ;;  %v5583_v47 = vmul.f32 0.70710677, %v5342_v55  ;;  %v5797_v53 = vpack.c.bf16 %v11206_v5, %v11191_v37 }
0x10ac   : > { %v8122_v8 = vpop.eup %8121  ;;  %v5703_v0 = vadd.f32 1.0, %v8120_v39  ;;  %8133 = verf.f32 %v5582_v30  ;;  %v5585_v6 = vmul.f32 0.70710677, %v5455_v48  ;;  %6139 = vmatmul.mubr.bf16.gmra.mrb[136].mxu1 %v5795_v40  ;;  %v5344_v14 = vadd.f32 %v11210_v58, %v11040_v38 }
0x10ad   : > { %v8124_v36 = vpop.eup %8123  ;;  %v11277_v13 = vmul.f32 %v5701_v25, %v11217_v1  ;;  %v5705_v61 = vadd.f32 1.0, %v8122_v8  ;;  %8135 = verf.f32 %v5583_v47  ;;  %6236 = vmatmul.mubr.bf16.gmra.mrb[152].mxu0 %v5797_v53  ;;  %v5457_v54 = vadd.f32 %v11212_v18, %v11042_v51 }
0x10ae   : > { %v5764_v37 = vmul.f32 %v5700_v31, %v11223_v56  ;;  %v5767_v5 = vmul.f32 %v5703_v0, %v5511_v43  ;;  %v5704_v27 = vadd.f32 1.0, %v8124_v36  ;;  %8137 = verf.f32 %v5585_v6 }
0x10af   : > { %v5702_v12 = vadd.f32 1.0, %v8118_v20  ;;  %v5769_v7 = vmul.f32 %v5705_v61, %v5513_v28  ;;  %v5584_v26 = vmul.f32 0.70710677, %v5344_v14  ;;  %v5586_v21 = vmul.f32 0.70710677, %v5457_v54 }
0x10b0   : > { %v5768_v58 = vmul.f32 %v5704_v27, %v5512_v49  ;;  %v5800_v1 = vpack.c.bf16 %v5760_v23, %v11229_v42  ;;  %v5802_v3 = vpack.c.bf16 %v5762_v17, %v11243_v15  ;;  %v5799_v45 = vpack.c.bf16 %v11252_v44, %v11221_v33 }
0x10b1   : > { %v8126_v38 = vpop.eup %8125  ;;  %8139 = verf.f32 %v5584_v26  ;;  %v5801_v56 = vpack.c.bf16 %v11255_v62, %v11226_v41  ;;  %v5803_v51 = vpack.c.bf16 %v5767_v5, %v11270_v4  ;;  %v5805_v43 = vpack.c.bf16 %v5769_v7, %v11277_v13  ;;  %v11297_v7 = vld [vmem:[%s759_s30] ss:$0 sm:$0xff] }
0x10b2   : > { %v5706_v29 = vadd.f32 1.0, %v8126_v38  ;;  %8141 = verf.f32 %v5586_v21  ;;  %6146 = vmatprep.mubr.bf16.mxu1 %v5800_v1  ;;  %6243 = vmatprep.mubr.bf16.mxu0 %v5802_v3  ;;  %v5804_v18 = vpack.c.bf16 %v5768_v58, %v5764_v37  ;;  %v5766_v42 = vmul.f32 %v5702_v12, %v11248_v57 }
0x10b3   : > { %v8128_v28 = vpop.eup %8127  ;;  %v5515_v17 = vmul.f32 0.5, %v11234_v50  ;;  %v5519_v25 = vmul.f32 0.5, %v5342_v55  ;;  %v5517_v60 = vmul.f32 0.5, %v11237_v46  ;;  %v5521_v57 = vmul.f32 0.5, %v5455_v48 }
0x10b4   : > { %v5770_v15 = vmul.f32 %v5706_v29, %v5514_v59  ;;  %v8130_v23 = vpop.eup %8129  ;;  %6147 = vmatmul.mubr.bf16.gmra.mrb[140].mxu1 %v5799_v45  ;;  %v5707_v41 = vadd.f32 1.0, %v8128_v28  ;;  %v5516_v8 = vmul.f32 0.5, %v11240_v2  ;;  %v5520_v0 = vmul.f32 0.5, %v5344_v14 }
0x10b5   : > { %v8132_v33 = vpop.eup %8131  ;;  %6244 = vmatmul.mubr.bf16.gmra.mrb[156].mxu0 %v5801_v56  ;;  %6154 = vmatprep.mubr.bf16.mxu1 %v5804_v18  ;;  %v5709_v49 = vadd.f32 1.0, %v8130_v23  ;;  %v5518_v55 = vmul.f32 0.5, %v11246_v52  ;;  %v5522_v36 = vmul.f32 0.5, %v5457_v54 }
0x10b6   : > { %v5806_v44 = vpack.c.bf16 %v5770_v15, %v5766_v42  ;;  %v8134_v10 = vpop.eup %8133  ;;  %v5771_v35 = vmul.f32 %v5707_v41, %v5515_v17  ;;  %v5708_v20 = vadd.f32 1.0, %v8132_v33 }
0x10b7   : > { %v8136_v62 = vpop.eup %8135  ;;  %v5773_v39 = vmul.f32 %v5709_v49, %v5517_v60  ;;  %v5710_v4 = vadd.f32 1.0, %v8134_v10 }
0x10b8   : > { %6251 = vmatprep.mubr.bf16.mxu0 %v5806_v44  ;;  %v8138_v63 = vpop.eup %8137  ;;  %v5711_v30 = vadd.f32 1.0, %v8136_v62  ;;  %v5772_v13 = vmul.f32 %v5708_v20, %v5516_v8 }
0x10b9   : > { %v5713_v59 = vadd.f32 1.0, %v8138_v63  ;;  %v5774_v37 = vmul.f32 %v5710_v4, %v5518_v55 }
0x10ba   : > { %v5775_v31 = vmul.f32 %v5711_v30, %v5519_v25 }
0x10bb   : > { %v8140_v40 = vpop.eup %8139  ;;  %v5777_v47 = vmul.f32 %v5713_v59, %v5521_v57 }
0x10bc   : > { %v8142_v53 = vpop.eup %8141  ;;  %v5712_v6 = vadd.f32 1.0, %v8140_v40  ;;  %6155 = vmatmul.mubr.bf16.gmra.mrb[144].mxu1 %v5803_v51  ;;  %v5807_v50 = vpack.c.bf16 %v5775_v31, %v5771_v35 }
0x10bd   : > { %v5714_v46 = vadd.f32 1.0, %v8142_v53  ;;  %6252 = vmatmul.mubr.bf16.gmra.mrb[160].mxu0 %v5805_v43  ;;  %v5809_v48 = vpack.c.bf16 %v5777_v47, %v5773_v39 }
0x10be   : > { %v5776_v61 = vmul.f32 %v5712_v6, %v5520_v0 }
0x10bf   : > { %v5778_v5 = vmul.f32 %v5714_v46, %v5522_v36 }
0x10c0   : > { %v5808_v27 = vpack.c.bf16 %v5776_v61, %v5772_v13 }
0x10c1   : > { %v5810_v12 = vpack.c.bf16 %v5778_v5, %v5774_v37 }
0x10c2   : > { %6162 = vmatprep.mubr.bf16.mxu1 %v5808_v27 }
0x10c3   : > { %6259 = vmatprep.mubr.bf16.mxu0 %v5810_v12 }
0x10c4   : > { %6163 = vmatmul.mubr.bf16.gmra.mrb[148].mxu1 %v5807_v50 }
0x10c5   : > { %6260 = vmatmul.mubr.bf16.gmra.mrb[164].mxu0 %v5809_v48 }
0x1115   : > { %v6961_v2 = vpop.f32.mrb[120].mxu1 }
0x1116   : > { %v7025_v14 = vpop.f32.mrb[136].mxu0  ;;  %v6962_v52 = vpop.f32.mrb[121].mxu1 }
0x1117   : > { %v6963_v54 = vadd.f32 %v6962_v52, %v6961_v2  ;;  %v7026_v26 = vpop.f32.mrb[137].mxu0  ;;  %v6964_v21 = vpop.f32.mrb[122].mxu1 }
0x1118   : > { %v7027_v38 = vadd.f32 %v7026_v26, %v7025_v14  ;;  %v7028_v58 = vpop.f32.mrb[138].mxu0  ;;  %v6965_v1 = vpop.f32.mrb[123].mxu1 }
0x1119   : > { %v6109_v3 = vadd.f32 %v6963_v54, %v11297_v7  ;;  %v6966_v45 = vadd.f32 %v6965_v1, %v6964_v21  ;;  %v7029_v29 = vpop.f32.mrb[139].mxu0 }
0x111a   : > { %v7030_v56 = vadd.f32 %v7029_v29, %v7028_v58 }
0x111b   : > { %v6206_v51 = vadd.f32 %v7027_v38, %v6109_v3  ;;  %v6112_v18 = vadd.f32 %v6966_v45, %v11297_v7 }
0x111d   : > { %v6268_v43 = vadd.f32 %v6206_v51, %v10761_v32  ;;  %v6209_v28 = vadd.f32 %v7030_v56, %v6112_v18  ;;  %v6967_v42 = vpop.f32.mrb[124].mxu1 }
0x111e   : > { %v6968_v23 = vpop.f32.mrb[125].mxu1  ;;  %v7031_v33 = vpop.f32.mrb[140].mxu0 }
0x111f   : > { %6284 = vst [vmem:[#allocation18] sm:$0xff] %v6268_v43  ;;  %v6269_v15 = vadd.f32 %v6209_v28, %v10766_v24  ;;  %v6969_v44 = vadd.f32 %v6968_v23, %v6967_v42  ;;  %v6970_v10 = vpop.f32.mrb[126].mxu1  ;;  %v7032_v41 = vpop.f32.mrb[141].mxu0 }
0x1120   : > { %v6971_v62 = vpop.f32.mrb[127].mxu1  ;;  %v7033_v63 = vadd.f32 %v7032_v41, %v7031_v33  ;;  %v7034_v17 = vpop.f32.mrb[142].mxu0 }
0x1121   : > { %6285 = vst [vmem:[#allocation18 + $0x8] sm:$0xff] %v6269_v15  ;;  %v6117_v49 = vadd.f32 %v6969_v44, %v11297_v7  ;;  %v6972_v25 = vadd.f32 %v6971_v62, %v6970_v10  ;;  %v7035_v30 = vpop.f32.mrb[143].mxu0 }
0x1122   : > { %v7036_v57 = vadd.f32 %v7035_v30, %v7034_v17 }
0x1123   : > { %v6214_v60 = vadd.f32 %v7033_v63, %v6117_v49  ;;  %v6120_v32 = vadd.f32 %v6972_v25, %v11297_v7  ;;  %v11622_v49 = vld [vmem:[#allocation64_spill] sm:$0xff] }
0x1125   : > { %v6270_v59 = vadd.f32 %v6214_v60, %v10782_v19  ;;  %v6217_v24 = vadd.f32 %v7036_v57, %v6120_v32  ;;  %v11623_v60 = vld [vmem:[#allocation66_spill] sm:$0xff] }
0x1127   : > { %6286 = vst [vmem:[#allocation18 + $0x10] sm:$0xff] %v6270_v59  ;;  %v6271_v35 = vadd.f32 %v6217_v24, %v10773_v9 }
0x1129   : > { %6287 = vst [vmem:[#allocation18 + $0x18] sm:$0xff] %v6271_v35 }
0x1141   : > { %v6973_v20 = vpop.f32.mrb[128].mxu1 }
0x1142   : > { %v7037_v31 = vpop.f32.mrb[144].mxu0  ;;  %v6974_v40 = vpop.f32.mrb[129].mxu1 }
0x1143   : > { %v6975_v39 = vadd.f32 %v6974_v40, %v6973_v20  ;;  %v7038_v4 = vpop.f32.mrb[145].mxu0  ;;  %v6976_v47 = vpop.f32.mrb[130].mxu1 }
0x1144   : > { %v7039_v53 = vadd.f32 %v7038_v4, %v7037_v31  ;;  %v7040_v8 = vpop.f32.mrb[146].mxu0  ;;  %v6977_v0 = vpop.f32.mrb[131].mxu1 }
0x1145   : > { %v6125_v6 = vadd.f32 %v6975_v39, %v11297_v7  ;;  %v6978_v50 = vadd.f32 %v6977_v0, %v6976_v47  ;;  %v7041_v55 = vpop.f32.mrb[147].mxu0  ;;  %v11624_v0 = vld [vmem:[#allocation65_spill] sm:$0xff] }
0x1146   : > { %v7042_v36 = vadd.f32 %v7041_v55, %v7040_v8 }
0x1147   : > { %v6222_v19 = vadd.f32 %v7039_v53, %v6125_v6  ;;  %v6128_v46 = vadd.f32 %v6978_v50, %v11297_v7 }
0x1149   : > { %v6272_v9 = vadd.f32 %v6222_v19, %v10821_v22  ;;  %v6225_v48 = vadd.f32 %v7042_v36, %v6128_v46  ;;  %v6979_v13 = vpop.f32.mrb[132].mxu1  ;;  %v11625_v46 = vld [vmem:[#allocation69_spill] sm:$0xff] }
0x114a   : > { %v6980_v37 = vpop.f32.mrb[133].mxu1  ;;  %v7043_v5 = vpop.f32.mrb[148].mxu0 }
0x114b   : > { %6288 = vst [vmem:[#allocation18 + $0x20] sm:$0xff] %v6272_v9  ;;  %v6273_v61 = vadd.f32 %v6225_v48, %v10825_v16  ;;  %v6981_v27 = vadd.f32 %v6980_v37, %v6979_v13  ;;  %v6982_v12 = vpop.f32.mrb[134].mxu1  ;;  %v7044_v2 = vpop.f32.mrb[149].mxu0 }
0x114c   : > { %v6983_v14 = vpop.f32.mrb[135].mxu1  ;;  %v7045_v54 = vadd.f32 %v7044_v2, %v7043_v5  ;;  %v7046_v26 = vpop.f32.mrb[150].mxu0 }
0x114d   : > { %6289 = vst [vmem:[#allocation18 + $0x28] sm:$0xff] %v6273_v61  ;;  %v6133_v52 = vadd.f32 %v6981_v27, %v11297_v7  ;;  %v6984_v21 = vadd.f32 %v6983_v14, %v6982_v12  ;;  %v7047_v38 = vpop.f32.mrb[151].mxu0 }
0x114e   : > { %v7048_v1 = vadd.f32 %v7047_v38, %v7046_v26 }
0x114f   : > { %v6230_v58 = vadd.f32 %v7045_v54, %v6133_v52  ;;  %v6136_v22 = vadd.f32 %v6984_v21, %v11297_v7  ;;  %v11626_v21 = vld [vmem:[#allocation67_spill] sm:$0xff] }
0x1151   : > { %v6274_v3 = vadd.f32 %v6230_v58, %v10836_v34  ;;  %v6233_v16 = vadd.f32 %v7048_v1, %v6136_v22 }
0x1153   : > { %6290 = vst [vmem:[#allocation18 + $0x30] sm:$0xff] %v6274_v3  ;;  %v6275_v45 = vadd.f32 %v6233_v16, %v10839_v11  ;;  %v11627_v16 = vld [vmem:[#allocation70_spill] sm:$0xff] }
0x1155   : > { %6291 = vst [vmem:[#allocation18 + $0x38] sm:$0xff] %v6275_v45 }
0x117f   : > { %v6985_v29 = vpop.f32.mrb[136].mxu1 }
0x1180   : > { %v7049_v56 = vpop.f32.mrb[152].mxu0  ;;  %v6986_v51 = vpop.f32.mrb[137].mxu1 }
0x1181   : > { %v6987_v18 = vadd.f32 %v6986_v51, %v6985_v29  ;;  %v7050_v43 = vpop.f32.mrb[153].mxu0  ;;  %v6988_v28 = vpop.f32.mrb[138].mxu1 }
0x1182   : > { %v7051_v42 = vadd.f32 %v7050_v43, %v7049_v56  ;;  %v7052_v15 = vpop.f32.mrb[154].mxu0  ;;  %v6989_v23 = vpop.f32.mrb[139].mxu1 }
0x1183   : > { %v6141_v33 = vadd.f32 %v6987_v18, %v11297_v7  ;;  %v6990_v44 = vadd.f32 %v6989_v23, %v6988_v28  ;;  %v7053_v10 = vpop.f32.mrb[155].mxu0 }
0x1184   : > { %v7054_v41 = vadd.f32 %v7053_v10, %v7052_v15 }
0x1185   : > { %v6238_v34 = vadd.f32 %v7051_v42, %v6141_v33  ;;  %v6144_v62 = vadd.f32 %v6990_v44, %v11297_v7 }
0x1187   : > { %v6276_v11 = vadd.f32 %v6238_v34, %v11622_v49  ;;  %v6241_v63 = vadd.f32 %v7054_v41, %v6144_v62  ;;  %v6991_v17 = vpop.f32.mrb[140].mxu1  ;;  %v11629_v41 = vld [vmem:[#allocation68_spill] sm:$0xff]  ;;  %v11630_v49 = vld [vmem:[#allocation51_spill] sm:$0xff] }
0x1188   : > { %v7055_v25 = vpop.f32.mrb[156].mxu0  ;;  %v6992_v30 = vpop.f32.mrb[141].mxu1 }
0x1189   : > { %6292 = vst [vmem:[#allocation18 + $0x40] sm:$0xff] %v6276_v11  ;;  %v6277_v32 = vadd.f32 %v6241_v63, %v11623_v60  ;;  %v6993_v57 = vadd.f32 %v6992_v30, %v6991_v17  ;;  %v7056_v59 = vpop.f32.mrb[157].mxu0  ;;  %v6994_v24 = vpop.f32.mrb[142].mxu1 }
0x118a   : > { %v7057_v35 = vadd.f32 %v7056_v59, %v7055_v25  ;;  %v7058_v20 = vpop.f32.mrb[158].mxu0  ;;  %v6995_v31 = vpop.f32.mrb[143].mxu1 }
0x118b   : > { %6293 = vst [vmem:[#allocation18 + $0x48] sm:$0xff] %v6277_v32  ;;  %v6149_v40 = vadd.f32 %v6993_v57, %v11297_v7  ;;  %v6996_v39 = vadd.f32 %v6995_v31, %v6994_v24  ;;  %v7059_v4 = vpop.f32.mrb[159].mxu0 }
0x118c   : > { %v7060_v47 = vadd.f32 %v7059_v4, %v7058_v20 }
0x118d   : > { %v6246_v53 = vadd.f32 %v7057_v35, %v6149_v40  ;;  %v6152_v8 = vadd.f32 %v6996_v39, %v11297_v7 }
0x118f   : > { %v6278_v6 = vadd.f32 %v6246_v53, %v11624_v0  ;;  %v6249_v50 = vadd.f32 %v7060_v47, %v6152_v8  ;;  %v6997_v55 = vpop.f32.mrb[144].mxu1 }
0x1190   : > { %v7061_v36 = vpop.f32.mrb[160].mxu0  ;;  %v6998_v19 = vpop.f32.mrb[145].mxu1 }
0x1191   : > { %6294 = vst [vmem:[#allocation18 + $0x50] sm:$0xff] %v6278_v6  ;;  %v6279_v9 = vadd.f32 %v6249_v50, %v11625_v46  ;;  %v6999_v48 = vadd.f32 %v6998_v19, %v6997_v55  ;;  %v7062_v13 = vpop.f32.mrb[161].mxu0  ;;  %v7000_v61 = vpop.f32.mrb[146].mxu1 }
0x1192   : > { %v7063_v37 = vadd.f32 %v7062_v13, %v7061_v36  ;;  %v7064_v5 = vpop.f32.mrb[162].mxu0  ;;  %v7001_v27 = vpop.f32.mrb[147].mxu1 }
0x1193   : > { %6295 = vst [vmem:[#allocation18 + $0x58] sm:$0xff] %v6279_v9  ;;  %v6157_v12 = vadd.f32 %v6999_v48, %v11297_v7  ;;  %v7002_v2 = vadd.f32 %v7001_v27, %v7000_v61  ;;  %v7065_v14 = vpop.f32.mrb[163].mxu0 }
0x1194   : > { %v7066_v52 = vadd.f32 %v7065_v14, %v7064_v5 }
0x1195   : > { %v6254_v54 = vadd.f32 %v7063_v37, %v6157_v12  ;;  %v6160_v26 = vadd.f32 %v7002_v2, %v11297_v7 }
0x1197   : > { %v6280_v38 = vadd.f32 %v6254_v54, %v11626_v21  ;;  %v6257_v58 = vadd.f32 %v7066_v52, %v6160_v26  ;;  %v7003_v22 = vpop.f32.mrb[148].mxu1 }
0x1198   : > { %v7067_v1 = vpop.f32.mrb[164].mxu0  ;;  %v7004_v3 = vpop.f32.mrb[149].mxu1 }
0x1199   : > { %6296 = vst [vmem:[#allocation18 + $0x60] sm:$0xff] %v6280_v38  ;;  %v6281_v45 = vadd.f32 %v6257_v58, %v11627_v16  ;;  %v7005_v29 = vadd.f32 %v7004_v3, %v7003_v22  ;;  %v7068_v56 = vpop.f32.mrb[165].mxu0  ;;  %v7006_v51 = vpop.f32.mrb[150].mxu1 }
0x119a   : > { %v7069_v18 = vadd.f32 %v7068_v56, %v7067_v1  ;;  %v7070_v43 = vpop.f32.mrb[166].mxu0  ;;  %v7007_v28 = vpop.f32.mrb[151].mxu1 }
0x119b   : > { %6297 = vst [vmem:[#allocation18 + $0x68] sm:$0xff] %v6281_v45  ;;  %v6165_v42 = vadd.f32 %v7005_v29, %v11297_v7  ;;  %v7008_v15 = vadd.f32 %v7007_v28, %v7006_v51  ;;  %v7071_v23 = vpop.f32.mrb[167].mxu0 }
0x119c   : > { %v7072_v33 = vadd.f32 %v7071_v23, %v7070_v43 }
0x119d   : > { %v6262_v44 = vadd.f32 %v7069_v18, %v6165_v42  ;;  %v6168_v10 = vadd.f32 %v7008_v15, %v11297_v7 }
0x119f   : > { %v6282_v34 = vadd.f32 %v6262_v44, %v11629_v41  ;;  %v6265_v62 = vadd.f32 %v7072_v33, %v6168_v10 }
0x11a1   : > { %6298 = vst [vmem:[#allocation18 + $0x70] sm:$0xff] %v6282_v34  ;;  %v6283_v11 = vadd.f32 %v6265_v62, %v11630_v49 }
0x11a3   : > { %6299 = vst [vmem:[#allocation18 + $0x78] sm:$0xff] %v6283_v11 }
0x11a4   : > { %8542 = shalt.err (!%p8539_p10)
}
0x11a5   : > { %s11631_s16 = sld [smem:[#allocation75_spill]] }
0x11ab   : > { %s8543_s21 = scalar_lea.hbm %s11631_s16, 2048 }
0x11ac   : > { %p8544_p1 = scmp.ne.s32.totalorder %s11631_s16, %s8543_s21  ;;  %p8549_p0 = scmp.lt.u32.totalorder %s8543_s21, %s11631_s16 }
0x11ae   : > { %p8545_p6 = pnand %p8544_p1, %p7508_p8 }
0x11b0   : > { %p8546_p7 = pneg %p8545_p6 }
0x11b2   : > { %p8551_p4 = pnand %p8549_p0, %p8546_p7 }
0x11b4   : > { %8554 = shalt.err (!%p8551_p4)
}
0x11b5   : > { %s8645_s25 = smov 128   ;;  %s8646_s20 = smov 8  }
0x11b6   : > { %7459 = dma.vmem_to_hbm [thread:$0]  (%p7508_p8), %s6311_s14, 2048, %s11631_s16, [#allocation4], %s8645_s25, %s8645_s25, %s8646_s20  }
0x11b7   : > { %8592 = dma.done.wait (%p7508_p8), [#allocation4], 2048  }
0x11b8   : > { %8594 = vsyncadd (%p7508_p8), [#allocation4], 4294965248 }
0x11b9 PF: > { %s11632_s30 = sld [smem:[#allocation26_spill]]  ;;  %s11633_s25 = sld [smem:[#allocation23_spill]] }
0x11ba   : > { %s11634_s26 = sld [smem:[#allocation24_spill]]  ;;  %s11635_s27 = sld [smem:[#allocation30_spill]] }
0x11bb   : > { %s11636_s18 = sld [smem:[#allocation28_spill]]  ;;  %s11637_s28 = smov %s8613_s29 }
0x11bf   : > { %s26_s30 = sadd.s32 1, %s11632_s30  }
0x11c0   : > { %p23_p9 = scmp.ge.s32.totalorder %s26_s30, 6  }
0x11c1   : > { %s11638_s29 = smov %s11636_s18 }
0x11c2   :  { %25 = sbr.rel (!%p23_p9) target bundleno = 11 (0xb), region = 233 }
0x11c9   :  { %6326 = vsyncpa [#allocation3], 1 }
0x11ca   :  { %6328 = vsyncpa [#allocation3 + $0x1], 1 }
0x11cb   :  { %6329 = vsyncpa [#allocation6], 1 }
0x11cc   :  { %6330 = vsyncpa [#allocation4], 1 }
0x11cd   :  { %6332 = vsyncpa [#allocation4 + $0x1], 1 }

</bundles_post_ra>
